<compile_context>
chip_gen: v5e
topology: v5e:2x2
jax: 0.10.0
libtpu: 0.0.40
codegen_flags: <defaults>
</compile_context>

<pallas_src>
import functools

import jax
import jax.numpy as jnp
from jax import lax
from jax.experimental import pallas as pl
from jax.experimental.pallas import tpu as pltpu


# ----------------------------------------------------------------------------
# Fused 16-layer conv chain + residual epilogue (single Pallas kernel)
# ----------------------------------------------------------------------------
def _make_fused_kernel(H, W, C, L, c_out, c_io, chunk):
    Hp, Wp = H + 2, W + 2
    flat = Hp * Wp                 # flattened padded spatial extent (lane axis)
    start = Wp + 1                 # flat index of (row 1, col 1)
    span = H * Wp - 2              # contiguous span covering every interior px
    n_chunks = pl.cdiv(span, chunk)
    assert L >= 4 and L % 2 == 0

    def kernel(x_ref, r_ref, w_ref, s_ref, m_ref,
               hres_ref, href_ref, fus_ref, buf0, buf1):
        # buf0's halo arrives already zero with the spatially pre-padded input
        # (written in full below); buf1 only needs its two end spans zeroed --
        # layer stores never touch them and the interior mask keeps the
        # inter-row halo columns zero every layer.
        zend = jnp.zeros((C, Wp + 1), jnp.float32)
        buf1[:, 0:Wp + 1] = zend
        buf1[:, start + span:flat] = zend

        buf0[...] = x_ref[0]       # channel-padded, spatially padded H_ini

        def conv_layer(src, dst, lay, relu):
            w_l = w_ref[lay]       # (C, 9C)  bias+BN folded, transposed
            s_l = s_ref[lay]       # (C, 1)
            for ci in range(n_chunks):            # static chunking of im2col
                off = ci * chunk
                size = min(chunk, span - off)
                # im2col: 9 statically lane-shifted slices of the flat padded
                # activation, stacked on the leading (9*C) contraction axis.
                cols = jnp.concatenate(
                    [src[:, dy * Wp + dx + off: dy * Wp + dx + off + size]
                     for dy in range(3) for dx in range(3)],
                    axis=0)                        # (9C, size)
                y = jnp.dot(w_l, cols,
                            preferred_element_type=jnp.float32)   # (C, size)
                y = y + s_l
                if relu:
                    y = jnp.maximum(y, 0.0)
                # Re-zero halo columns so SAME padding survives to next layer.
                y = y * m_ref[:, start + off: start + off + size]
                dst[:, start + off: start + off + size] = y

        # Bounded layer loop, two layers per step -> static ping-pong roles;
        # only the weight/shift index is dynamic.
        @pl.loop(0, L // 2 - 1)
        def _(i):
            conv_layer(buf0, buf1, 2 * i, relu=True)
            conv_layer(buf1, buf0, 2 * i + 1, relu=True)

        conv_layer(buf0, buf1, L - 2, relu=True)
        conv_layer(buf1, buf0, L - 1, relu=False)      # conv16: no ReLU

        # Fused residual epilogue (lane-dense, full-width stores; the wrapper
        # crops the spatial halo).
        hini = x_ref[0, 0:c_io]                        # H_ini, flat padded
        hres_ref[0] = buf0[0:c_out, :]
        href_ref[0] = r_ref[0] - hini
        fus_ref[0] = hini + buf0[0:c_io, :]

    return kernel


def _vmem_limit_bytes(H, W, C, L, c_io, c_out, chunk):
    up = lambda n, m: ((n + m - 1) // m) * m
    f32 = 4
    flat = up((H + 2) * (W + 2), 128)
    buf = C * flat * f32                               # one ping/pong buffer
    weights = L * C * (up(9 * C, 128) + 128) * f32     # resident W + shift
    io = (C + 3 * up(c_io, 8) + up(c_out, 8) + 8) * flat * f32
    t = up(min(chunk, (H + 2) * (W + 2)), 128)
    transient = (9 * C + 2 * C) * t * f32              # im2col + matmul result
    need = 2 * buf + weights + 2 * io + transient
    # At least the 32 MiB scoped default, capped below v7x physical VMEM.
    return int(min(max(need * 1.3, 32 * 2 ** 20), 60 * 2 ** 20))


def fused_drcnn_chain(x, r, mask, w_all, s_all, *, out_channels, H, W,
                      chunk=2048):
    """x: (N, C_mid, (H+2)*(W+2)) flat-padded H_ini; r, mask likewise flat."""
    N, C, flat = x.shape
    c_io = r.shape[1]
    L = w_all.shape[0]
    kernel = _make_fused_kernel(H, W, C, L, out_channels, c_io, chunk)
    span = H * (W + 2) - 2
    flops = 2 * N * L * (9 * C) * C * span
    bytes_accessed = 4 * (x.size + r.size + mask.size + w_all.size
                          + s_all.size + N * flat * (out_channels + 2 * c_io))
    return pl.pallas_call(
        kernel,
        out_shape=(jax.ShapeDtypeStruct((N, out_channels, flat), jnp.float32),
                   jax.ShapeDtypeStruct((N, c_io, flat), jnp.float32),
                   jax.ShapeDtypeStruct((N, c_io, flat), jnp.float32)),
        grid=(N,),
        in_specs=[
            pl.BlockSpec((1, C, flat), lambda n: (n, 0, 0)),
            pl.BlockSpec((1, c_io, flat), lambda n: (n, 0, 0)),
            # Constant index maps: weights / shifts / mask stay VMEM-resident.
            pl.BlockSpec((L, C, 9 * C), lambda n: (0, 0, 0)),
            pl.BlockSpec((L, C, 1), lambda n: (0, 0, 0)),
            pl.BlockSpec((1, flat), lambda n: (0, 0)),
        ],
        out_specs=(
            pl.BlockSpec((1, out_channels, flat), lambda n: (n, 0, 0)),
            pl.BlockSpec((1, c_io, flat), lambda n: (n, 0, 0)),
            pl.BlockSpec((1, c_io, flat), lambda n: (n, 0, 0)),
        ),
        scratch_shapes=[
            pltpu.VMEM((C, flat), jnp.float32),   # ping (zero halo)
            pltpu.VMEM((C, flat), jnp.float32),   # pong (zero halo)
        ],
        compiler_params=pltpu.CompilerParams(
            dimension_semantics=("parallel",),
            vmem_limit_bytes=_vmem_limit_bytes(H, W, C, L, c_io, out_channels,
                                               chunk)),
        cost_estimate=pl.CostEstimate(flops=flops, transcendentals=0,
                                      bytes_accessed=bytes_accessed),
    )(x, r, w_all, s_all, mask)


# ----------------------------------------------------------------------------
# Plain-JAX glue: bicubic upsample, guide normalisation, guided filter (NCHW)
# ----------------------------------------------------------------------------
def _box_mean(x, k):
    ones = jnp.ones_like(x)
    s = lax.reduce_window(x, 0.0, lax.add, (1, 1, k, k), (1, 1, 1, 1), "SAME")
    c = lax.reduce_window(ones, 0.0, lax.add, (1, 1, k, k), (1, 1, 1, 1),
                          "SAME")
    return s / c


def guided_filter(A, G, k, eps):
    """A: (N,C,H,W) image to filter; G: (N,1,H,W) guide (≈ imguidedfilter)."""
    mean_G = _box_mean(G, k)
    mean_A = _box_mean(A, k)
    corr_G = _box_mean(G * G, k)
    corr_GA = _box_mean(G * A, k)
    var_G = corr_G - mean_G * mean_G
    cov_GA = corr_GA - mean_G * mean_A
    a = cov_GA / (var_G + eps)
    b = mean_A - a * mean_G
    return _box_mean(a, k) * G + _box_mean(b, k)


def preprocess(batch_h, batch_p, hp_ratio):
    """Bicubic upsample + guide normalisation + guided filter; returns NCHW."""
    N, C, Hh, Wh = batch_h.shape
    h_up = jax.image.resize(batch_h, (N, C, Hh * hp_ratio, Wh * hp_ratio),
                            method="bicubic")
    # TODO(synk): cv2.createCLAHE has no JAX/Pallas equivalent; only the
    # subsequent per-image min/max normalisation of the guide band is applied.
    g = batch_p[:, 0:1]
    gmin = jnp.min(g, axis=(2, 3), keepdims=True)
    gmax = jnp.max(g, axis=(2, 3), keepdims=True)
    g = (g - gmin) / jnp.maximum(gmax - gmin, 1e-12)
    # TODO(synk): MATLAB imguidedfilter border handling is approximated with a
    # SAME-padded, count-normalised box filter.
    return guided_filter(h_up, g, 15, 1e-6)


# ----------------------------------------------------------------------------
# Parameters (deterministic, synthetic)
# ----------------------------------------------------------------------------
def init_params(key, in_channels, mid_channels, out_channels):
    chans = [in_channels] + [mid_channels] * 15 + [out_channels]
    keys = jax.random.split(key, 16)
    bn_eps = 1e-5
    layers = []
    for i in range(16):
        cin, cout = chans[i], chans[i + 1]
        wk, bk = jax.random.split(keys[i])
        fan_in = 9 * cin
        w = jax.random.normal(wk, (3, 3, cin, cout), jnp.float32) * jnp.sqrt(
            2.0 / fan_in)
        b = jax.random.normal(bk, (cout,), jnp.float32) * 0.01
        has_bn = 1 <= i <= 14                      # conv2 .. conv15 carry BN
        if has_bn:
            gamma = jnp.ones((cout,), jnp.float32)
            beta = jnp.zeros((cout,), jnp.float32)
            rmean = jnp.zeros((cout,), jnp.float32)
            rvar = jnp.ones((cout,), jnp.float32)
            scale = gamma / jnp.sqrt(rvar + bn_eps)
            shift = beta - rmean * scale
        else:
            scale = jnp.ones((cout,), jnp.float32)
            shift = jnp.zeros((cout,), jnp.float32)
        layers.append(dict(w=w, b=b, scale=scale, shift=shift,
                           relu=(i < 15)))         # conv16 has no ReLU
    return layers


def build_fused_params(params, mid_channels):
    """Fold bias+BN into weights, pad Cin/Cout to mid, transpose for the MXU."""
    ws, ss = [], []
    for layer in params:
        w = layer["w"] * layer["scale"][None, None, None, :]    # fold BN scale
        shift = layer["b"] * layer["scale"] + layer["shift"]    # fold bias
        cin, cout = w.shape[2], w.shape[3]
        w = jnp.pad(w, ((0, 0), (0, 0),
                        (0, mid_channels - cin), (0, mid_channels - cout)))
        shift = jnp.pad(shift, (0, mid_channels - cout))
        # (C_out, 9*C_in): column order (dy*3+dx)*C + cin matches the in-kernel
        # im2col concat order.
        ws.append(w.reshape(9 * mid_channels, mid_channels).T)
        ss.append(shift.reshape(mid_channels, 1))
    return jnp.stack(ws), jnp.stack(ss)      # (16, mid, 9*mid), (16, mid, 1)


# ----------------------------------------------------------------------------
# Forward pass
# ----------------------------------------------------------------------------
@functools.partial(jax.jit, static_argnames=("hp_ratio", "out_channels"))
def guided_drcnn_forward(w_all, shift_all, batch_h, batch_m, batch_p, batch_r,
                         *, hp_ratio, out_channels):
    del batch_m                                   # unused in reference forward
    H_ini = preprocess(batch_h, batch_p, hp_ratio)      # (N, in_C, H, W)
    N, cin, H, W = H_ini.shape
    mid = w_all.shape[1]
    Hp, Wp = H + 2, W + 2
    assert batch_r.shape[1] == cin and out_channels == cin

    # Channel-pad to mid (uniform 32-wide layers), add the spatial zero halo
    # once, flatten the padded spatial extent into one lane-dense axis.
    x = jnp.pad(H_ini, ((0, 0), (0, mid - cin), (1, 1), (1, 1)))
    x = x.reshape(N, mid, Hp * Wp)
    r = jnp.pad(batch_r, ((0, 0), (0, 0), (1, 1), (1, 1)))
    r = r.reshape(N, cin, Hp * Wp)
    mask = jnp.pad(jnp.ones((H, W), jnp.float32),
                   ((1, 1), (1, 1))).reshape(1, Hp * Wp)

    hres_f, href_f, fus_f = fused_drcnn_chain(
        x, r, mask, w_all, shift_all, out_channels=out_channels, H=H, W=W)

    def crop(t):
        n, c, _ = t.shape
        return t.reshape(n, c, Hp, Wp)[:, :, 1:H + 1, 1:W + 1]

    return crop(hres_f), crop(href_f), crop(fus_f)       # NCHW, like PyTorch


# ----------------------------------------------------------------------------
# Pure-JAX reference for the conv stack (correctness check only)
# ----------------------------------------------------------------------------
def _ref_conv_chain(params, H_ini):
    x = H_ini
    for layer in params:
        y = lax.conv_general_dilated(
            x, layer["w"], (1, 1), "SAME",
            dimension_numbers=("NCHW", "HWIO", "NCHW"))
        y = ((y + layer["b"][None, :, None, None])
             * layer["scale"][None, :, None, None]
             + layer["shift"][None, :, None, None])
        if layer["relu"]:
            y = jnp.maximum(y, 0.0)
        x = y
    return x


if __name__ == "__main__":
    N = 2
    in_channels = 4           # n_bands
    mid_channels = 32
    out_channels = 4
    hp_ratio = 4
    hm_ratio = 2
    n_select_bands = 1
    n_bands = in_channels
    Hh = Wh = 4                     # low-res hyperspectral
    Hf = Wf = Hh * hp_ratio         # 16  (pan / reference resolution)

    key = jax.random.PRNGKey(0)
    kp, kh, km, kpan, kr = jax.random.split(key, 5)
    params = init_params(kp, in_channels, mid_channels, out_channels)
    w_all, shift_all = build_fused_params(params, mid_channels)

    batch_h = jax.random.uniform(kh, (N, in_channels, Hh, Wh), jnp.float32)
    batch_m = jax.random.uniform(
        km, (N, n_bands, Hf // hm_ratio, Wf // hm_ratio), jnp.float32)
    batch_p = jax.random.uniform(kpan, (N, n_select_bands, Hf, Wf),
                                 jnp.float32)
    batch_r = jax.random.uniform(kr, (N, in_channels, Hf, Wf), jnp.float32)

    H_res, H_ref, fusion_out = guided_drcnn_forward(
        w_all, shift_all, batch_h, batch_m, batch_p, batch_r,
        hp_ratio=hp_ratio, out_channels=out_channels)
    jax.block_until_ready((H_res, H_ref, fusion_out))

    # Cross-check the fused Pallas conv chain against an XLA reference.
    H_ini = preprocess(batch_h, batch_p, hp_ratio)
    ref_res = _ref_conv_chain(params, H_ini)
    err_res = float(jnp.max(jnp.abs(H_res - ref_res)))
    assert err_res < 1e-2, f"conv chain max abs error {err_res}"

    ref_href = batch_r - H_ini
    ref_fus = H_ini + ref_res
    err_href = float(jnp.max(jnp.abs(H_ref - ref_href)))
    err_fus = float(jnp.max(jnp.abs(fusion_out - ref_fus)))
    assert err_href < 1e-3, f"H_ref max abs error {err_href}"
    assert err_fus < 2e-2, f"fusion_out max abs error {err_fus}"

    print("KERNEL_OK")
</pallas_src>

<mosaic_0001>
module attributes {stable_mosaic.version = 11 : i64} {
  func.func @kernel(%arg0: i32, %arg1: memref<1x32x324xf32, #tpu.memory_space<vmem>>, %arg2: memref<1x4x324xf32, #tpu.memory_space<vmem>>, %arg3: memref<16x32x288xf32, #tpu.memory_space<vmem>>, %arg4: memref<16x32x1xf32, #tpu.memory_space<vmem>>, %arg5: memref<1x324xf32, #tpu.memory_space<vmem>>, %arg6: memref<1x4x324xf32, #tpu.memory_space<vmem>>, %arg7: memref<1x4x324xf32, #tpu.memory_space<vmem>>, %arg8: memref<1x4x324xf32, #tpu.memory_space<vmem>>, %arg9: memref<32x324xf32, #tpu.memory_space<vmem>>, %arg10: memref<32x324xf32, #tpu.memory_space<vmem>>) attributes {dimension_semantics = [#tpu.dimension_semantics<parallel>], iteration_bounds = array<i64: 2>, scalar_prefetch = 0 : i64, scratch_operands = 2 : i64, tpu.core_type = #tpu.core_type<tc>, window_params = [{transform_indices = @transform_0, window_bounds = array<i64: 1, 32, 324>}, {transform_indices = @transform_1, window_bounds = array<i64: 1, 4, 324>}, {pipeline_mode = #tpu.pipeline_mode<synchronous>, transform_indices = @transform_2, window_bounds = array<i64: 16, 32, 288>}, {pipeline_mode = #tpu.pipeline_mode<synchronous>, transform_indices = @transform_3, window_bounds = array<i64: 16, 32, 1>}, {pipeline_mode = #tpu.pipeline_mode<synchronous>, transform_indices = @transform_4, window_bounds = array<i64: 1, 324>}, {transform_indices = @transform_5, window_bounds = array<i64: 1, 4, 324>}, {transform_indices = @transform_6, window_bounds = array<i64: 1, 4, 324>}, {transform_indices = @transform_7, window_bounds = array<i64: 1, 4, 324>}]} {
    %cst = arith.constant 0.000000e+00 : f32
    %0 = vector.broadcast %cst : f32 to vector<32x19xf32>
    %c0 = arith.constant 0 : index
    %c0_0 = arith.constant 0 : index
    %1 = vector.load %arg10[%c0, %c0_0] : memref<32x324xf32, #tpu.memory_space<vmem>>, vector<32x19xf32>
    tpu.vector_store %arg10[%c0, %c0_0], %0 {strides = array<i32>} : memref<32x324xf32, #tpu.memory_space<vmem>>, vector<32x19xf32>,
    %c0_1 = arith.constant 0 : index
    %c305 = arith.constant 305 : index
    %2 = vector.load %arg10[%c0_1, %c305] : memref<32x324xf32, #tpu.memory_space<vmem>>, vector<32x19xf32>
    tpu.vector_store %arg10[%c0_1, %c305], %0 {strides = array<i32>} : memref<32x324xf32, #tpu.memory_space<vmem>>, vector<32x19xf32>,
    %c0_2 = arith.constant 0 : index
    %c0_3 = arith.constant 0 : index
    %c0_4 = arith.constant 0 : index
    %3 = vector.load %arg1[%c0_2, %c0_3, %c0_4] : memref<1x32x324xf32, #tpu.memory_space<vmem>>, vector<1x32x324xf32>
    %4 = vector.shape_cast %3 : vector<1x32x324xf32> to vector<32x324xf32>
    %c0_5 = arith.constant 0 : index
    %c0_6 = arith.constant 0 : index
    %5 = vector.load %arg9[%c0_5, %c0_6] : memref<32x324xf32, #tpu.memory_space<vmem>>, vector<32x324xf32>
    tpu.vector_store %arg9[%c0_5, %c0_6], %4 {strides = array<i32>} : memref<32x324xf32, #tpu.memory_space<vmem>>, vector<32x324xf32>,
    %c0_i32 = arith.constant 0 : i32
    %c7_i32 = arith.constant 7 : i32
    %6 = arith.addi %c0_i32, %c7_i32 : i32
    %c1_i32 = arith.constant 1 : i32
    scf.for %arg11 = %c0_i32 to %6 step %c1_i32  : i32 {
      %c1_i32_76 = arith.constant 1 : i32
      %68 = arith.muli %arg11, %c1_i32_76 : i32
      %c0_i32_77 = arith.constant 0 : i32
      %69 = arith.addi %c0_i32_77, %68 : i32
      %c2_i32 = arith.constant 2 : i32
      %70 = arith.muli %c2_i32, %69 : i32
      %71 = arith.index_cast %70 : i32 to index
      %c0_78 = arith.constant 0 : index
      %c0_79 = arith.constant 0 : index
      %72 = vector.load %arg3[%71, %c0_78, %c0_79] : memref<16x32x288xf32, #tpu.memory_space<vmem>>, vector<1x32x288xf32>
      %73 = vector.shape_cast %72 : vector<1x32x288xf32> to vector<32x288xf32>
      %74 = arith.index_cast %70 : i32 to index
      %c0_80 = arith.constant 0 : index
      %c0_81 = arith.constant 0 : index
      %75 = vector.load %arg4[%74, %c0_80, %c0_81] : memref<16x32x1xf32, #tpu.memory_space<vmem>>, vector<1x32x1xf32>
      %76 = vector.shape_cast %75 : vector<1x32x1xf32> to vector<32x1xf32>
      %c0_82 = arith.constant 0 : index
      %c0_83 = arith.constant 0 : index
      %77 = vector.load %arg9[%c0_82, %c0_83] : memref<32x324xf32, #tpu.memory_space<vmem>>, vector<32x286xf32>
      %c0_84 = arith.constant 0 : index
      %c1_85 = arith.constant 1 : index
      %78 = vector.load %arg9[%c0_84, %c1_85] : memref<32x324xf32, #tpu.memory_space<vmem>>, vector<32x286xf32>
      %c0_86 = arith.constant 0 : index
      %c2_87 = arith.constant 2 : index
      %79 = vector.load %arg9[%c0_86, %c2_87] : memref<32x324xf32, #tpu.memory_space<vmem>>, vector<32x286xf32>
      %c0_88 = arith.constant 0 : index
      %c18_89 = arith.constant 18 : index
      %80 = vector.load %arg9[%c0_88, %c18_89] : memref<32x324xf32, #tpu.memory_space<vmem>>, vector<32x286xf32>
      %c0_90 = arith.constant 0 : index
      %c19_91 = arith.constant 19 : index
      %81 = vector.load %arg9[%c0_90, %c19_91] : memref<32x324xf32, #tpu.memory_space<vmem>>, vector<32x286xf32>
      %c0_92 = arith.constant 0 : index
      %c20_93 = arith.constant 20 : index
      %82 = vector.load %arg9[%c0_92, %c20_93] : memref<32x324xf32, #tpu.memory_space<vmem>>, vector<32x286xf32>
      %c0_94 = arith.constant 0 : index
      %c36_95 = arith.constant 36 : index
      %83 = vector.load %arg9[%c0_94, %c36_95] : memref<32x324xf32, #tpu.memory_space<vmem>>, vector<32x286xf32>
      %c0_96 = arith.constant 0 : index
      %c37_97 = arith.constant 37 : index
      %84 = vector.load %arg9[%c0_96, %c37_97] : memref<32x324xf32, #tpu.memory_space<vmem>>, vector<32x286xf32>
      %c0_98 = arith.constant 0 : index
      %c38_99 = arith.constant 38 : index
      %85 = vector.load %arg9[%c0_98, %c38_99] : memref<32x324xf32, #tpu.memory_space<vmem>>, vector<32x286xf32>
      %86 = tpu.concatenate %77, %78, %79, %80, %81, %82, %83, %84, %85 in 0 : vector<32x286xf32>, vector<32x286xf32>, vector<32x286xf32>, vector<32x286xf32>, vector<32x286xf32>, vector<32x286xf32>, vector<32x286xf32>, vector<32x286xf32>, vector<32x286xf32> -> vector<288x286xf32>
      %cst_100 = arith.constant dense<0.000000e+00> : vector<32x286xf32>
      %87 = tpu.matmul %73, %86, %cst_100 {dimension_numbers = #tpu.dot_dimension_numbers<[1], [0], [0], [1], [0, 0, 1, 1], [], []>} : vector<32x288xf32>, vector<288x286xf32>, vector<32x286xf32> -> vector<32x286xf32>
      %88 = vector.broadcast %76 : vector<32x1xf32> to vector<32x286xf32>
      %89 = arith.addf %87, %88 : vector<32x286xf32>
      %cst_101 = arith.constant 0.000000e+00 : f32
      %90 = vector.broadcast %cst_101 : f32 to vector<32x286xf32>
      %91 = arith.maximumf %89, %90 : vector<32x286xf32>
      %c0_102 = arith.constant 0 : index
      %c19_103 = arith.constant 19 : index
      %92 = vector.load %arg5[%c0_102, %c19_103] : memref<1x324xf32, #tpu.memory_space<vmem>>, vector<1x286xf32>
      %93 = vector.broadcast %92 : vector<1x286xf32> to vector<32x286xf32>
      %94 = arith.mulf %91, %93 : vector<32x286xf32>
      %c0_104 = arith.constant 0 : index
      %c19_105 = arith.constant 19 : index
      %95 = vector.load %arg10[%c0_104, %c19_105] : memref<32x324xf32, #tpu.memory_space<vmem>>, vector<32x286xf32>
      tpu.vector_store %arg10[%c0_104, %c19_105], %94 {strides = array<i32>} : memref<32x324xf32, #tpu.memory_space<vmem>>, vector<32x286xf32>,
      %c2_i32_106 = arith.constant 2 : i32
      %96 = arith.muli %c2_i32_106, %69 : i32
      %c1_i32_107 = arith.constant 1 : i32
      %97 = arith.addi %96, %c1_i32_107 : i32
      %98 = arith.index_cast %97 : i32 to index
      %c0_108 = arith.constant 0 : index
      %c0_109 = arith.constant 0 : index
      %99 = vector.load %arg3[%98, %c0_108, %c0_109] : memref<16x32x288xf32, #tpu.memory_space<vmem>>, vector<1x32x288xf32>
      %100 = vector.shape_cast %99 : vector<1x32x288xf32> to vector<32x288xf32>
      %101 = arith.index_cast %97 : i32 to index
      %c0_110 = arith.constant 0 : index
      %c0_111 = arith.constant 0 : index
      %102 = vector.load %arg4[%101, %c0_110, %c0_111] : memref<16x32x1xf32, #tpu.memory_space<vmem>>, vector<1x32x1xf32>
      %103 = vector.shape_cast %102 : vector<1x32x1xf32> to vector<32x1xf32>
      %c0_112 = arith.constant 0 : index
      %c0_113 = arith.constant 0 : index
      %104 = vector.load %arg10[%c0_112, %c0_113] : memref<32x324xf32, #tpu.memory_space<vmem>>, vector<32x286xf32>
      %c0_114 = arith.constant 0 : index
      %c1_115 = arith.constant 1 : index
      %105 = vector.load %arg10[%c0_114, %c1_115] : memref<32x324xf32, #tpu.memory_space<vmem>>, vector<32x286xf32>
      %c0_116 = arith.constant 0 : index
      %c2_117 = arith.constant 2 : index
      %106 = vector.load %arg10[%c0_116, %c2_117] : memref<32x324xf32, #tpu.memory_space<vmem>>, vector<32x286xf32>
      %c0_118 = arith.constant 0 : index
      %c18_119 = arith.constant 18 : index
      %107 = vector.load %arg10[%c0_118, %c18_119] : memref<32x324xf32, #tpu.memory_space<vmem>>, vector<32x286xf32>
      %c0_120 = arith.constant 0 : index
      %c19_121 = arith.constant 19 : index
      %108 = vector.load %arg10[%c0_120, %c19_121] : memref<32x324xf32, #tpu.memory_space<vmem>>, vector<32x286xf32>
      %c0_122 = arith.constant 0 : index
      %c20_123 = arith.constant 20 : index
      %109 = vector.load %arg10[%c0_122, %c20_123] : memref<32x324xf32, #tpu.memory_space<vmem>>, vector<32x286xf32>
      %c0_124 = arith.constant 0 : index
      %c36_125 = arith.constant 36 : index
      %110 = vector.load %arg10[%c0_124, %c36_125] : memref<32x324xf32, #tpu.memory_space<vmem>>, vector<32x286xf32>
      %c0_126 = arith.constant 0 : index
      %c37_127 = arith.constant 37 : index
      %111 = vector.load %arg10[%c0_126, %c37_127] : memref<32x324xf32, #tpu.memory_space<vmem>>, vector<32x286xf32>
      %c0_128 = arith.constant 0 : index
      %c38_129 = arith.constant 38 : index
      %112 = vector.load %arg10[%c0_128, %c38_129] : memref<32x324xf32, #tpu.memory_space<vmem>>, vector<32x286xf32>
      %113 = tpu.concatenate %104, %105, %106, %107, %108, %109, %110, %111, %112 in 0 : vector<32x286xf32>, vector<32x286xf32>, vector<32x286xf32>, vector<32x286xf32>, vector<32x286xf32>, vector<32x286xf32>, vector<32x286xf32>, vector<32x286xf32>, vector<32x286xf32> -> vector<288x286xf32>
      %cst_130 = arith.constant dense<0.000000e+00> : vector<32x286xf32>
      %114 = tpu.matmul %100, %113, %cst_130 {dimension_numbers = #tpu.dot_dimension_numbers<[1], [0], [0], [1], [0, 0, 1, 1], [], []>} : vector<32x288xf32>, vector<288x286xf32>, vector<32x286xf32> -> vector<32x286xf32>
      %115 = vector.broadcast %103 : vector<32x1xf32> to vector<32x286xf32>
      %116 = arith.addf %114, %115 : vector<32x286xf32>
      %cst_131 = arith.constant 0.000000e+00 : f32
      %117 = vector.broadcast %cst_131 : f32 to vector<32x286xf32>
      %118 = arith.maximumf %116, %117 : vector<32x286xf32>
      %c0_132 = arith.constant 0 : index
      %c19_133 = arith.constant 19 : index
      %119 = vector.load %arg5[%c0_132, %c19_133] : memref<1x324xf32, #tpu.memory_space<vmem>>, vector<1x286xf32>
      %120 = vector.broadcast %119 : vector<1x286xf32> to vector<32x286xf32>
      %121 = arith.mulf %118, %120 : vector<32x286xf32>
      %c0_134 = arith.constant 0 : index
      %c19_135 = arith.constant 19 : index
      %122 = vector.load %arg9[%c0_134, %c19_135] : memref<32x324xf32, #tpu.memory_space<vmem>>, vector<32x286xf32>
      tpu.vector_store %arg9[%c0_134, %c19_135], %121 {strides = array<i32>} : memref<32x324xf32, #tpu.memory_space<vmem>>, vector<32x286xf32>,
    }
    %c7_i32_7 = arith.constant 7 : i32
    %c14 = arith.constant 14 : index
    %c0_8 = arith.constant 0 : index
    %c0_9 = arith.constant 0 : index
    %7 = vector.load %arg3[%c14, %c0_8, %c0_9] : memref<16x32x288xf32, #tpu.memory_space<vmem>>, vector<1x32x288xf32>
    %8 = vector.shape_cast %7 : vector<1x32x288xf32> to vector<32x288xf32>
    %c14_10 = arith.constant 14 : index
    %c0_11 = arith.constant 0 : index
    %c0_12 = arith.constant 0 : index
    %9 = vector.load %arg4[%c14_10, %c0_11, %c0_12] : memref<16x32x1xf32, #tpu.memory_space<vmem>>, vector<1x32x1xf32>
    %10 = vector.shape_cast %9 : vector<1x32x1xf32> to vector<32x1xf32>
    %c0_13 = arith.constant 0 : index
    %c0_14 = arith.constant 0 : index
    %11 = vector.load %arg9[%c0_13, %c0_14] : memref<32x324xf32, #tpu.memory_space<vmem>>, vector<32x286xf32>
    %c0_15 = arith.constant 0 : index
    %c1 = arith.constant 1 : index
    %12 = vector.load %arg9[%c0_15, %c1] : memref<32x324xf32, #tpu.memory_space<vmem>>, vector<32x286xf32>
    %c0_16 = arith.constant 0 : index
    %c2 = arith.constant 2 : index
    %13 = vector.load %arg9[%c0_16, %c2] : memref<32x324xf32, #tpu.memory_space<vmem>>, vector<32x286xf32>
    %c0_17 = arith.constant 0 : index
    %c18 = arith.constant 18 : index
    %14 = vector.load %arg9[%c0_17, %c18] : memref<32x324xf32, #tpu.memory_space<vmem>>, vector<32x286xf32>
    %c0_18 = arith.constant 0 : index
    %c19 = arith.constant 19 : index
    %15 = vector.load %arg9[%c0_18, %c19] : memref<32x324xf32, #tpu.memory_space<vmem>>, vector<32x286xf32>
    %c0_19 = arith.constant 0 : index
    %c20 = arith.constant 20 : index
    %16 = vector.load %arg9[%c0_19, %c20] : memref<32x324xf32, #tpu.memory_space<vmem>>, vector<32x286xf32>
    %c0_20 = arith.constant 0 : index
    %c36 = arith.constant 36 : index
    %17 = vector.load %arg9[%c0_20, %c36] : memref<32x324xf32, #tpu.memory_space<vmem>>, vector<32x286xf32>
    %c0_21 = arith.constant 0 : index
    %c37 = arith.constant 37 : index
    %18 = vector.load %arg9[%c0_21, %c37] : memref<32x324xf32, #tpu.memory_space<vmem>>, vector<32x286xf32>
    %c0_22 = arith.constant 0 : index
    %c38 = arith.constant 38 : index
    %19 = vector.load %arg9[%c0_22, %c38] : memref<32x324xf32, #tpu.memory_space<vmem>>, vector<32x286xf32>
    %20 = tpu.concatenate %11, %12, %13, %14, %15, %16, %17, %18, %19 in 0 : vector<32x286xf32>, vector<32x286xf32>, vector<32x286xf32>, vector<32x286xf32>, vector<32x286xf32>, vector<32x286xf32>, vector<32x286xf32>, vector<32x286xf32>, vector<32x286xf32> -> vector<288x286xf32>
    %cst_23 = arith.constant dense<0.000000e+00> : vector<32x286xf32>
    %21 = tpu.matmul %8, %20, %cst_23 {dimension_numbers = #tpu.dot_dimension_numbers<[1], [0], [0], [1], [0, 0, 1, 1], [], []>} : vector<32x288xf32>, vector<288x286xf32>, vector<32x286xf32> -> vector<32x286xf32>
    %22 = vector.broadcast %10 : vector<32x1xf32> to vector<32x286xf32>
    %23 = arith.addf %21, %22 : vector<32x286xf32>
    %cst_24 = arith.constant 0.000000e+00 : f32
    %24 = vector.broadcast %cst_24 : f32 to vector<32x286xf32>
    %25 = arith.maximumf %23, %24 : vector<32x286xf32>
    %c0_25 = arith.constant 0 : index
    %c19_26 = arith.constant 19 : index
    %26 = vector.load %arg5[%c0_25, %c19_26] : memref<1x324xf32, #tpu.memory_space<vmem>>, vector<1x286xf32>
    %27 = vector.broadcast %26 : vector<1x286xf32> to vector<32x286xf32>
    %28 = arith.mulf %25, %27 : vector<32x286xf32>
    %c0_27 = arith.constant 0 : index
    %c19_28 = arith.constant 19 : index
    %29 = vector.load %arg10[%c0_27, %c19_28] : memref<32x324xf32, #tpu.memory_space<vmem>>, vector<32x286xf32>
    tpu.vector_store %arg10[%c0_27, %c19_28], %28 {strides = array<i32>} : memref<32x324xf32, #tpu.memory_space<vmem>>, vector<32x286xf32>,
    %c15 = arith.constant 15 : index
    %c0_29 = arith.constant 0 : index
    %c0_30 = arith.constant 0 : index
    %30 = vector.load %arg3[%c15, %c0_29, %c0_30] : memref<16x32x288xf32, #tpu.memory_space<vmem>>, vector<1x32x288xf32>
    %31 = vector.shape_cast %30 : vector<1x32x288xf32> to vector<32x288xf32>
    %c15_31 = arith.constant 15 : index
    %c0_32 = arith.constant 0 : index
    %c0_33 = arith.constant 0 : index
    %32 = vector.load %arg4[%c15_31, %c0_32, %c0_33] : memref<16x32x1xf32, #tpu.memory_space<vmem>>, vector<1x32x1xf32>
    %33 = vector.shape_cast %32 : vector<1x32x1xf32> to vector<32x1xf32>
    %c0_34 = arith.constant 0 : index
    %c0_35 = arith.constant 0 : index
    %34 = vector.load %arg10[%c0_34, %c0_35] : memref<32x324xf32, #tpu.memory_space<vmem>>, vector<32x286xf32>
    %c0_36 = arith.constant 0 : index
    %c1_37 = arith.constant 1 : index
    %35 = vector.load %arg10[%c0_36, %c1_37] : memref<32x324xf32, #tpu.memory_space<vmem>>, vector<32x286xf32>
    %c0_38 = arith.constant 0 : index
    %c2_39 = arith.constant 2 : index
    %36 = vector.load %arg10[%c0_38, %c2_39] : memref<32x324xf32, #tpu.memory_space<vmem>>, vector<32x286xf32>
    %c0_40 = arith.constant 0 : index
    %c18_41 = arith.constant 18 : index
    %37 = vector.load %arg10[%c0_40, %c18_41] : memref<32x324xf32, #tpu.memory_space<vmem>>, vector<32x286xf32>
    %c0_42 = arith.constant 0 : index
    %c19_43 = arith.constant 19 : index
    %38 = vector.load %arg10[%c0_42, %c19_43] : memref<32x324xf32, #tpu.memory_space<vmem>>, vector<32x286xf32>
    %c0_44 = arith.constant 0 : index
    %c20_45 = arith.constant 20 : index
    %39 = vector.load %arg10[%c0_44, %c20_45] : memref<32x324xf32, #tpu.memory_space<vmem>>, vector<32x286xf32>
    %c0_46 = arith.constant 0 : index
    %c36_47 = arith.constant 36 : index
    %40 = vector.load %arg10[%c0_46, %c36_47] : memref<32x324xf32, #tpu.memory_space<vmem>>, vector<32x286xf32>
    %c0_48 = arith.constant 0 : index
    %c37_49 = arith.constant 37 : index
    %41 = vector.load %arg10[%c0_48, %c37_49] : memref<32x324xf32, #tpu.memory_space<vmem>>, vector<32x286xf32>
    %c0_50 = arith.constant 0 : index
    %c38_51 = arith.constant 38 : index
    %42 = vector.load %arg10[%c0_50, %c38_51] : memref<32x324xf32, #tpu.memory_space<vmem>>, vector<32x286xf32>
    %43 = tpu.concatenate %34, %35, %36, %37, %38, %39, %40, %41, %42 in 0 : vector<32x286xf32>, vector<32x286xf32>, vector<32x286xf32>, vector<32x286xf32>, vector<32x286xf32>, vector<32x286xf32>, vector<32x286xf32>, vector<32x286xf32>, vector<32x286xf32> -> vector<288x286xf32>
    %cst_52 = arith.constant dense<0.000000e+00> : vector<32x286xf32>
    %44 = tpu.matmul %31, %43, %cst_52 {dimension_numbers = #tpu.dot_dimension_numbers<[1], [0], [0], [1], [0, 0, 1, 1], [], []>} : vector<32x288xf32>, vector<288x286xf32>, vector<32x286xf32> -> vector<32x286xf32>
    %45 = vector.broadcast %33 : vector<32x1xf32> to vector<32x286xf32>
    %46 = arith.addf %44, %45 : vector<32x286xf32>
    %c0_53 = arith.constant 0 : index
    %c19_54 = arith.constant 19 : index
    %47 = vector.load %arg5[%c0_53, %c19_54] : memref<1x324xf32, #tpu.memory_space<vmem>>, vector<1x286xf32>
    %48 = vector.broadcast %47 : vector<1x286xf32> to vector<32x286xf32>
    %49 = arith.mulf %46, %48 : vector<32x286xf32>
    %c0_55 = arith.constant 0 : index
    %c19_56 = arith.constant 19 : index
    %50 = vector.load %arg9[%c0_55, %c19_56] : memref<32x324xf32, #tpu.memory_space<vmem>>, vector<32x286xf32>
    tpu.vector_store %arg9[%c0_55, %c19_56], %49 {strides = array<i32>} : memref<32x324xf32, #tpu.memory_space<vmem>>, vector<32x286xf32>,
    %c0_57 = arith.constant 0 : index
    %c0_58 = arith.constant 0 : index
    %c0_59 = arith.constant 0 : index
    %51 = vector.load %arg1[%c0_57, %c0_58, %c0_59] : memref<1x32x324xf32, #tpu.memory_space<vmem>>, vector<1x4x324xf32>
    %52 = vector.shape_cast %51 : vector<1x4x324xf32> to vector<4x324xf32>
    %c0_60 = arith.constant 0 : index
    %c0_61 = arith.constant 0 : index
    %53 = vector.load %arg9[%c0_60, %c0_61] : memref<32x324xf32, #tpu.memory_space<vmem>>, vector<4x324xf32>
    %c0_62 = arith.constant 0 : index
    %c0_63 = arith.constant 0 : index
    %c0_64 = arith.constant 0 : index
    %54 = vector.load %arg6[%c0_62, %c0_63, %c0_64] : memref<1x4x324xf32, #tpu.memory_space<vmem>>, vector<1x4x324xf32>
    %55 = vector.shape_cast %54 : vector<1x4x324xf32> to vector<4x324xf32>
    %56 = vector.shape_cast %53 : vector<4x324xf32> to vector<1x4x324xf32>
    tpu.vector_store %arg6[%c0_62, %c0_63, %c0_64], %56 {strides = array<i32>} : memref<1x4x324xf32, #tpu.memory_space<vmem>>, vector<1x4x324xf32>,
    %c0_65 = arith.constant 0 : index
    %c0_66 = arith.constant 0 : index
    %c0_67 = arith.constant 0 : index
    %57 = vector.load %arg2[%c0_65, %c0_66, %c0_67] : memref<1x4x324xf32, #tpu.memory_space<vmem>>, vector<1x4x324xf32>
    %58 = vector.shape_cast %57 : vector<1x4x324xf32> to vector<4x324xf32>
    %59 = arith.subf %58, %52 : vector<4x324xf32>
    %c0_68 = arith.constant 0 : index
    %c0_69 = arith.constant 0 : index
    %c0_70 = arith.constant 0 : index
    %60 = vector.load %arg7[%c0_68, %c0_69, %c0_70] : memref<1x4x324xf32, #tpu.memory_space<vmem>>, vector<1x4x324xf32>
    %61 = vector.shape_cast %60 : vector<1x4x324xf32> to vector<4x324xf32>
    %62 = vector.shape_cast %59 : vector<4x324xf32> to vector<1x4x324xf32>
    tpu.vector_store %arg7[%c0_68, %c0_69, %c0_70], %62 {strides = array<i32>} : memref<1x4x324xf32, #tpu.memory_space<vmem>>, vector<1x4x324xf32>,
    %c0_71 = arith.constant 0 : index
    %c0_72 = arith.constant 0 : index
    %63 = vector.load %arg9[%c0_71, %c0_72] : memref<32x324xf32, #tpu.memory_space<vmem>>, vector<4x324xf32>
    %64 = arith.addf %52, %63 : vector<4x324xf32>
    %c0_73 = arith.constant 0 : index
    %c0_74 = arith.constant 0 : index
    %c0_75 = arith.constant 0 : index
    %65 = vector.load %arg8[%c0_73, %c0_74, %c0_75] : memref<1x4x324xf32, #tpu.memory_space<vmem>>, vector<1x4x324xf32>
    %66 = vector.shape_cast %65 : vector<1x4x324xf32> to vector<4x324xf32>
    %67 = vector.shape_cast %64 : vector<4x324xf32> to vector<1x4x324xf32>
    tpu.vector_store %arg8[%c0_73, %c0_74, %c0_75], %67 {strides = array<i32>} : memref<1x4x324xf32, #tpu.memory_space<vmem>>, vector<1x4x324xf32>,
    return
  }
  func.func @transform_0(%arg0: i32) -> (i32, i32, i32) {
    %c0_i32 = arith.constant 0 : i32
    %c0_i32_0 = arith.constant 0 : i32
    %c0_i32_1 = arith.constant 0 : i32
    return %arg0, %c0_i32, %c0_i32_0 : i32, i32, i32
  }
  func.func @transform_1(%arg0: i32) -> (i32, i32, i32) {
    %c0_i32 = arith.constant 0 : i32
    %c0_i32_0 = arith.constant 0 : i32
    %c0_i32_1 = arith.constant 0 : i32
    return %arg0, %c0_i32, %c0_i32_0 : i32, i32, i32
  }
  func.func @transform_2(%arg0: i32) -> (i32, i32, i32) {
    %c0_i32 = arith.constant 0 : i32
    %c0_i32_0 = arith.constant 0 : i32
    %c0_i32_1 = arith.constant 0 : i32
    %c0_i32_2 = arith.constant 0 : i32
    return %c0_i32, %c0_i32_0, %c0_i32_1 : i32, i32, i32
  }
  func.func @transform_3(%arg0: i32) -> (i32, i32, i32) {
    %c0_i32 = arith.constant 0 : i32
    %c0_i32_0 = arith.constant 0 : i32
    %c0_i32_1 = arith.constant 0 : i32
    %c0_i32_2 = arith.constant 0 : i32
    return %c0_i32, %c0_i32_0, %c0_i32_1 : i32, i32, i32
  }
  func.func @transform_4(%arg0: i32) -> (i32, i32) {
    %c0_i32 = arith.constant 0 : i32
    %c0_i32_0 = arith.constant 0 : i32
    %c0_i32_1 = arith.constant 0 : i32
    return %c0_i32, %c0_i32_0 : i32, i32
  }
  func.func @transform_5(%arg0: i32) -> (i32, i32, i32) {
    %c0_i32 = arith.constant 0 : i32
    %c0_i32_0 = arith.constant 0 : i32
    %c0_i32_1 = arith.constant 0 : i32
    return %arg0, %c0_i32, %c0_i32_0 : i32, i32, i32
  }
  func.func @transform_6(%arg0: i32) -> (i32, i32, i32) {
    %c0_i32 = arith.constant 0 : i32
    %c0_i32_0 = arith.constant 0 : i32
    %c0_i32_1 = arith.constant 0 : i32
    return %arg0, %c0_i32, %c0_i32_0 : i32, i32, i32
  }
  func.func @transform_7(%arg0: i32) -> (i32, i32, i32) {
    %c0_i32 = arith.constant 0 : i32
    %c0_i32_0 = arith.constant 0 : i32
    %c0_i32_1 = arith.constant 0 : i32
    return %arg0, %c0_i32, %c0_i32_0 : i32, i32, i32
  }
}

</mosaic_0001>

<bundles_post_ra>
// kernel: guided_drcnn_forward.1
= control target key start
LH: loop header
LB: loop body
LE: loop exit
PB: predicated region body
PF: predicated region fallthrough
CT: control target
= control target key end

     0   :  { %s4985_s24 = smov 0   ;;  %s7576_s0 = inlined_call_operand.vmem [shape: f32[2,32,324], index: 0, kind: input, shape index: {}]   ;;  %s7577_s1 = inlined_call_operand.vmem [shape: f32[2,4,324], index: 1, kind: input, shape index: {}]   ;;  %s7578_s2 = inlined_call_operand.vmem [shape: f32[16,32,288], index: 2, kind: input, shape index: {}]   ;;  %s7579_s3 = inlined_call_operand.vmem [shape: f32[16,32,1], index: 3, kind: input, shape index: {}]   ;;  %s7580_s4 = inlined_call_operand.vmem [shape: f32[1,324], index: 4, kind: input, shape index: {}]   ;;  %s7581_s5 = inlined_call_operand.vmem [shape: f32[2,4,324], index: 5, kind: output, shape index: {0}]   ;;  %s7582_s6 = inlined_call_operand.vmem [shape: f32[2,4,324], index: 6, kind: output, shape index: {1}]   ;;  %s7583_s7 = inlined_call_operand.vmem [shape: f32[2,4,324], index: 7, kind: output, shape index: {2}]  }
   0x1 LB: > { %s3752_s25 = sadd.s32 4294967295, %s4918_s24   ;;  %p3756_p0 = scmp.ge.s32.totalorder %s4918_s24, 1  ;;  %s4918_s24 = sphi %s4985_s24, %s18_s24  }
   0x2   : > { %p252_p1 = scmp.lt.s32.totalorder %s4918_s24, 3 }
   0x4   : > { %p253_p2 = pnand %p3756_p0, %p252_p1 }
   0x5   : > { %p299_p3 = scmp.lt.s32.totalorder (!%p253_p2), %s3752_s25, 1  ;;  %s5038_s20 = smov (!%p253_p2), 0  }
   0x6   : > { %256 = sbr.rel (%p253_p2) target bundleno = 2134 (0x856), region = 40 }
   0xb   : > { %vm324_vm0 = vcmask 154624   ;;  %v4924_v0 = vmov 0.0   ;;  %vm329_vm1 = vcmask 556424   ;;  %s7709_s25 = smov (!%p299_p3, %s3752_s25), 1  ;;  %vm348_vm2 = vcmask 556032  }
   0xc   : > { %325 = vst.msk [vmem:[#allocation3] sm:$0xff] %vm324_vm0, %v4924_v0  ;;  %s3903_s26 = smul.u32 96, %s7709_s25 }
   0xd   : > { %326 = vst.msk [vmem:[#allocation3 + $0x18] sm:$0xff] %vm324_vm0, %v4924_v0  ;;  %s3904_s27 = smul.u32 12, %s7709_s25 }
   0xe   : > { %327 = vst.msk [vmem:[#allocation3 + $0x30] sm:$0xff] %vm324_vm0, %v4924_v0  ;;  %s5000_s30 = scalar_lea.vmem %s7576_s0, %s3903_s26 }
   0xf   : > { %328 = vst.msk [vmem:[#allocation3 + $0x48] sm:$0xff] %vm324_vm0, %v4924_v0  ;;  %s5005_s10 = scalar_lea.vmem %s7577_s1, %s3904_s27  ;;  %s5010_s13 = scalar_lea.vmem %s7581_s5, %s3904_s27  ;;  %v334_v1 = vld [vmem:[%s5000_s30] sm:$0xff]  ;;  %v335_v2 = vld [vmem:[%s5000_s30 + $0x8] sm:$0xff]  ;;  %v336_v3 = vld [vmem:[%s5000_s30 + $0x10] sm:$0xff] }
  0x10   : > { %330 = vst.msk [vmem:[#allocation3 + $0x10] sm:$0xff] %vm329_vm1, %v4924_v0  ;;  %s5017_s16 = scalar_lea.vmem %s7582_s6, %s3904_s27  ;;  %s5022_s19 = scalar_lea.vmem %s7583_s7, %s3904_s27  ;;  %v337_v4 = vld [vmem:[%s5000_s30 + $0x18] sm:$0xff]  ;;  %v338_v5 = vld [vmem:[%s5000_s30 + $0x20] sm:$0xff]  ;;  %v339_v6 = vld [vmem:[%s5000_s30 + $0x28] sm:$0xff] }
  0x11   : > { %331 = vst.msk [vmem:[#allocation3 + $0x28] sm:$0xff] %vm329_vm1, %v4924_v0  ;;  %v340_v7 = vld [vmem:[%s5000_s30 + $0x30] sm:$0xff]  ;;  %v341_v8 = vld [vmem:[%s5000_s30 + $0x38] sm:$0xff]  ;;  %v342_v9 = vld [vmem:[%s5000_s30 + $0x40] sm:$0xff] }
  0x12   : > { %332 = vst.msk [vmem:[#allocation3 + $0x40] sm:$0xff] %vm329_vm1, %v4924_v0  ;;  %v343_v10 = vld [vmem:[%s5000_s30 + $0x48] sm:$0xff]  ;;  %v344_v11 = vld [vmem:[%s5000_s30 + $0x50] sm:$0xff]  ;;  %v345_v12 = vld [vmem:[%s5000_s30 + $0x58] sm:$0xff] }
  0x13   : > { %333 = vst.msk [vmem:[#allocation3 + $0x58] sm:$0xff] %vm329_vm1, %v4924_v0 }
  0x14   : > { %346 = vst [vmem:[#allocation2] sm:$0xff] %v334_v1 }
  0x15   : > { %347 = vst [vmem:[#allocation2 + $0x8] sm:$0xff] %v335_v2 }
  0x16   : > { %349 = vst.msk [vmem:[#allocation2 + $0x10] sm:$0xff] %vm348_vm2, %v336_v3 }
  0x17   : > { %350 = vst [vmem:[#allocation2 + $0x18] sm:$0xff] %v337_v4 }
  0x18   : > { %351 = vst [vmem:[#allocation2 + $0x20] sm:$0xff] %v338_v5 }
  0x19   : > { %352 = vst.msk [vmem:[#allocation2 + $0x28] sm:$0xff] %vm348_vm2, %v339_v6 }
  0x1a   : > { %353 = vst [vmem:[#allocation2 + $0x30] sm:$0xff] %v340_v7 }
  0x1b   : > { %354 = vst [vmem:[#allocation2 + $0x38] sm:$0xff] %v341_v8 }
  0x1c   : > { %355 = vst.msk [vmem:[#allocation2 + $0x40] sm:$0xff] %vm348_vm2, %v342_v9 }
  0x1d   : > { %356 = vst [vmem:[#allocation2 + $0x48] sm:$0xff] %v343_v10 }
  0x1e   : > { %357 = vst [vmem:[#allocation2 + $0x50] sm:$0xff] %v344_v11 }
  0x1f   : > { %358 = vst.msk [vmem:[#allocation2 + $0x58] sm:$0xff] %vm348_vm2, %v345_v12 }
  0x20 LB: >> { %v5047_v15 = vld [vmem:[#allocation2 + $0x20] sm:$0xff]  ;;  %v5051_v17 = vld [vmem:[#allocation2 + $0x28] sm:$0xff]  ;;  %s4925_s21 = smov 127   ;;  %v5072_v26 = vld [vmem:[#allocation2 + $0x10] sm:$0xff]  ;;  %s4926_s22 = smov 126   ;;  %vm750_vm3 = vcmask 736256   ;;  %s4922_s20 = sphi %s5038_s20, %s364_s20  }
  0x21   : >> { %v5053_v18 = vld [vmem:[#allocation2] sm:$0xff]  ;;  %v5055_v19 = vld [vmem:[#allocation2 + $0x8] sm:$0xff]  ;;  %v3952_v20 = vpack.i.bf16 %v5051_v17, %v5047_v15  ;;  %v5068_v24 = vld [vmem:[#allocation2 + $0x30] sm:$0xff]  ;;  %s4927_s23 = smov 110   ;;  %s4928_s25 = smov 90   ;;  %v4177_v46 = vpack.i.bf16 %v5072_v26, %v5051_v17  ;;  %vm525_vm4 = vcmask 900096  }
  0x22   : >> { %v3942_v21 = vpack.i.bf16 %v5055_v19, %v5053_v18  ;;  %v5070_v25 = vld [vmem:[#allocation2 + $0x38] sm:$0xff]  ;;  %s4929_s26 = smov 91   ;;  %v4072_v36 = vpack.i.bf16 %v5072_v26, %v5055_v19  ;;  %v4067_v37 = vpack.i.bf16 %v5068_v24, %v5051_v17  ;;  %s4930_s27 = smov 92   ;;  %vm791_vm5 = vcmask 261120  }
  0x23   : >> { %v5043_v13 = vld [vmem:[#allocation2 + $0x40] sm:$0xff]  ;;  %3953 = vrot.lane.b32.xlu1 %v3952_v20, %s4925_s21  ;;  %v5074_v27 = vld [vmem:[#allocation2 + $0x18] sm:$0xff]  ;;  %v3957_v29 = vpack.i.bf16 %v5070_v25, %v5068_v24  ;;  %s4931_s28 = smov 108   ;;  %s4932_s29 = smov 109   ;;  %vm705_vm6 = vcmask 744448   ;;  %vm480_vm7 = vcmask 1031168  }
  0x24   : >> { %v5045_v14 = vld [vmem:[#allocation2 + $0x48] sm:$0xff]  ;;  %3943 = vrot.lane.b32.xlu0 %v3942_v21, %s4925_s21  ;;  %v3947_v30 = vpack.i.bf16 %v5074_v27, %v5072_v26  ;;  %v4027_v32 = vpack.i.bf16 %v5047_v15, %v5074_v27  ;;  %v4057_v34 = vpack.i.bf16 %v5043_v13, %v5070_v25  ;;  %v4047_v35 = vpack.i.bf16 %v5051_v17, %v5043_v13  ;;  %s3868_s8 = smul.u32 192, %s4922_s20  ;;  %s3869_s14 = sshll.u32 %s4922_s20, 6 }
  0x25   : >> { %v3962_v16 = vpack.i.bf16 %v5045_v14, %v5043_v13  ;;  %v5064_v22 = vld [vmem:[#allocation2 + $0x50] sm:$0xff]  ;;  %v4012_v31 = vpack.i.bf16 %v5045_v14, %v5047_v15  ;;  %v4062_v38 = vpack.i.bf16 %v5047_v15, %v5045_v14  ;;  %v4077_v39 = vpack.i.bf16 %v5053_v18, %v5074_v27  ;;  %s5452_s18 = scalar_lea.vmem %s7579_s3, %s3869_s14  ;;  %s4934_s11 = smov 19  }
  0x26   : >> { %v5066_v23 = vld [vmem:[#allocation2 + $0x58] sm:$0xff]  ;;  %v4017_v33 = vpack.i.bf16 %v5064_v22, %v5045_v14  ;;  %s5233_s12 = scalar_lea.vmem %s7578_s2, %s3868_s8  ;;  %vm435_vm8 = vcmask 1039360   ;;  %vm660_vm9 = vcmask 752640   ;;  %vm615_vm10 = vcmask 883712   ;;  %s364_s20 = sadd.s32 1, %s4922_s20  }
  0x27   : >> { %3963 = vrot.lane.b32.xlu2 %v3962_v16, %s4925_s21  ;;  %v3967_v28 = vpack.i.bf16 %v5066_v23, %v5064_v22  ;;  %v4172_v47 = vpack.i.bf16 %v5043_v13, %v5066_v23  ;;  %vm570_vm11 = vcmask 891904   ;;  %vm1161_vm12 = vcmask 1047704   ;;  %p361_p4 = scmp.ge.s32.totalorder %s364_s20, 7  }
  0x28   : >> { %vm1164_vm13 = vcmask 400384   ;;  %s4935_s20 = smov (%p361_p4), 127   ;;  %vm3572_vm14 = vcmask (%p361_p4), 1043456   ;;  %vm3576_vm15 = vcmask (%p361_p4), 551936  }
  0x2b   : >> { %3958 = vrot.lane.b32.xlu1 %v3957_v29, %s4925_s21 }
  0x2c   : >> { %3948 = vrot.lane.b32.xlu0 %v3947_v30, %s4925_s21 }
  0x2f   : >> { %3968 = vrot.lane.b32.xlu2 %v3967_v28, %s4925_s21 }
  0x33   : >> { %3978 = vrot.lane.b32.xlu1 %v3947_v30, %s4926_s22 }
  0x34   : >> { %3973 = vrot.lane.b32.xlu0 %v3942_v21, %s4926_s22 }
  0x37   : >> { %3983 = vrot.lane.b32.xlu2 %v3952_v20, %s4926_s22 }
  0x3b   : >> { %3993 = vrot.lane.b32.xlu1 %v3962_v16, %s4926_s22 }
  0x3c   : >> { %3988 = vrot.lane.b32.xlu0 %v3957_v29, %s4926_s22 }
  0x3f   : >> { %3998 = vrot.lane.b32.xlu2 %v3967_v28, %s4926_s22 }
  0x43   : >> { %4008 = vrot.lane.b32.xlu1 %v3947_v30, %s4927_s23 }
  0x44   : >> { %4003 = vrot.lane.b32.xlu0 %v3942_v21, %s4927_s23 }
  0x47   : >> { %4013 = vrot.lane.b32.xlu2 %v4012_v31, %s4927_s23 }
  0x4b   : >> { %4023 = vrot.lane.b32.xlu1 %v3957_v29, %s4928_s25 }
  0x4c   : >> { %4018 = vrot.lane.b32.xlu0 %v4017_v33, %s4928_s25 }
  0x4f   : >> { %4028 = vrot.lane.b32.xlu2 %v4027_v32, %s4928_s25 }
  0x53   : >> { %4038 = vrot.lane.b32.xlu1 %v3942_v21, %s4928_s25 }
  0x54   : >> { %4033 = vrot.lane.b32.xlu0 %v3967_v28, %s4927_s23 }
  0x57   : >> { %4043 = vrot.lane.b32.xlu2 %v3957_v29, %s4927_s23 }
  0x5b   : >> { %4053 = vrot.lane.b32.xlu1 %v3967_v28, %s4929_s26 }
  0x5c   : >> { %4048 = vrot.lane.b32.xlu0 %v4047_v35, %s4927_s23 }
  0x5f   : >> { %4058 = vrot.lane.b32.xlu2 %v4057_v34, %s4929_s26 }
  0x63   : >> { %4068 = vrot.lane.b32.xlu1 %v4067_v37, %s4929_s26 }
  0x64   : >> { %4063 = vrot.lane.b32.xlu0 %v4062_v38, %s4929_s26 }
  0x67   : >> { %4073 = vrot.lane.b32.xlu2 %v4072_v36, %s4929_s26 }
  0x6b   : >> { %4083 = vrot.lane.b32.xlu1 %v3967_v28, %s4930_s27 }
  0x6c   : >> { %4078 = vrot.lane.b32.xlu0 %v4077_v39, %s4929_s26 }
  0x6f   : >> { %4088 = vrot.lane.b32.xlu2 %v4057_v34, %s4930_s27 }
  0x73   : >> { %4098 = vrot.lane.b32.xlu1 %v4067_v37, %s4930_s27 }
  0x74   : >> { %4093 = vrot.lane.b32.xlu0 %v4062_v38, %s4930_s27 }
  0x77   : >> { %4103 = vrot.lane.b32.xlu2 %v4072_v36, %s4930_s27 }
  0x7b   : >> { %4113 = vrot.lane.b32.xlu1 %v3967_v28, %s4931_s28 }
  0x7c   : >> { %4108 = vrot.lane.b32.xlu0 %v4077_v39, %s4930_s27 }
  0x7f   : >> { %4118 = vrot.lane.b32.xlu2 %v4057_v34, %s4931_s28 }
  0x81   : >> { %v5133_v40 = vpop.permute.xlu2 %3963 }
  0x83   : >> { %4128 = vrot.lane.b32.xlu1 %v4067_v37, %s4931_s28 }
  0x84   : >> { %4123 = vrot.lane.b32.xlu0 %v4062_v38, %s4931_s28 }
  0x87   : >> { %4133 = vrot.lane.b32.xlu2 %v4072_v36, %s4931_s28 }
  0x89   : >> { %v5138_v41 = vpop.permute.xlu2 %3968 }
  0x8b   : >> { %4143 = vrot.lane.b32.xlu1 %v3967_v28, %s4932_s29 }
  0x8c   : >> { %4138 = vrot.lane.b32.xlu0 %v4077_v39, %s4931_s28 }
  0x8f   : >> { %4148 = vrot.lane.b32.xlu2 %v4057_v34, %s4932_s29 }
  0x91   : >> { %v5143_v42 = vpop.permute.xlu2 %3983 }
  0x93   : >> { %4158 = vrot.lane.b32.xlu1 %v4067_v37, %s4932_s29 }
  0x94   : >> { %4153 = vrot.lane.b32.xlu0 %v4062_v38, %s4932_s29 }
  0x95   : >> { %v5148_v43 = vpop.permute.xlu1 %3953 }
  0x96   : >> { %v5150_v44 = vpop.permute.xlu0 %3943 }
  0x97   : >> { %4163 = vrot.lane.b32.xlu2 %v4072_v36, %s4932_s29 }
  0x99   : >> { %v5152_v45 = vpop.permute.xlu2 %3998 }
  0x9a   : >> { %v4000_v37 = vunpack.i.l.bf16 %v5152_v45 }
  0x9b   : >> { %4173 = vrot.lane.b32.xlu1 %v4172_v47, %s4928_s25 }
  0x9c   : >> { %4168 = vrot.lane.b32.xlu0 %v4077_v39, %s4932_s29 }
  0x9d   : >> { %v5161_v48 = vpop.permute.xlu1 %3958 }
  0x9e   : >> { %v5163_v49 = vpop.permute.xlu0 %3948 }
  0x9f   : >> { %4178 = vrot.lane.b32.xlu2 %v4177_v46, %s4928_s25 }
  0xa1   : >> { %v5165_v50 = vpop.permute.xlu2 %4013 }
  0xa2   : >> { %v4016_v9 = vunpack.i.h.bf16 %v5165_v50  ;;  %v4015_v28 = vunpack.i.l.bf16 %v5165_v50  ;;  %v5241_v50 = vld [vmem:[%s5233_s12 + $0x10] sm:$0xff] }
  0xa5   : >> { %v5167_v51 = vpop.permute.xlu1 %3978 }
  0xa6   : >> { %v5169_v52 = vpop.permute.xlu0 %3973 }
  0xa9   : >> { %v5171_v53 = vpop.permute.xlu2 %4028 }
  0xaa   : >> { %v7587_v59 = vunpack.i.h.bf16 %v5171_v53  ;;  %v4030_v60 = vunpack.i.l.bf16 %v5171_v53 }
  0xac   : >> { %v753_v6 = vsel %vm750_vm3, %v4030_v60, %v7587_v59 }
  0xad   : >> { %v5173_v54 = vpop.permute.xlu1 %3993 }
  0xae   : >> { %v5175_v55 = vpop.permute.xlu0 %3988  ;;  %v3996_v38 = vunpack.i.h.bf16 %v5173_v54 }
  0xaf   : >> { %v3991_v39 = vunpack.i.h.bf16 %v5175_v55  ;;  %v3990_v46 = vunpack.i.l.bf16 %v5175_v55  ;;  %v3971_v55 = vunpack.i.h.bf16 %v5138_v41 }
  0xb1   : >> { %v5177_v56 = vpop.permute.xlu2 %4043 }
  0xb2   : >> { %v4046_v7 = vunpack.i.h.bf16 %v5177_v56  ;;  %v4045_v8 = vunpack.i.l.bf16 %v5177_v56 }
  0xb4   : >> { %v530_v29 = vsel %vm525_vm4, %v4045_v8, %v4046_v7 }
  0xb5   : >> { %v5179_v57 = vpop.permute.xlu1 %4008 }
  0xb6   : >> { %v5181_v58 = vpop.permute.xlu0 %4003  ;;  %v4011_v30 = vunpack.i.h.bf16 %v5179_v57 }
  0xb7   : >> { %v4006_v35 = vunpack.i.h.bf16 %v5181_v58  ;;  %v4005_v36 = vunpack.i.l.bf16 %v5181_v58 }
  0xb8   : >> { %v528_v47 = vsel %vm525_vm4, %v4011_v30, %v4015_v28  ;;  %v487_v30 = vsel %vm480_vm7, %v3996_v38, %v4000_v37 }
  0xb9   : >> { %v5189_v63 = vpop.permute.xlu2 %4058 }
  0xba   : >> { %v7593_v56 = vunpack.i.h.bf16 %v5189_v63  ;;  %v4060_v58 = vunpack.i.l.bf16 %v5189_v63 }
  0xbc   : >> { %v711_v38 = vsel %vm705_vm6, %v4060_v58, %v7593_v56  ;;  %v3945_v56 = vunpack.i.l.bf16 %v5150_v44 }
  0xbd   : >> { %v5185_v61 = vpop.permute.xlu1 %4023 }
  0xbe   : >> { %v5187_v62 = vpop.permute.xlu0 %4018  ;;  %v7591_v0 = vunpack.i.h.bf16 %v5185_v61  ;;  %v4025_v1 = vunpack.i.l.bf16 %v5185_v61 }
  0xbf   : >> { %v7592_v2 = vunpack.i.h.bf16 %v5187_v62  ;;  %v4020_v3 = vunpack.i.l.bf16 %v5187_v62 }
  0xc0   : >> { %v755_v5 = vsel %vm750_vm3, %v4025_v1, %v7591_v0  ;;  %v3946_v0 = vunpack.i.h.bf16 %v5150_v44 }
  0xc1   : >> { %v757_v4 = vsel %vm750_vm3, %v4020_v3, %v7592_v2  ;;  %v5219_v31 = vpop.permute.xlu2 %4073  ;;  %v526_v3 = vsel %vm525_vm4, %v4005_v36, %v4006_v35  ;;  %v3975_v36 = vunpack.i.l.bf16 %v5169_v52 }
  0xc2   : >> { %874 = vmatpush.msra.mxu2 %v757_v4 }
  0xc4   : >> { %875 = vmatpush.msra.mxu2 %v755_v5 }
  0xc5   : >> { %v5207_v10 = vpop.permute.xlu1 %4038 }
  0xc6   : >> { %v5209_v11 = vpop.permute.xlu0 %4033  ;;  %876 = vmatpush.msra.mxu2 %v753_v6  ;;  %v7584_v12 = vunpack.i.h.bf16 %v5207_v10  ;;  %v4040_v16 = vunpack.i.l.bf16 %v5207_v10 }
  0xc7   : >> { %v7588_v20 = vunpack.i.h.bf16 %v5209_v11  ;;  %v4035_v21 = vunpack.i.l.bf16 %v5209_v11 }
  0xc8   : >> { %v751_v33 = vsel %vm750_vm3, %v4040_v16, %v7584_v12  ;;  %v7589_v16 = vunpack.i.h.bf16 %v5152_v45  ;;  %v5285_v12 = vld [vmem:[%s5233_s12 + $0x28] sm:$0xff] }
  0xc9   : >> { %v532_v32 = vsel %vm525_vm4, %v4016_v9, %v4035_v21  ;;  %v533_v34 = vsel %vm525_vm4, %v4035_v21, %v7588_v20  ;;  %877 = vmatpush.msra.mxu2 %v751_v33  ;;  %v3985_v9 = vunpack.i.l.bf16 %v5143_v42  ;;  %v3981_v21 = vunpack.i.h.bf16 %v5167_v51 }
  0xca   : >> { %804 = vmatpush.msra.mxu0 %v532_v32  ;;  %891 = vmatpush.msra.mxu3 %v533_v34  ;;  %v3976_v34 = vunpack.i.h.bf16 %v5169_v52 }
  0xcb   : >> { %3766 = vmatmul.msk.f32.vlgmr.msra.gmra.mxu2 %vm791_vm5, %v5241_v50 }
  0xcc   : >> { %805 = vmatpush.msra.mxu0 %v530_v29  ;;  %v7590_v29 = vunpack.i.l.bf16 %v5179_v57 }
  0xcd   : >> { %v5245_v60 = vpop.permute.xlu1 %4053 }
  0xce   : >> { %v5247_v1 = vpop.permute.xlu0 %4048  ;;  %806 = vmatpush.msra.mxu0 %v528_v47  ;;  %v4056_v4 = vunpack.i.h.bf16 %v5245_v60  ;;  %v4055_v5 = vunpack.i.l.bf16 %v5245_v60  ;;  %v5274_v47 = vpop.permute.xlu2 %4088 }
  0xcf   : >> { %v7586_v6 = vunpack.i.h.bf16 %v5247_v1  ;;  %v7585_v8 = vunpack.i.l.bf16 %v5247_v1 }
  0xd0   : >> { %807 = vmatpush.msra.mxu0 %v526_v3  ;;  %v713_v33 = vsel %vm705_vm6, %v4055_v5, %v4056_v4 }
  0xd1   : >> { %v531_v32 = vsel %vm525_vm4, %v4046_v7, %v7585_v8  ;;  %920 = vmatpush.msrb.mxu2 %v713_v33  ;;  %v485_v7 = vsel %vm480_vm7, %v3990_v46, %v3991_v39  ;;  %v529_v3 = vsel %vm525_vm4, %v4015_v28, %v7586_v6  ;;  %v3960_v8 = vunpack.i.l.bf16 %v5161_v48 }
  0xd2   : >> { %808 = vmatpush.msra.mxu0 %v487_v30  ;;  %892 = vmatpush.msra.mxu3 %v531_v32  ;;  %v3966_v30 = vunpack.i.h.bf16 %v5133_v40  ;;  %v3970_v32 = vunpack.i.l.bf16 %v5138_v41  ;;  %v483_v33 = vsel %vm480_vm7, %v3981_v21, %v3985_v9  ;;  %v527_v46 = vsel %vm525_vm4, %v4006_v35, %v7590_v29 }
  0xd3   : >> { %v488_v28 = vsel %vm480_vm7, %v4000_v37, %v7589_v16  ;;  %921 = vmatpush.msrb.mxu2 %v711_v38  ;;  %v4075_v6 = vunpack.i.l.bf16 %v5219_v31  ;;  %v481_v35 = vsel %vm480_vm7, %v3975_v36, %v3976_v34  ;;  %v7594_v29 = vunpack.i.h.bf16 %v5143_v42 }
  0xd4   : >> { %809 = vmatpush.msra.mxu0 %v485_v7  ;;  %893 = vmatpush.msra.mxu3 %v529_v3  ;;  %v3995_v7 = vunpack.i.l.bf16 %v5173_v54  ;;  %v4076_v3 = vunpack.i.h.bf16 %v5219_v31  ;;  %v3961_v36 = vunpack.i.h.bf16 %v5161_v48  ;;  %v443_v52 = vsel %vm435_vm8, %v3970_v32, %v3971_v55 }
  0xd5   : >> { %v5300_v59 = vpop.permute.xlu1 %4068  ;;  %3767 = vmatmul.msk.f32.gmra.mxu2 %vm791_vm5, %v5285_v12 }
  0xd6   : >> { %v4064_v20 = vpop.permute.xlu0 %4063  ;;  %810 = vmatpush.msra.mxu0 %v483_v33  ;;  %894 = vmatpush.msra.mxu3 %v527_v46  ;;  %v4071_v21 = vunpack.i.h.bf16 %v5300_v59  ;;  %v4070_v37 = vunpack.i.l.bf16 %v5300_v59  ;;  %v442_v33 = vsel %vm435_vm8, %v3966_v30, %v3970_v32  ;;  %v3951_v46 = vunpack.i.h.bf16 %v5163_v49 }
  0xd7   : >> { %v4066_v38 = vunpack.i.h.bf16 %v4064_v20  ;;  %v4065_v16 = vunpack.i.l.bf16 %v4064_v20  ;;  %v486_v48 = vsel %vm480_vm7, %v3991_v39, %v3995_v7  ;;  %v440_v30 = vsel %vm435_vm8, %v3960_v8, %v3961_v36 }
  0xd8   : >> { %811 = vmatpush.msra.mxu0 %v481_v35  ;;  %895 = vmatpush.msra.mxu3 %v488_v28  ;;  %v3980_v35 = vunpack.i.l.bf16 %v5167_v51  ;;  %v484_v39 = vsel %vm480_vm7, %v3985_v9, %v7594_v29  ;;  %v5344_v28 = vld [vmem:[%s5233_s12 + $0x40] sm:$0xff]  ;;  %v4090_v8 = vunpack.i.l.bf16 %v5274_v47 }
  0xd9   : >> { %v712_v2 = vsel %vm705_vm6, %v4065_v16, %v4055_v5  ;;  %v709_v20 = vsel %vm705_vm6, %v4066_v38, %v4070_v37  ;;  %v707_v5 = vsel %vm705_vm6, %v4075_v6, %v4076_v3  ;;  %v3955_v16 = vunpack.i.l.bf16 %v5148_v43 }
  0xda   : >> { %812 = vmatpush.msra.mxu0 %v442_v33  ;;  %833 = vmatpush.msra.mxu1 %v712_v2  ;;  %v710_v2 = vsel %vm705_vm6, %v4071_v21, %v4060_v58  ;;  %v4091_v33 = vunpack.i.h.bf16 %v5274_v47  ;;  %v3965_v21 = vunpack.i.l.bf16 %v5133_v40  ;;  %v482_v9 = vsel %vm480_vm7, %v3976_v34, %v3980_v35 }
  0xdb   : >> { %896 = vmatpush.msra.mxu3 %v486_v48  ;;  %922 = vmatpush.msrb.mxu2 %v709_v20  ;;  %v5348_v20 = vpop.permute.xlu2 %4103  ;;  %v438_v58 = vsel %vm435_vm8, %v3951_v46, %v3955_v16 }
  0xdc   : >> { %813 = vmatpush.msra.mxu0 %v440_v30  ;;  %834 = vmatpush.msra.mxu1 %v710_v2  ;;  %v436_v2 = vsel %vm435_vm8, %v3945_v56, %v3946_v0 }
  0xdd   : >> { %897 = vmatpush.msra.mxu3 %v484_v39  ;;  %923 = vmatpush.msrb.mxu2 %v707_v5  ;;  %v5352_v48 = vpop.permute.xlu1 %4083 }
  0xde   : >> { %v4079_v30 = vpop.permute.xlu0 %4078  ;;  %814 = vmatpush.msra.mxu0 %v438_v58  ;;  %v4086_v46 = vunpack.i.h.bf16 %v5352_v48  ;;  %v4085_v5 = vunpack.i.l.bf16 %v5352_v48  ;;  %3768 = vmatmul.msk.f32.gmra.mxu2 %vm791_vm5, %v5344_v28  ;;  %v3956_v58 = vunpack.i.h.bf16 %v5148_v43 }
  0xdf   : >> { %v4081_v39 = vunpack.i.h.bf16 %v4079_v30  ;;  %v4080_v29 = vunpack.i.l.bf16 %v4079_v30  ;;  %898 = vmatpush.msra.mxu3 %v482_v9  ;;  %v666_v30 = vsel %vm660_vm9, %v4090_v8, %v4091_v33  ;;  %v3950_v9 = vunpack.i.l.bf16 %v5163_v49 }
  0xe0   : >> { %815 = vmatpush.msra.mxu0 %v436_v2  ;;  %v668_v56 = vsel %vm660_vm9, %v4085_v5, %v4086_v46  ;;  %v441_v2 = vsel %vm435_vm8, %v3961_v36, %v3965_v21  ;;  %v4105_v36 = vunpack.i.l.bf16 %v5348_v20 }
  0xe1   : >> { %899 = vmatpush.msra.mxu3 %v443_v52  ;;  %v708_v34 = vsel %vm705_vm6, %v4080_v29, %v4066_v38  ;;  %924 = vmatpush.msrb.mxu2 %v668_v56  ;;  %v706_v32 = vsel %vm705_vm6, %v4081_v39, %v4075_v6  ;;  %v439_v29 = vsel %vm435_vm8, %v3955_v16, %v3956_v58  ;;  %v4106_v38 = vunpack.i.h.bf16 %v5348_v20  ;;  %v5394_v52 = vld [vmem:[%s5233_s12 + $0x58] sm:$0xff] }
  0xe2   : >> { %835 = vmatpush.msra.mxu1 %v708_v34  ;;  %816 = vmatpush.msra.mxu0 %v5045_v14  ;;  %v437_v14 = vsel %vm435_vm8, %v3946_v0, %v3950_v9 }
  0xe3   : >> { %900 = vmatpush.msra.mxu3 %v441_v2  ;;  %925 = vmatpush.msrb.mxu2 %v666_v30  ;;  %v5403_v16 = vpop.permute.xlu2 %4118 }
  0xe4   : >> { %836 = vmatpush.msra.mxu1 %v706_v32  ;;  %817 = vmatpush.msra.mxu0 %v5068_v24  ;;  %v5409_v24 = vld [vmem:[%s5233_s12] sm:$0xff]  ;;  %v662_v32 = vsel %vm660_vm9, %v4105_v36, %v4106_v38 }
  0xe5   : >> { %901 = vmatpush.msra.mxu3 %v439_v29  ;;  %v5396_v56 = vpop.permute.xlu1 %4098 }
  0xe6   : >> { %v4094_v6 = vpop.permute.xlu0 %4093  ;;  %v4101_v39 = vunpack.i.h.bf16 %v5396_v56  ;;  %v4100_v34 = vunpack.i.l.bf16 %v5396_v56  ;;  %818 = vmatpush.msra.mxu0 %v5074_v27  ;;  %3769 = vmatmul.msk.f32.gmra.mxu2 %vm791_vm5, %v5394_v52  ;;  %v5487_v56 = vld [vmem:[%s5233_s12 + $0x48] sm:$0xff] }
  0xe7   : >> { %v4096_v30 = vunpack.i.h.bf16 %v4094_v6  ;;  %v4095_v2 = vunpack.i.l.bf16 %v4094_v6  ;;  %902 = vmatpush.msra.mxu3 %v437_v14 }
  0xe8   : >> { %819 = vmatpush.msra.mxu0 %v5053_v18  ;;  %v665_v27 = vsel %vm660_vm9, %v4101_v39, %v4090_v8  ;;  %v5437_v39 = vld [vmem:[%s5233_s12 + $0x18] sm:$0xff] }
  0xe9   : >> { %903 = vmatpush.msra.mxu3 %v5064_v22  ;;  %v667_v44 = vsel %vm660_vm9, %v4095_v2, %v4085_v5  ;;  %v664_v0 = vsel %vm660_vm9, %v4096_v30, %v4100_v34  ;;  %820 = vmatmul.f32.vlgmr.msra.gmra.mxu0 %v5409_v24  ;;  %v4121_v22 = vunpack.i.h.bf16 %v5403_v16  ;;  %v4120_v5 = vunpack.i.l.bf16 %v5403_v16 }
  0xea   : >> { %837 = vmatpush.msra.mxu1 %v667_v44  ;;  %926 = vmatpush.msrb.mxu2 %v664_v0 }
  0xeb   : >> { %904 = vmatpush.msra.mxu3 %v5070_v25  ;;  %v5439_v2 = vpop.permute.xlu2 %4133  ;;  %v621_v0 = vsel %vm615_vm10, %v4120_v5, %v4121_v22 }
  0xec   : >> { %838 = vmatpush.msra.mxu1 %v665_v27  ;;  %927 = vmatpush.msrb.mxu2 %v662_v32  ;;  %v4135_v32 = vunpack.i.l.bf16 %v5439_v2 }
  0xed   : >> { %905 = vmatpush.msra.mxu3 %v5047_v15  ;;  %v5428_v29 = vpop.permute.xlu1 %4113 }
  0xee   : >> { %v4109_v18 = vpop.permute.xlu0 %4108  ;;  %v4116_v25 = vunpack.i.h.bf16 %v5428_v29  ;;  %v4115_v8 = vunpack.i.l.bf16 %v5428_v29 }
  0xef   : >> { %v4110_v6 = vunpack.i.l.bf16 %v4109_v18  ;;  %906 = vmatpush.msra.mxu3 %v5055_v19  ;;  %v4111_v14 = vunpack.i.h.bf16 %v4109_v18  ;;  %v7646_v19 = vunpack.i.h.bf16 %v5189_v63  ;;  %v4136_v63 = vunpack.i.h.bf16 %v5439_v2 }
  0xf0   : >> { %v623_v15 = vsel %vm615_vm10, %v4115_v8, %v4116_v25  ;;  %907 = vmatmul.f32.vlgmr.msra.gmra.mxu3 %v5409_v24 }
  0xf1   : >> { %1007 = vmatpush.msrb.mxu3 %v4056_v4  ;;  %v663_v44 = vsel %vm660_vm9, %v4110_v6, %v4096_v30  ;;  %928 = vmatpush.msrb.mxu2 %v623_v15  ;;  %v661_v60 = vsel %vm660_vm9, %v4111_v14, %v4105_v36  ;;  %v383_v4 = vld [vmem:[%s5452_s18] sm:$0xff]  ;;  %v4933_v30 = vmov 0   ;;  %v384_v14 = vld [vmem:[%s5452_s18 + $0x8] sm:$0xff]  ;;  %v5469_v15 = vld [vmem:[%s5233_s12 + $0x30] sm:$0xff] }
  0xf2   : >> { %839 = vmatpush.msra.mxu1 %v663_v44  ;;  %823 = vmatmul.f32.gmra.mxu0 %v5437_v39 }
  0xf3   : >> { %1008 = vmatpush.msrb.mxu3 %v7646_v19  ;;  %929 = vmatpush.msrb.mxu2 %v621_v0  ;;  %v4149_v44 = vpop.permute.xlu2 %4148 }
  0xf4   : >> { %840 = vmatpush.msra.mxu1 %v661_v60  ;;  %4183 = vset.pattern.permute.xlu1 %v4933_v30 }
  0xf5   : >> { %1009 = vmatpush.msrb.mxu3 %v4070_v37  ;;  %v4129_v27 = vpop.permute.xlu1 %4128  ;;  %4182 = vset.pattern.permute.xlu0 %v4933_v30 }
  0xf6   : >> { %v4124_v18 = vpop.permute.xlu0 %4123  ;;  %v4131_v59 = vunpack.i.h.bf16 %v4129_v27  ;;  %v4130_v37 = vunpack.i.l.bf16 %v4129_v27  ;;  %773 = vperm.xlu0 %4182, %v383_v4   ;;  %4184 = vset.pattern.permute.xlu2 %v4933_v30 }
  0xf7   : >> { %1010 = vmatpush.msrb.mxu3 %v4076_v3  ;;  %v4126_v36 = vunpack.i.h.bf16 %v4124_v18  ;;  %v4125_v6 = vunpack.i.l.bf16 %v4124_v18  ;;  %778 = vperm.xlu1 %4183, %v384_v14   ;;  %v617_v3 = vsel %vm615_vm10, %v4135_v32, %v4136_v63 }
  0xf8   : >> { %910 = vmatmul.f32.gmra.mxu3 %v5437_v39  ;;  %v620_v48 = vsel %vm615_vm10, %v4131_v59, %v4120_v5  ;;  %v386_v5 = vld [vmem:[%s5452_s18 + $0x18] sm:$0xff] }
  0xf9   : >> { %1011 = vmatpush.msrb.mxu3 %v4086_v46  ;;  %v622_v2 = vsel %vm615_vm10, %v4125_v6, %v4115_v8  ;;  %v619_v31 = vsel %vm615_vm10, %v4126_v36, %v4130_v37  ;;  %v4151_v46 = vunpack.i.h.bf16 %v4149_v44  ;;  %v4150_v8 = vunpack.i.l.bf16 %v4149_v44  ;;  %v370_v44 = vld [vmem:[%s5233_s12 + $0x8] sm:$0xff] }
  0xfa   : >> { %841 = vmatpush.msra.mxu1 %v622_v2  ;;  %930 = vmatpush.msrb.mxu2 %v619_v31 }
  0xfb   : >> { %1012 = vmatpush.msrb.mxu3 %v4091_v33  ;;  %826 = vmatmul.f32.gmra.mxu0 %v5469_v15  ;;  %v576_v20 = vsel %vm570_vm11, %v4150_v8, %v4151_v46  ;;  %v4164_v27 = vpop.permute.xlu2 %4163 }
  0xfc   : >> { %842 = vmatpush.msra.mxu1 %v620_v48  ;;  %931 = vmatpush.msrb.mxu2 %v617_v3  ;;  %v4166_v18 = vunpack.i.h.bf16 %v4164_v27  ;;  %v4165_v16 = vunpack.i.l.bf16 %v4164_v27 }
  0xfd   : >> { %1013 = vmatpush.msrb.mxu3 %v4100_v34  ;;  %v4144_v47 = vpop.permute.xlu1 %4143 }
  0xfe   : >> { %v4139_v33 = vpop.permute.xlu0 %4138  ;;  %v4146_v0 = vunpack.i.h.bf16 %v4144_v47  ;;  %v4145_v19 = vunpack.i.l.bf16 %v4144_v47 }
  0xff   : >> { %1014 = vmatpush.msrb.mxu3 %v4106_v38  ;;  %v4140_v60 = vunpack.i.l.bf16 %v4139_v33  ;;  %v4141_v4 = vunpack.i.h.bf16 %v4139_v33  ;;  %788 = vperm.xlu1 %4183, %v386_v5   ;;  %v5499_v38 = vld [vmem:[%s7580_s4] sm:$0x7] }
 0x100   : >> { %v578_v34 = vsel %vm570_vm11, %v4145_v19, %v4146_v0  ;;  %913 = vmatmul.f32.gmra.mxu3 %v5469_v15 }
 0x101   : >> { %1015 = vmatpush.msrb.mxu3 %v4116_v25  ;;  %v618_v30 = vsel %vm615_vm10, %v4140_v60, %v4126_v36  ;;  %932 = vmatpush.msrb.mxu2 %v578_v34  ;;  %v616_v29 = vsel %vm615_vm10, %v4141_v4, %v4135_v32  ;;  %v1080_v25 = vperm.slane %v5499_v38, 1  ;;  %v1081_v36 = vperm.slane %v5499_v38, 2 }
 0x102   : >> { %843 = vmatpush.msra.mxu1 %v618_v30 }
 0x103   : >> { %1016 = vmatpush.msrb.mxu3 %v4121_v22  ;;  %829 = vmatmul.f32.gmra.mxu0 %v5487_v56  ;;  %v4179_v33 = vpop.permute.xlu2 %4178 }
 0x104   : >> { %933 = vmatpush.msrb.mxu2 %v576_v20  ;;  %844 = vmatpush.msra.mxu1 %v616_v29  ;;  %v4180_v34 = vunpack.i.l.bf16 %v4179_v33  ;;  %v7648_v20 = vunpack.i.h.bf16 %v5185_v61  ;;  %v4181_v27 = vunpack.i.h.bf16 %v4179_v33  ;;  %v7651_v61 = vunpack.i.l.bf16 %v5247_v1 }
 0x105   : >> { %1017 = vmatpush.msrb.mxu3 %v4130_v37  ;;  %v4159_v22 = vpop.permute.xlu1 %4158  ;;  %1084 = vrot.lane.b32.xlu0 %v1080_v25, %s4932_s29  ;;  %v373_v25 = vld [vmem:[%s5233_s12 + $0x20] sm:$0xff] }
 0x106   : >> { %v4154_v59 = vpop.permute.xlu0 %4153  ;;  %v4161_v6 = vunpack.i.h.bf16 %v4159_v22  ;;  %v4160_v14 = vunpack.i.l.bf16 %v4159_v22  ;;  %v7650_v22 = vunpack.i.h.bf16 %v5171_v53  ;;  %v376_v53 = vld [vmem:[%s5233_s12 + $0x38] sm:$0xff] }
 0x107   : >> { %1018 = vmatpush.msrb.mxu3 %v4136_v63  ;;  %v4156_v37 = vunpack.i.h.bf16 %v4154_v59  ;;  %v4155_v2 = vunpack.i.l.bf16 %v4154_v59  ;;  %1086 = vrot.lane.b32.xlu1 %v1081_v36, %s4932_s29  ;;  %v572_v63 = vsel %vm570_vm11, %v4165_v16, %v4166_v18  ;;  %v7652_v59 = vunpack.i.h.bf16 %v5207_v10 }
 0x108   : >> { %916 = vmatmul.f32.gmra.mxu3 %v5487_v56  ;;  %v575_v3 = vsel %vm570_vm11, %v4161_v6, %v4150_v8  ;;  %v7647_v8 = vunpack.i.h.bf16 %v5187_v62  ;;  %v385_v62 = vld [vmem:[%s5452_s18 + $0x10] sm:$0xff]  ;;  %v7654_v6 = vunpack.i.l.bf16 %v5179_v57  ;;  %v7655_v10 = vunpack.i.h.bf16 %v5152_v45 }
 0x109   : >> { %1019 = vmatpush.msrb.mxu3 %v4146_v0  ;;  %v577_v32 = vsel %vm570_vm11, %v4155_v2, %v4145_v19  ;;  %v574_v31 = vsel %vm570_vm11, %v4156_v37, %v4160_v14  ;;  %v752_v36 = vsel %vm750_vm3, %v7652_v59, %v4181_v27  ;;  %783 = vperm.xlu2 %4184, %v385_v62   ;;  %v379_v57 = vld [vmem:[%s5233_s12 + $0x50] sm:$0xff] }
 0x10a   : >> { %845 = vmatpush.msra.mxu1 %v577_v32  ;;  %934 = vmatpush.msrb.mxu2 %v574_v31 }
 0x10b   : >> { %1020 = vmatpush.msrb.mxu3 %v4151_v46 }
 0x10c   : >> { %846 = vmatpush.msra.mxu1 %v575_v3  ;;  %935 = vmatpush.msrb.mxu2 %v572_v63 }
 0x10d   : >> { %1021 = vmatpush.msrb.mxu3 %v4160_v14  ;;  %936 = vmatmul.f32.vlgmr.msrb.gmra.mxu2 %v370_v44  ;;  %v4174_v48 = vpop.permute.xlu1 %4173  ;;  %v1079_v14 = vperm.slane %v5499_v38, 0 }
 0x10e   : >> { %v4169_v47 = vpop.permute.xlu0 %4168  ;;  %v4176_v0 = vunpack.i.h.bf16 %v4174_v48  ;;  %v4175_v19 = vunpack.i.l.bf16 %v4174_v48 }
 0x10f   : >> { %1022 = vmatpush.msrb.mxu3 %v4166_v18  ;;  %v4171_v60 = vunpack.i.h.bf16 %v4169_v47  ;;  %v4170_v46 = vunpack.i.l.bf16 %v4169_v47  ;;  %v7649_v18 = vunpack.i.h.bf16 %v5209_v11  ;;  %v7653_v11 = vunpack.i.h.bf16 %v5247_v1 }
 0x110   : >> { %1048 = vmatpush.msra.mxu2 %v4175_v19  ;;  %v758_v4 = vsel %vm750_vm3, %v7647_v8, %v4175_v19  ;;  %v756_v29 = vsel %vm750_vm3, %v7648_v20, %v4176_v0  ;;  %1023 = vmatmul.f32.vlgmr.msrb.gmra.mxu3 %v370_v44  ;;  %v7656_v1 = vunpack.i.h.bf16 %v5143_v42 }
 0x111   : >> { %v573_v5 = vsel %vm570_vm11, %v4170_v46, %v4156_v37  ;;  %961 = vmatpush.msrb.mxu0 %v758_v4  ;;  %v571_v30 = vsel %vm570_vm11, %v4171_v60, %v4165_v16  ;;  %v754_v16 = vsel %vm750_vm3, %v7650_v22, %v4180_v34  ;;  %1082 = vrot.lane.b32.xlu2 %v1079_v14, %s4932_s29 }
 0x112   : >> { %847 = vmatpush.msra.mxu1 %v573_v5  ;;  %1049 = vmatpush.msra.mxu2 %v4176_v0 }
 0x113   : >> { %962 = vmatpush.msrb.mxu0 %v756_v29 }
 0x114   : >> { %848 = vmatpush.msra.mxu1 %v571_v30  ;;  %1050 = vmatpush.msra.mxu2 %v4180_v34 }
 0x115   : >> { %849 = vmatmul.f32.vlgmr.msra.gmra.mxu1 %v370_v44  ;;  %939 = vmatmul.f32.gmra.mxu2 %v373_v25 }
 0x116   : >> { %978 = vmatpush.msrb.mxu1 %v7649_v18  ;;  %963 = vmatpush.msrb.mxu0 %v754_v16 }
 0x117   : >> { %1051 = vmatpush.msra.mxu2 %v4181_v27 }
 0x118   : >> { %979 = vmatpush.msrb.mxu1 %v7651_v61  ;;  %964 = vmatpush.msrb.mxu0 %v752_v36 }
 0x119   : >> { %3770 = vmatmul.msk.f32.vlgmr.msrb.gmra.mxu0 %vm791_vm5, %v5241_v50  ;;  %1026 = vmatmul.f32.gmra.mxu3 %v373_v25 }
 0x11a   : >> { %980 = vmatpush.msrb.mxu1 %v7653_v11 }
 0x11c   : >> { %981 = vmatpush.msrb.mxu1 %v7654_v6 }
 0x11d   : >> { %852 = vmatmul.f32.gmra.mxu1 %v373_v25  ;;  %942 = vmatmul.f32.gmra.mxu2 %v376_v53 }
 0x11e   : >> { %982 = vmatpush.msrb.mxu1 %v7655_v10 }
 0x120   : >> { %983 = vmatpush.msrb.mxu1 %v3995_v7 }
 0x121   : >> { %3771 = vmatmul.msk.f32.gmra.mxu0 %vm791_vm5, %v5285_v12  ;;  %1029 = vmatmul.f32.gmra.mxu3 %v376_v53 }
 0x122   : >> { %984 = vmatpush.msrb.mxu1 %v7656_v1 }
 0x124   : >> { %985 = vmatpush.msrb.mxu1 %v3980_v35 }
 0x125   : >> { %855 = vmatmul.f32.gmra.mxu1 %v376_v53  ;;  %945 = vmatmul.f32.gmra.mxu2 %v379_v57 }
 0x126   : >> { %986 = vmatpush.msrb.mxu1 %v3971_v55 }
 0x128   : >> { %987 = vmatpush.msrb.mxu1 %v3965_v21 }
 0x129   : >> { %3772 = vmatmul.msk.f32.gmra.mxu0 %vm791_vm5, %v5344_v28  ;;  %1032 = vmatmul.f32.gmra.mxu3 %v379_v57 }
 0x12a   : >> { %988 = vmatpush.msrb.mxu1 %v3956_v58 }
 0x12c   : >> { %989 = vmatpush.msrb.mxu1 %v3950_v9 }
 0x12d   : >> { %858 = vmatmul.f32.gmra.mxu1 %v379_v57  ;;  %3774 = vmatmul.msk.f32.vlgmr.msra.gmra.mxu2 %vm791_vm5, %v5241_v50 }
 0x12e   : >> { %990 = vmatpush.msrb.mxu1 %v5066_v23 }
 0x130   : >> { %991 = vmatpush.msrb.mxu1 %v5043_v13 }
 0x131   : >> { %3773 = vmatmul.msk.f32.gmra.mxu0 %vm791_vm5, %v5394_v52 }
 0x132   : >> { %992 = vmatpush.msrb.mxu1 %v5051_v17 }
 0x134   : >> { %993 = vmatpush.msrb.mxu1 %v5072_v26 }
 0x135   : >> { %994 = vmatmul.f32.vlgmr.msrb.gmra.mxu1 %v5409_v24  ;;  %3775 = vmatmul.msk.f32.gmra.mxu2 %vm791_vm5, %v5285_v12 }
 0x13d   : >> { %997 = vmatmul.f32.gmra.mxu1 %v5437_v39  ;;  %3776 = vmatmul.msk.f32.gmra.mxu2 %vm791_vm5, %v5344_v28 }
 0x145   : >> { %1000 = vmatmul.f32.gmra.mxu1 %v5469_v15  ;;  %3777 = vmatmul.msk.f32.gmra.mxu2 %vm791_vm5, %v5394_v52 }
 0x14d   : >> { %1003 = vmatmul.f32.gmra.mxu1 %v5487_v56 }
 0x14e   : >> { %v879_v13 = vpop.f32.mrf.mxu2 }
 0x158   : >> { %v882_v23 = vpop.f32.mrf.mxu2 }
 0x161   : >> { %v885_v40 = vpop.f32.mrf.mxu2 }
 0x163   : >> { %v5584_v49 = vpop.permute.xlu2 %783 }
 0x166   : >> { %v821_v17 = vpop.f32.mrf.mxu0 }
 0x168   : >> { %v5586_v51 = vpop.permute.xlu0 %773 }
 0x169   : >> { %v5580_v41 = vpop.permute.xlu1 %778  ;;  %v5582_v45 = vpop.f32.mrf.mxu2  ;;  %v822_v55 = vadd.f32 %v821_v17, %v5586_v51 }
 0x16b   : >> { %v1083_v58 = vpop.permute.xlu2 %1082 }
 0x16f   : >> { %v824_v26 = vpop.f32.mrf.mxu0 }
 0x170   : >> { %v825_v31 = vadd.f32 %v824_v26, %v5580_v41 }
 0x171   : >> { %v5588_v54 = vpop.permute.xlu1 %788 }
 0x173   : >> { %v908_v43 = vpop.f32.mrf.mxu3 }
 0x174   : >> { %v909_v50 = vadd.f32 %v908_v43, %v5586_v51 }
 0x177   : >> { %v1085_v9 = vpop.permute.xlu0 %1084 }
 0x178   : >> { %v827_v42 = vpop.f32.mrf.mxu0  ;;  %v1088_v39 = vsel %vm570_vm11, %v1083_v58, %v1085_v9 }
 0x179   : >> { %v5593_v15 = vpop.permute.xlu1 %1086  ;;  %v828_v30 = vadd.f32 %v827_v42, %v5584_v49 }
 0x17a   : >> { %v1089_v3 = vsel %vm570_vm11, %v1085_v9, %v5593_v15 }
 0x17b   : >> { %v911_v7 = vpop.f32.mrf.mxu3 }
 0x17c   : >> { %v912_v37 = vadd.f32 %v911_v7, %v5580_v41 }
 0x180   : >> { %v830_v12 = vpop.f32.mrf.mxu0 }
 0x181   : >> { %v831_v53 = vadd.f32 %v830_v12, %v5588_v54 }
 0x183   : >> { %v914_v48 = vpop.f32.mrf.mxu3 }
 0x184   : >> { %v915_v8 = vadd.f32 %v914_v48, %v5584_v49 }
 0x18b   : >> { %v917_v22 = vpop.f32.mrf.mxu3 }
 0x18c   : >> { %v918_v57 = vadd.f32 %v917_v22, %v5588_v54 }
 0x190   : >> { %v937_v35 = vpop.f32.mrf.mxu2 }
 0x191   : >> { %v938_v52 = vadd.f32 %v937_v35, %v909_v50 }
 0x192   : >> { %v850_v28 = vpop.f32.mrf.mxu1 }
 0x193   : >> { %v851_v21 = vadd.f32 %v850_v28, %v822_v55  ;;  %v1024_v17 = vpop.f32.mrf.mxu3 }
 0x195   : >> { %v880_v24 = vadd.f32 %v879_v13, %v851_v21 }
 0x196   : >> { %v966_v38 = vpop.f32.mrf.mxu0 }
 0x197   : >> { %v1065_v56 = vmax.f32 %v880_v24, 0.0  ;;  %v967_v2 = vadd.f32 %v966_v38, %v938_v52 }
 0x198   : >> { %v940_v32 = vpop.f32.mrf.mxu2 }
 0x199   : >> { %v1093_v63 = vmul.f32 %v1088_v39, %v1065_v56  ;;  %v1066_v44 = vmax.f32 %v967_v2, 0.0  ;;  %v941_v0 = vadd.f32 %v940_v32, %v912_v37 }
 0x19a   : >> { %v853_v47 = vpop.f32.mrf.mxu1 }
 0x19b   : >> { %v854_v33 = vadd.f32 %v853_v47, %v825_v31  ;;  %1117 = vrot.lane.b32.xlu2 %v1093_v63, %s4934_s11  ;;  %v1094_v19 = vmul.f32 %v1089_v3, %v1066_v44 }
 0x19c   : >> { %v1027_v58 = vpop.f32.mrf.mxu3 }
 0x19d   : >> { %v883_v60 = vadd.f32 %v882_v23, %v854_v33  ;;  %1119 = vrot.lane.b32.xlu0 %v1094_v19, %s4934_s11 }
 0x19e   : >> { %v969_v5 = vpop.f32.mrf.mxu0 }
 0x19f   : >> { %v1068_v46 = vmax.f32 %v883_v60, 0.0  ;;  %v970_v4 = vadd.f32 %v969_v5, %v941_v0 }
 0x1a0   : >> { %v943_v34 = vpop.f32.mrf.mxu2 }
 0x1a1   : >> { %v1096_v20 = vmul.f32 %v1088_v39, %v1068_v46  ;;  %v1069_v29 = vmax.f32 %v970_v4, 0.0  ;;  %v944_v18 = vadd.f32 %v943_v34, %v915_v8 }
 0x1a2   : >> { %v856_v25 = vpop.f32.mrf.mxu1 }
 0x1a3   : >> { %v857_v27 = vadd.f32 %v856_v25, %v828_v30  ;;  %1123 = vrot.lane.b32.xlu2 %v1096_v20, %s4934_s11  ;;  %v1097_v62 = vmul.f32 %v1089_v3, %v1069_v29 }
 0x1a5   : >> { %v886_v16 = vadd.f32 %v885_v40, %v857_v27  ;;  %1125 = vrot.lane.b32.xlu0 %v1097_v62, %s4934_s11 }
 0x1a6   : >> { %v972_v59 = vpop.f32.mrf.mxu0 }
 0x1a7   : >> { %v1071_v61 = vmax.f32 %v886_v16, 0.0  ;;  %v973_v36 = vadd.f32 %v972_v59, %v944_v18 }
 0x1a8   : >> { %v946_v11 = vpop.f32.mrf.mxu2 }
 0x1a9   : >> { %v1099_v6 = vmul.f32 %v1088_v39, %v1071_v61  ;;  %v1072_v14 = vmax.f32 %v973_v36, 0.0  ;;  %v947_v26 = vadd.f32 %v946_v11, %v918_v57 }
 0x1aa   : >> { %v859_v10 = vpop.f32.mrf.mxu1 }
 0x1ab   : >> { %v860_v1 = vadd.f32 %v859_v10, %v831_v53  ;;  %1129 = vrot.lane.b32.xlu2 %v1099_v6, %s4934_s11  ;;  %v1100_v13 = vmul.f32 %v1089_v3, %v1072_v14 }
 0x1ad   : >> { %v889_v23 = vadd.f32 %v5582_v45, %v860_v1  ;;  %1131 = vrot.lane.b32.xlu0 %v1100_v13, %s4934_s11 }
 0x1ae   : >> { %v975_v42 = vpop.f32.mrf.mxu0 }
 0x1af   : >> { %v1074_v40 = vmax.f32 %v889_v23, 0.0  ;;  %v976_v43 = vadd.f32 %v975_v42, %v947_v26 }
 0x1b0   : >> { %v1053_v12 = vpop.f32.mrf.mxu2 }
 0x1b1   : >> { %v1102_v50 = vmul.f32 %v1088_v39, %v1074_v40  ;;  %v1075_v7 = vmax.f32 %v976_v43, 0.0 }
 0x1b2   : >> { %v995_v35 = vpop.f32.mrf.mxu1 }
 0x1b3   : >> { %v996_v55 = vadd.f32 %v995_v35, %v5586_v51  ;;  %1135 = vrot.lane.b32.xlu2 %v1102_v50, %s4934_s11  ;;  %v1103_v28 = vmul.f32 %v1089_v3, %v1075_v7  ;;  %v1030_v51 = vpop.f32.mrf.mxu3 }
 0x1b5   : >> { %v1025_v21 = vadd.f32 %v1024_v17, %v996_v55  ;;  %1137 = vrot.lane.b32.xlu0 %v1103_v28, %s4934_s11 }
 0x1b7   : >> { %v1054_v45 = vadd.f32 %v1053_v12, %v1025_v21 }
 0x1b8   : >> { %v1056_v52 = vpop.f32.mrf.mxu2 }
 0x1b9   : >> { %v1067_v9 = vmax.f32 %v1054_v45, 0.0 }
 0x1ba   : >> { %v998_v24 = vpop.f32.mrf.mxu1 }
 0x1bb   : >> { %v1095_v56 = vmul.f32 %v5593_v15, %v1067_v9  ;;  %v999_v39 = vadd.f32 %v998_v24, %v5580_v41  ;;  %v1033_v0 = vpop.f32.mrf.mxu3 }
 0x1bd   : >> { %v1028_v38 = vadd.f32 %v1027_v58, %v999_v39  ;;  %1121 = vrot.lane.b32.xlu1 %v1095_v56, %s4934_s11 }
 0x1bf   : >> { %v1057_v37 = vadd.f32 %v1056_v52, %v1028_v38 }
 0x1c0   : >> { %v1059_v31 = vpop.f32.mrf.mxu2 }
 0x1c1   : >> { %v1070_v2 = vmax.f32 %v1057_v37, 0.0  ;;  %v3796_v37 = vld [vmem:[%s5452_s18 + $0x30] sm:$0xff] }
 0x1c2   : >> { %v1001_v32 = vpop.f32.mrf.mxu1 }
 0x1c3   : >> { %v1098_v63 = vmul.f32 %v5593_v15, %v1070_v2  ;;  %v1002_v3 = vadd.f32 %v1001_v32, %v5584_v49 }
 0x1c5   : >> { %v1031_v44 = vadd.f32 %v1030_v51, %v1002_v3  ;;  %1127 = vrot.lane.b32.xlu1 %v1098_v63, %s4934_s11  ;;  %v3794_v51 = vld [vmem:[%s5452_s18 + $0x20] sm:$0xff] }
 0x1c7   : >> { %v1060_v48 = vadd.f32 %v1059_v31, %v1031_v44  ;;  %v3797_v31 = vld [vmem:[%s5452_s18 + $0x38] sm:$0xff]  ;;  %v3795_v44 = vld [vmem:[%s5452_s18 + $0x28] sm:$0xff] }
 0x1c8   : >> { %v1062_v60 = vpop.f32.mrf.mxu2 }
 0x1c9   : >> { %v1073_v47 = vmax.f32 %v1060_v48, 0.0 }
 0x1ca   : >> { %v1004_v33 = vpop.f32.mrf.mxu1 }
 0x1cb   : >> { %v1101_v41 = vmul.f32 %v5593_v15, %v1073_v47  ;;  %v1005_v19 = vadd.f32 %v1004_v33, %v5588_v54 }
 0x1cd   : >> { %v1034_v46 = vadd.f32 %v1033_v0, %v1005_v19  ;;  %1133 = vrot.lane.b32.xlu1 %v1101_v41, %s4934_s11 }
 0x1cf   : >> { %v1063_v5 = vadd.f32 %v1062_v60, %v1034_v46 }
 0x1d1   : >> { %v1076_v8 = vmax.f32 %v1063_v5, 0.0 }
 0x1d3   : >> { %v1104_v4 = vmul.f32 %v5593_v15, %v1076_v8 }
 0x1d5   : >> { %1139 = vrot.lane.b32.xlu1 %v1104_v4, %s4934_s11 }
 0x1f5   : >> { %v1118_v49 = vpop.permute.xlu2 %1117 }
 0x1f6   : >> { %1162 = vst.msk [vmem:[#allocation3] sm:$0xff] %vm1161_vm12, %v1118_v49 }
 0x1fd   : >> { %v1124_v34 = vpop.permute.xlu2 %1123  ;;  %v5631_v15 = vld [vmem:[#allocation3] sm:$0xff] }
 0x1fe   : >> { %1166 = vst.msk [vmem:[#allocation3 + $0x18] sm:$0xff] %vm1161_vm12, %v1124_v34 }
 0x205   : >> { %v1130_v30 = vpop.permute.xlu2 %1129  ;;  %v5646_v18 = vld [vmem:[#allocation3 + $0x18] sm:$0xff] }
 0x206   : >> { %1169 = vst.msk [vmem:[#allocation3 + $0x30] sm:$0xff] %vm1161_vm12, %v1130_v30 }
 0x20d   : >> { %v1136_v54 = vpop.permute.xlu2 %1135  ;;  %v5670_v11 = vld [vmem:[#allocation3 + $0x30] sm:$0xff] }
 0x20e   : >> { %1172 = vst.msk [vmem:[#allocation3 + $0x48] sm:$0xff] %vm1161_vm12, %v1136_v54 }
 0x20f   : >> { %v1120_v20 = vpop.permute.xlu0 %1119 }
 0x210   : >> { %v5629_v29 = vsel %vm324_vm0, %v1118_v49, %v1120_v20 }
 0x211   : >> { %v5635_v25 = vpack.i.bf16 %v5629_v29, %v5631_v15 }
 0x213   : >> { %4201 = vrot.lane.b32.xlu1 %v5635_v25, %s4929_s26  ;;  %4196 = vrot.lane.b32.xlu0 %v5635_v25, %s4927_s23 }
 0x214   : >> { %4186 = vrot.lane.b32.xlu2 %v5635_v25, %s4925_s21 }
 0x215   : >> { %v5704_v12 = vld [vmem:[#allocation3 + $0x48] sm:$0xff] }
 0x217   : >> { %v1126_v27 = vpop.permute.xlu0 %1125 }
 0x218   : >> { %v5644_v62 = vsel %vm324_vm0, %v1124_v34, %v1126_v27 }
 0x219   : >> { %v5650_v22 = vpack.i.bf16 %v5644_v62, %v5646_v18 }
 0x21b   : >> { %4206 = vrot.lane.b32.xlu1 %v5635_v25, %s4930_s27  ;;  %4231 = vrot.lane.b32.xlu0 %v5650_v22, %s4930_s27 }
 0x21c   : >> { %4191 = vrot.lane.b32.xlu2 %v5635_v25, %s4926_s22 }
 0x21f   : >> { %v1132_v16 = vpop.permute.xlu0 %1131 }
 0x220   : >> { %v5659_v61 = vsel %vm324_vm0, %v1130_v30, %v1132_v16 }
 0x221   : >> { %v4245_v53 = vpack.i.bf16 %v5659_v61, %v5670_v11 }
 0x223   : >> { %4211 = vrot.lane.b32.xlu1 %v5635_v25, %s4931_s28  ;;  %4236 = vrot.lane.b32.xlu0 %v5650_v22, %s4931_s28 }
 0x224   : >> { %4221 = vrot.lane.b32.xlu2 %v5650_v22, %s4929_s26 }
 0x227   : >> { %v1138_v59 = vpop.permute.xlu0 %1137 }
 0x228   : >> { %v5668_v36 = vsel %vm324_vm0, %v1136_v54, %v1138_v59 }
 0x229   : >> { %v4295_v7 = vpack.i.bf16 %v5668_v36, %v5704_v12 }
 0x22b   : >> { %4216 = vrot.lane.b32.xlu1 %v5650_v22, %s4927_s23 }
 0x22c   : >> { %4246 = vrot.lane.b32.xlu2 %v4245_v53, %s4925_s21 }
 0x22f   : >> { %v1122_v6 = vpop.permute.xlu1 %1121 }
 0x230   : >> { %v1142_v14 = vsel %vm324_vm0, %v1120_v20, %v1122_v6 }
 0x231   : >> { %1165 = vst.msk [vmem:[#allocation3 + $0x10] sm:$0xff] %vm1164_vm13, %v1142_v14 }
 0x233   : >> { %4226 = vrot.lane.b32.xlu1 %v5650_v22, %s4926_s22 }
 0x234   : >> { %4251 = vrot.lane.b32.xlu2 %v4245_v53, %s4927_s23 }
 0x237   : >> { %v1128_v10 = vpop.permute.xlu1 %1127 }
 0x238   : >> { %v1144_v1 = vsel %vm324_vm0, %v1126_v27, %v1128_v10  ;;  %v5683_v57 = vld [vmem:[#allocation3 + $0x10] sm:$0xff] }
 0x239   : >> { %1168 = vst.msk [vmem:[#allocation3 + $0x28] sm:$0xff] %vm1164_vm13, %v1144_v1  ;;  %v4240_v13 = vpack.i.bf16 %v5646_v18, %v5683_v57 }
 0x23b   : >> { %4241 = vrot.lane.b32.xlu0 %v4240_v13, %s4925_s21  ;;  %4271 = vrot.lane.b32.xlu1 %v4245_v53, %s4931_s28 }
 0x23c   : >> { %4261 = vrot.lane.b32.xlu2 %v4245_v53, %s4926_s22 }
 0x23f   : >> { %v1134_v17 = vpop.permute.xlu1 %1133 }
 0x240   : >> { %v1146_v23 = vsel %vm324_vm0, %v1132_v16, %v1134_v17  ;;  %v5692_v26 = vld [vmem:[#allocation3 + $0x28] sm:$0xff] }
 0x241   : >> { %1171 = vst.msk [vmem:[#allocation3 + $0x40] sm:$0xff] %vm1164_vm13, %v1146_v23  ;;  %v4275_v40 = vpack.i.bf16 %v5692_v26, %v5644_v62  ;;  %v4280_v42 = vpack.i.bf16 %v5683_v57, %v5692_v26 }
 0x243   : >> { %4256 = vrot.lane.b32.xlu0 %v4245_v53, %s4929_s26  ;;  %4276 = vrot.lane.b32.xlu1 %v4275_v40, %s4925_s21 }
 0x244   : >> { %4281 = vrot.lane.b32.xlu2 %v4280_v42, %s4927_s23 }
 0x247   : >> { %v1140_v43 = vpop.permute.xlu1 %1139 }
 0x248   : >> { %v1148_v50 = vsel %vm324_vm0, %v1138_v59, %v1140_v43  ;;  %v5721_v28 = vld [vmem:[#allocation3 + $0x40] sm:$0xff] }
 0x249   : >> { %1174 = vst.msk [vmem:[#allocation3 + $0x58] sm:$0xff] %vm1164_vm13, %v1148_v50  ;;  %v4320_v21 = vpack.i.bf16 %v5704_v12, %v5721_v28 }
 0x24b   : >> { %4266 = vrot.lane.b32.xlu0 %v4245_v53, %s4930_s27  ;;  %4296 = vrot.lane.b32.xlu1 %v4295_v7, %s4929_s26 }
 0x24c   : >> { %4286 = vrot.lane.b32.xlu2 %v4280_v42, %s4926_s22 }
 0x250   : >> { %v5714_v35 = vld [vmem:[#allocation3 + $0x58] sm:$0xff] }
 0x251   : >> { %v4325_v55 = vpack.i.bf16 %v5714_v35, %v5668_v36  ;;  %v4345_v58 = vpack.i.bf16 %v5721_v28, %v5714_v35 }
 0x253   : >> { %4291 = vrot.lane.b32.xlu0 %v4295_v7, %s4927_s23  ;;  %4306 = vrot.lane.b32.xlu1 %v4295_v7, %s4930_s27 }
 0x254   : >> { %4301 = vrot.lane.b32.xlu2 %v4295_v7, %s4926_s22 }
 0x25b   : >> { %4311 = vrot.lane.b32.xlu0 %v4295_v7, %s4931_s28  ;;  %4326 = vrot.lane.b32.xlu1 %v4325_v55, %s4925_s21 }
 0x25c   : >> { %4316 = vrot.lane.b32.xlu2 %v4295_v7, %s4932_s29 }
 0x263   : >> { %4321 = vrot.lane.b32.xlu0 %v4320_v21, %s4925_s21  ;;  %4341 = vrot.lane.b32.xlu1 %v5650_v22, %s4932_s29  ;;  %s4944_s21 = smov (%p361_p4), 19  }
 0x264   : >> { %4346 = vrot.lane.b32.xlu2 %v4345_v58, %s4926_s22 }
 0x26b   : >> { %4331 = vrot.lane.b32.xlu0 %v4345_v58, %s4927_s23  ;;  %4371 = vrot.lane.b32.xlu1 %v4345_v58, %s4929_s26  ;;  %s4936_s23 = smov (%p361_p4), 126  }
 0x26c   : >> { %4351 = vrot.lane.b32.xlu2 %v5635_v25, %s4932_s29 }
 0x26e   : >> { %v5735_v45 = vpop.permute.xlu2 %4186 }
 0x26f   : >> { %v4189_v19 = vunpack.i.h.bf16 %v5735_v45 }
 0x273   : >> { %4336 = vrot.lane.b32.xlu0 %v4245_v53, %s4932_s29  ;;  %4376 = vrot.lane.b32.xlu1 %v4280_v42, %s4929_s26  ;;  %s4938_s26 = smov (%p361_p4), 90  }
 0x274   : >> { %4361 = vrot.lane.b32.xlu2 %v4245_v53, %s4928_s25 }
 0x276   : >> { %v5741_v9 = vpop.permute.xlu2 %4191 }
 0x27b   : >> { %4356 = vrot.lane.b32.xlu0 %v4295_v7, %s4928_s25  ;;  %4391 = vrot.lane.b32.xlu1 %v4280_v42, %s4930_s27 }
 0x27c   : >> { %4381 = vrot.lane.b32.xlu2 %v5635_v25, %s4928_s25 }
 0x27e   : >> { %v5749_v52 = vpop.permute.xlu2 %4221 }
 0x27f   : >> { %v4223_v16 = vunpack.i.l.bf16 %v5749_v52 }
 0x283   : >> { %4366 = vrot.lane.b32.xlu0 %v5650_v22, %s4928_s25  ;;  %4406 = vrot.lane.b32.xlu1 %v4345_v58, %s4932_s29  ;;  %v7600_v22 = vunpack.i.h.bf16 %v5749_v52 }
 0x284   : >> { %4396 = vrot.lane.b32.xlu2 %v4345_v58, %s4931_s28 }
 0x285   : >> { %v5752_v24 = vpop.permute.xlu1 %4201  ;;  %v5761_v38 = vpop.permute.xlu0 %4196  ;;  %v1511_v13 = vsel %vm705_vm6, %v4223_v16, %v7600_v22 }
 0x286   : >> { %v5759_v39 = vpop.permute.xlu2 %4246  ;;  %v7598_v59 = vunpack.i.h.bf16 %v5752_v24  ;;  %v4203_v53 = vunpack.i.l.bf16 %v5752_v24 }
 0x288   : >> { %v1509_v17 = vsel %vm705_vm6, %v4203_v53, %v7598_v59 }
 0x28b   : >> { %4386 = vrot.lane.b32.xlu0 %v4345_v58, %s4930_s27  ;;  %4421 = vrot.lane.b32.xlu1 %v4280_v42, %s4928_s25  ;;  %s4939_s27 = smov (%p361_p4), 91  }
 0x28c   : >> { %4411 = vrot.lane.b32.xlu2 %v4280_v42, %s4932_s29 }
 0x28d   : >> { %v5757_v56 = vpop.permute.xlu1 %4206  ;;  %v5771_v63 = vpop.permute.xlu0 %4231 }
 0x28e   : >> { %v5768_v32 = vpop.permute.xlu2 %4251  ;;  %v4233_v16 = vunpack.i.l.bf16 %v5771_v63 }
 0x28f   : >> { %v4254_v23 = vunpack.i.h.bf16 %v5768_v32  ;;  %v4253_v40 = vunpack.i.l.bf16 %v5768_v32  ;;  %v5989_v32 = vld [vmem:[%s5233_s12 + $0x60] sm:$0xff] }
 0x293   : >> { %4401 = vrot.lane.b32.xlu0 %v4280_v42, %s4931_s28  ;;  %1585 = vperm.xlu1 %4183, %v3796_v37   ;;  %v4199_v37 = vunpack.i.h.bf16 %v5761_v38  ;;  %s4940_s28 = smov (%p361_p4), 92  }
 0x294   : >> { %1575 = vperm.xlu2 %4184, %v3794_v51  }
 0x295   : >> { %v5766_v2 = vpop.permute.xlu1 %4211  ;;  %v5779_v47 = vpop.permute.xlu0 %4236 }
 0x296   : >> { %v5777_v48 = vpop.permute.xlu2 %4261 }
 0x29b   : >> { %4416 = vrot.lane.b32.xlu0 %v4345_v58, %s4928_s25  ;;  %s4937_s25 = smov (%p361_p4), 110  }
 0x29c   : >> { %1590 = vperm.xlu2 %4184, %v3797_v31  }
 0x29d   : >> { %v5774_v3 = vpop.permute.xlu1 %4216 }
 0x29e   : >> { %v5783_v0 = vpop.permute.xlu2 %4281  ;;  %v4219_v51 = vunpack.i.h.bf16 %v5774_v3  ;;  %v4218_v31 = vunpack.i.l.bf16 %v5774_v3 }
 0x2a3   : >> { %1580 = vperm.xlu0 %4182, %v3795_v44  }
 0x2a5   : >> { %v5781_v33 = vpop.permute.xlu1 %4226 }
 0x2a6   : >> { %v5802_v49 = vpop.permute.xlu2 %4286 }
 0x2ad   : >> { %v5785_v41 = vpop.permute.xlu0 %4241  ;;  %v5789_v46 = vpop.permute.xlu1 %4271 }
 0x2ae   : >> { %v7595_v60 = vunpack.i.l.bf16 %v5785_v41  ;;  %v5816_v6 = vpop.permute.xlu2 %4301  ;;  %v4273_v59 = vunpack.i.l.bf16 %v5789_v46 }
 0x2b0   : >> { %v5796_v5 = vsel %vm435_vm8, %v4189_v19, %v7595_v60  ;;  %v7608_v60 = vunpack.i.h.bf16 %v5777_v48 }
 0x2b5   : >> { %v5798_v8 = vpop.permute.xlu0 %4256  ;;  %v5800_v4 = vpop.permute.xlu1 %4276 }
 0x2b6   : >> { %v7601_v54 = vunpack.i.h.bf16 %v5798_v8  ;;  %v4258_v20 = vunpack.i.l.bf16 %v5798_v8 }
 0x2b8   : >> { %v1513_v10 = vsel %vm705_vm6, %v4258_v20, %v7601_v54  ;;  %v4198_v20 = vunpack.i.l.bf16 %v5761_v38  ;;  %v7610_v54 = vunpack.i.h.bf16 %v5741_v9 }
 0x2bd   : >> { %v5804_v34 = vpop.permute.xlu0 %4266  ;;  %v5806_v30 = vpop.permute.xlu1 %4296 }
 0x2be   : >> { %v7602_v25 = vunpack.i.h.bf16 %v5806_v30  ;;  %v4298_v27 = vunpack.i.l.bf16 %v5806_v30  ;;  %v7596_v7 = vunpack.i.h.bf16 %v5804_v34  ;;  %v4268_v55 = vunpack.i.l.bf16 %v5804_v34 }
 0x2c0   : >> { %v1515_v14 = vsel %vm705_vm6, %v4298_v27, %v7602_v25  ;;  %v7599_v27 = vunpack.i.h.bf16 %v5771_v63  ;;  %v7609_v25 = vunpack.i.h.bf16 %v5779_v47 }
 0x2c1   : >> { %1634 = vmatpush.msra.mxu1 %v1515_v14  ;;  %v1337_v14 = vsel %vm525_vm4, %v4253_v40, %v4254_v23  ;;  %v1335_v40 = vsel %vm525_vm4, %v4218_v31, %v4219_v51 }
 0x2c3   : >> { %1635 = vmatpush.msra.mxu1 %v1513_v10  ;;  %v7603_v10 = vunpack.i.h.bf16 %v5757_v56 }
 0x2c5   : >> { %v5824_v1 = vpop.permute.xlu0 %4291  ;;  %v5836_v50 = vpop.permute.xlu1 %4306  ;;  %1636 = vmatpush.msra.mxu1 %v1511_v13  ;;  %v4208_v13 = vunpack.i.l.bf16 %v5757_v56 }
 0x2c6   : >> { %v4294_v42 = vunpack.i.h.bf16 %v5824_v1  ;;  %v4293_v43 = vunpack.i.l.bf16 %v5824_v1  ;;  %v7597_v21 = vunpack.i.h.bf16 %v5836_v50  ;;  %v4308_v58 = vunpack.i.l.bf16 %v5836_v50 }
 0x2c7   : >> { %1637 = vmatpush.msra.mxu1 %v1509_v17  ;;  %v5859_v17 = vpop.permute.xlu2 %4316 }
 0x2c8   : >> { %v1339_v44 = vsel %vm525_vm4, %v4293_v43, %v4294_v42  ;;  %v1471_v53 = vsel %vm660_vm9, %v4308_v58, %v7597_v21  ;;  %v1469_v43 = vsel %vm660_vm9, %v4268_v55, %v7596_v7  ;;  %v4303_v58 = vunpack.i.l.bf16 %v5816_v6 }
 0x2c9   : >> { %1605 = vmatpush.msra.mxu0 %v1339_v44  ;;  %1638 = vmatpush.msra.mxu1 %v1471_v53  ;;  %v7605_v44 = vunpack.i.h.bf16 %v5816_v6  ;;  %v1467_v55 = vsel %vm660_vm9, %v4233_v16, %v7599_v27  ;;  %v4263_v7 = vunpack.i.l.bf16 %v5777_v48  ;;  %v7607_v16 = vunpack.i.h.bf16 %v5781_v33 }
 0x2ca   : >> { %v4228_v27 = vunpack.i.l.bf16 %v5781_v33 }
 0x2cb   : >> { %1606 = vmatpush.msra.mxu0 %v1337_v14  ;;  %1639 = vmatpush.msra.mxu1 %v1469_v43  ;;  %v1333_v14 = vsel %vm525_vm4, %v4198_v20, %v4199_v37  ;;  %v1465_v20 = vsel %vm660_vm9, %v4208_v13, %v7603_v10  ;;  %v1295_v22 = vsel %vm480_vm7, %v4303_v58, %v7605_v44  ;;  %v4238_v13 = vunpack.i.l.bf16 %v5779_v47 }
 0x2cc   : >> { %v1293_v10 = vsel %vm480_vm7, %v4263_v7, %v7608_v60  ;;  %v7612_v58 = vunpack.i.h.bf16 %v5766_v2  ;;  %v4318_v44 = vunpack.i.l.bf16 %v5859_v17 }
 0x2cd   : >> { %v5869_v53 = vpop.permute.xlu0 %4311  ;;  %1607 = vmatpush.msra.mxu0 %v1335_v40  ;;  %v5881_v43 = vpop.permute.xlu1 %4326  ;;  %1640 = vmatpush.msra.mxu1 %v1467_v55  ;;  %v7606_v40 = vunpack.i.h.bf16 %v5789_v46 }
 0x2ce   : >> { %v7604_v21 = vunpack.i.h.bf16 %v5869_v53  ;;  %v4313_v31 = vunpack.i.l.bf16 %v5869_v53 }
 0x2cf   : >> { %1608 = vmatpush.msra.mxu0 %v1333_v14  ;;  %1641 = vmatpush.msra.mxu1 %v1465_v20  ;;  %v4193_v14 = vunpack.i.l.bf16 %v5741_v9  ;;  %v4213_v20 = vunpack.i.l.bf16 %v5766_v2  ;;  %v5913_v7 = vpop.permute.xlu2 %4346 }
 0x2d0   : >> { %v1427_v55 = vsel %vm615_vm10, %v4313_v31, %v7604_v21  ;;  %v1425_v31 = vsel %vm615_vm10, %v4273_v59, %v7606_v40  ;;  %v1291_v21 = vsel %vm480_vm7, %v4228_v27, %v7607_v16  ;;  %v1423_v59 = vsel %vm615_vm10, %v4238_v13, %v7609_v25 }
 0x2d1   : >> { %1609 = vmatpush.msra.mxu0 %v1295_v22  ;;  %1642 = vmatpush.msra.mxu1 %v1427_v55  ;;  %v7611_v22 = vunpack.i.h.bf16 %v5859_v17  ;;  %v4249_v27 = vunpack.i.h.bf16 %v5759_v39  ;;  %v4328_v40 = vunpack.i.l.bf16 %v5881_v43 }
 0x2d3   : >> { %1610 = vmatpush.msra.mxu0 %v1293_v10  ;;  %1643 = vmatpush.msra.mxu1 %v1425_v31  ;;  %v1289_v10 = vsel %vm480_vm7, %v4193_v14, %v7610_v54  ;;  %v4248_v31 = vunpack.i.l.bf16 %v5759_v39  ;;  %v4278_v14 = vunpack.i.l.bf16 %v5800_v4  ;;  %v1383_v25 = vsel %vm570_vm11, %v4318_v44, %v7611_v22 }
 0x2d4   : >> { %v4188_v54 = vunpack.i.l.bf16 %v5735_v45 }
 0x2d5   : >> { %v5915_v55 = vpop.permute.xlu0 %4321  ;;  %1611 = vmatpush.msra.mxu0 %v1291_v21  ;;  %v5927_v60 = vpop.permute.xlu1 %4341  ;;  %1644 = vmatpush.msra.mxu1 %v1423_v59  ;;  %v1421_v21 = vsel %vm615_vm10, %v4213_v20, %v7612_v58  ;;  %v1249_v20 = vsel %vm435_vm8, %v4248_v31, %v4249_v27 }
 0x2d6   : >> { %v4324_v16 = vunpack.i.h.bf16 %v5915_v55  ;;  %v7616_v3 = vunpack.i.h.bf16 %v5927_v60 }
 0x2d7   : >> { %1612 = vmatpush.msra.mxu0 %v1289_v10  ;;  %1645 = vmatpush.msra.mxu1 %v1421_v21  ;;  %v4244_v10 = vunpack.i.h.bf16 %v5785_v41  ;;  %v5956_v31 = vpop.permute.xlu2 %4351 }
 0x2d8   : >> { %v1251_v13 = vsel %vm435_vm8, %v4324_v16, %v4328_v40  ;;  %v7615_v38 = vunpack.i.h.bf16 %v5956_v31 }
 0x2d9   : >> { %1613 = vmatpush.msra.mxu0 %v1251_v13  ;;  %1646 = vmatpush.msra.mxu1 %v1383_v25  ;;  %v1247_v16 = vsel %vm435_vm8, %v4244_v10, %v4278_v14  ;;  %v1245_v13 = vsel %vm435_vm8, %v4188_v54, %v4189_v19  ;;  %v7614_v25 = vunpack.i.l.bf16 %v5783_v0  ;;  %v4348_v19 = vunpack.i.l.bf16 %v5913_v7 }
 0x2db   : >> { %1614 = vmatpush.msra.mxu0 %v1249_v20  ;;  %v7613_v20 = vunpack.i.h.bf16 %v5783_v0  ;;  %v1336_v54 = vsel %vm525_vm4, %v4219_v51, %v7614_v25 }
 0x2dd   : >> { %v5947_v59 = vpop.permute.xlu0 %4331  ;;  %1615 = vmatpush.msra.mxu0 %v1247_v16  ;;  %v5954_v22 = vpop.permute.xlu1 %4371 }
 0x2de   : >> { %v4334_v21 = vunpack.i.h.bf16 %v5947_v59  ;;  %v4333_v44 = vunpack.i.l.bf16 %v5947_v59  ;;  %v4373_v1 = vunpack.i.l.bf16 %v5954_v22  ;;  %v6157_v59 = vld [vmem:[%s5233_s12 + $0x88] sm:$0xff] }
 0x2df   : >> { %1616 = vmatpush.msra.mxu0 %v1245_v13 }
 0x2e0   : >> { %v1340_v10 = vsel %vm525_vm4, %v4294_v42, %v4333_v44  ;;  %v1338_v45 = vsel %vm525_vm4, %v4254_v23, %v4334_v21  ;;  %v4343_v23 = vunpack.i.l.bf16 %v5927_v60 }
 0x2e1   : >> { %1617 = vmatpush.msra.mxu0 %v5704_v12  ;;  %1692 = vmatpush.msrb.mxu2 %v1340_v10  ;;  %v4349_v12 = vunpack.i.h.bf16 %v5913_v7  ;;  %v4374_v10 = vunpack.i.h.bf16 %v5954_v22  ;;  %v7671_v7 = vunpack.i.h.bf16 %v5869_v53  ;;  %v7673_v53 = vunpack.i.h.bf16 %v5779_v47 }
 0x2e3   : >> { %1618 = vmatpush.msra.mxu0 %v5670_v11  ;;  %1693 = vmatpush.msrb.mxu2 %v1338_v45  ;;  %v1334_v11 = vsel %vm525_vm4, %v4199_v37, %v7613_v20  ;;  %v4353_v37 = vunpack.i.l.bf16 %v5956_v31  ;;  %v7658_v20 = vunpack.i.h.bf16 %v5806_v30  ;;  %v7660_v30 = vunpack.i.h.bf16 %v5798_v8 }
 0x2e5   : >> { %v5980_v42 = vpop.permute.xlu0 %4336  ;;  %1619 = vmatpush.msra.mxu0 %v5646_v18  ;;  %1694 = vmatpush.msrb.mxu2 %v1336_v54  ;;  %v5995_v13 = vpop.permute.xlu1 %4376  ;;  %v4288_v18 = vunpack.i.l.bf16 %v5802_v49  ;;  %v7657_v54 = vunpack.i.h.bf16 %v5816_v6  ;;  %v1516_v25 = vsel %vm705_vm6, %v7658_v20, %v4373_v1  ;;  %v1379_v6 = vsel %vm570_vm11, %v4343_v23, %v7616_v3 }
 0x2e6   : >> { %v7617_v51 = vunpack.i.h.bf16 %v5980_v42  ;;  %v4338_v16 = vunpack.i.l.bf16 %v5980_v42  ;;  %v1514_v20 = vsel %vm705_vm6, %v7660_v30, %v4374_v10  ;;  %v1377_v23 = vsel %vm570_vm11, %v4353_v37, %v7615_v38  ;;  %v6054_v38 = vld [vmem:[%s5233_s12 + $0x78] sm:$0xff] }
 0x2e7   : >> { %1620 = vmatpush.msra.mxu0 %v5631_v15  ;;  %1695 = vmatpush.msrb.mxu2 %v1334_v11  ;;  %v1296_v58 = vsel %vm480_vm7, %v7657_v54, %v4348_v19  ;;  %v4289_v15 = vunpack.i.h.bf16 %v5802_v49  ;;  %v6012_v11 = vpop.permute.xlu2 %4361  ;;  %v7659_v54 = vunpack.i.h.bf16 %v5777_v48  ;;  %v7661_v48 = vunpack.i.h.bf16 %v5781_v33 }
 0x2e8   : >> { %1621 = vmatmul.f32.vlgmr.msra.gmra.mxu0 %v5989_v32  ;;  %v1381_v45 = vsel %vm570_vm11, %v4338_v16, %v7617_v51  ;;  %v4378_v16 = vunpack.i.l.bf16 %v5995_v13  ;;  %v7662_v30 = vunpack.i.h.bf16 %v5741_v9  ;;  %v7663_v33 = vunpack.i.h.bf16 %v5749_v52 }
 0x2e9   : >> { %1647 = vmatpush.msra.mxu1 %v1381_v45  ;;  %1696 = vmatpush.msrb.mxu2 %v1296_v58  ;;  %v1294_v58 = vsel %vm480_vm7, %v7659_v54, %v4349_v12  ;;  %v6034_v45 = vld [vmem:[%s5233_s12 + $0x68] sm:$0xff]  ;;  %v4329_v54 = vunpack.i.h.bf16 %v5881_v43  ;;  %v4364_v3 = vunpack.i.h.bf16 %v6012_v11  ;;  %v4363_v51 = vunpack.i.l.bf16 %v6012_v11 }
 0x2ea   : >> { %1721 = vmatpush.msrb.mxu0 %v1516_v25  ;;  %v1290_v37 = vsel %vm480_vm7, %v7662_v30, %v4289_v15  ;;  %v4323_v9 = vunpack.i.l.bf16 %v5915_v55  ;;  %v4279_v30 = vunpack.i.h.bf16 %v5800_v4  ;;  %v7674_v49 = vunpack.i.h.bf16 %v5766_v2 }
 0x2eb   : >> { %1648 = vmatpush.msra.mxu1 %v1379_v6  ;;  %1697 = vmatpush.msrb.mxu2 %v1294_v58  ;;  %v1292_v6 = vsel %vm480_vm7, %v7661_v48, %v4288_v18  ;;  %v4379_v58 = vunpack.i.h.bf16 %v5995_v13  ;;  %v1512_v48 = vsel %vm705_vm6, %v7663_v33, %v4378_v16  ;;  %v1252_v33 = vsel %vm435_vm8, %v4328_v40, %v4329_v54 }
 0x2ec   : >> { %1722 = vmatpush.msrb.mxu0 %v1514_v20  ;;  %v7675_v43 = vunpack.i.h.bf16 %v5859_v17  ;;  %v7678_v17 = vunpack.i.h.bf16 %v5927_v60 }
 0x2ed   : >> { %v6046_v8 = vpop.permute.xlu0 %4356  ;;  %1649 = vmatpush.msra.mxu1 %v1377_v23  ;;  %1698 = vmatpush.msrb.mxu2 %v1292_v6 }
 0x2ee   : >> { %v7618_v23 = vunpack.i.h.bf16 %v6046_v8  ;;  %v4358_v6 = vunpack.i.l.bf16 %v6046_v8  ;;  %1650 = vmatmul.f32.vlgmr.msra.gmra.mxu1 %v6034_v45  ;;  %1723 = vmatpush.msrb.mxu0 %v1512_v48 }
 0x2ef   : >> { %3871 = vmatpush.msrb.mxu1 %v1516_v25  ;;  %1699 = vmatpush.msrb.mxu2 %v1290_v37  ;;  %v7664_v25 = vunpack.i.h.bf16 %v5752_v24  ;;  %v1250_v24 = vsel %vm435_vm8, %v4249_v27, %v4323_v9 }
 0x2f0   : >> { %1624 = vmatmul.f32.gmra.mxu0 %v6054_v38  ;;  %v1559_v52 = vsel %vm750_vm3, %v4358_v6, %v7618_v23  ;;  %v6085_v6 = vld [vmem:[%s7580_s4] sm:$0x7]  ;;  %v6092_v23 = vpop.permute.xlu2 %4381 }
 0x2f1   : >> { %3872 = vmatpush.msrb.mxu1 %v1514_v20  ;;  %1675 = vmatpush.msra.mxu3 %v1559_v52  ;;  %v1510_v37 = vsel %vm705_vm6, %v7664_v25, %v4379_v58  ;;  %v1557_v20 = vsel %vm750_vm3, %v4363_v51, %v4364_v3  ;;  %v1881_v40 = vperm.slane %v6085_v6, 1  ;;  %v1880_v52 = vperm.slane %v6085_v6, 0  ;;  %v6111_v25 = vld [vmem:[%s5233_s12 + $0x90] sm:$0xff] }
 0x2f2   : >> { %1700 = vmatpush.msrb.mxu2 %v1252_v33  ;;  %1724 = vmatpush.msrb.mxu0 %v1510_v37  ;;  %v6100_v33 = vld [vmem:[%s5233_s12 + $0x80] sm:$0xff]  ;;  %v4384_v39 = vunpack.i.h.bf16 %v6092_v23  ;;  %v4383_v27 = vunpack.i.l.bf16 %v6092_v23 }
 0x2f3   : >> { %3873 = vmatpush.msrb.mxu1 %v1512_v48  ;;  %1676 = vmatpush.msra.mxu3 %v1557_v20  ;;  %v1248_v48 = vsel %vm435_vm8, %v4278_v14, %v4279_v30 }
 0x2f4   : >> { %1701 = vmatpush.msrb.mxu2 %v1250_v24  ;;  %1885 = vrot.lane.b32.xlu1 %v1881_v40, %s4932_s29  ;;  %v6125_v40 = vld [vmem:[%s5233_s12 + $0x70] sm:$0xff]  ;;  %v6132_v24 = vld [vmem:[%s5233_s12 + $0x98] sm:$0xff] }
 0x2f5   : >> { %3874 = vmatpush.msrb.mxu1 %v1510_v37  ;;  %v6103_v51 = vpop.permute.xlu0 %4366  ;;  %1883 = vrot.lane.b32.xlu0 %v1880_v52, %s4932_s29  ;;  %v1553_v52 = vsel %vm750_vm3, %v4383_v27, %v4384_v39  ;;  %v4392_v27 = vpop.permute.xlu1 %4391 }
 0x2f6   : >> { %v4369_v20 = vunpack.i.h.bf16 %v6103_v51  ;;  %v4368_v37 = vunpack.i.l.bf16 %v6103_v51  ;;  %1702 = vmatpush.msrb.mxu2 %v1248_v48  ;;  %1653 = vmatmul.f32.gmra.mxu1 %v6100_v33  ;;  %v6140_v48 = vld [vmem:[%s5233_s12 + $0xa8] sm:$0xff] }
 0x2f8   : >> { %1703 = vmatpush.msrb.mxu2 %v5796_v5  ;;  %1627 = vmatmul.f32.gmra.mxu0 %v6111_v25  ;;  %v1555_v14 = vsel %vm750_vm3, %v4368_v37, %v4369_v20 }
 0x2f9   : >> { %1677 = vmatpush.msra.mxu3 %v1555_v14  ;;  %v4393_v14 = vunpack.i.l.bf16 %v4392_v27 }
 0x2fa   : >> { %1704 = vmatpush.msrb.mxu2 %v5668_v36 }
 0x2fb   : >> { %1678 = vmatpush.msra.mxu3 %v1553_v52  ;;  %v4397_v52 = vpop.permute.xlu2 %4396 }
 0x2fc   : >> { %1705 = vmatpush.msrb.mxu2 %v5659_v61  ;;  %3798 = vmatmul.msk.f32.vlgmr.msra.gmra.mxu3 %vm791_vm5, %v6125_v40  ;;  %v7665_v61 = vunpack.i.h.bf16 %v5836_v50  ;;  %v7668_v50 = vunpack.i.h.bf16 %v5804_v34 }
 0x2fd   : >> { %1779 = vmatpush.msrb.mxu3 %v4333_v44  ;;  %v4387_v5 = vpop.permute.xlu0 %4386 }
 0x2fe   : >> { %v4388_v36 = vunpack.i.l.bf16 %v4387_v5  ;;  %1706 = vmatpush.msrb.mxu2 %v5644_v62  ;;  %1656 = vmatmul.f32.gmra.mxu1 %v6132_v24  ;;  %v4389_v37 = vunpack.i.h.bf16 %v4387_v5  ;;  %v7666_v62 = vunpack.i.l.bf16 %v5783_v0  ;;  %v4394_v5 = vunpack.i.h.bf16 %v4392_v27 }
 0x2ff   : >> { %1780 = vmatpush.msrb.mxu3 %v4334_v21  ;;  %v4398_v27 = vunpack.i.l.bf16 %v4397_v52 }
 0x300   : >> { %1707 = vmatpush.msrb.mxu2 %v5629_v29  ;;  %1630 = vmatmul.f32.gmra.mxu0 %v6140_v48  ;;  %v1472_v44 = vsel %vm660_vm9, %v7665_v61, %v4388_v36  ;;  %v7667_v29 = vunpack.i.h.bf16 %v5783_v0  ;;  %v1470_v21 = vsel %vm660_vm9, %v7668_v50, %v4389_v37  ;;  %v7669_v0 = vunpack.i.h.bf16 %v5771_v63 }
 0x301   : >> { %1708 = vmatmul.f32.vlgmr.msrb.gmra.mxu2 %v5989_v32  ;;  %1781 = vmatpush.msrb.mxu3 %v7666_v62  ;;  %v4399_v61 = vunpack.i.h.bf16 %v4397_v52 }
 0x302   : >> { %1808 = vmatpush.msra.mxu2 %v4373_v1  ;;  %1725 = vmatpush.msrb.mxu0 %v1472_v44  ;;  %v6169_v1 = vld [vmem:[%s5233_s12 + $0xb0] sm:$0xff]  ;;  %v1468_v34 = vsel %vm660_vm9, %v7669_v0, %v4393_v14 }
 0x303   : >> { %3875 = vmatpush.msrb.mxu1 %v1472_v44  ;;  %1782 = vmatpush.msrb.mxu3 %v7667_v29 }
 0x304   : >> { %1809 = vmatpush.msra.mxu2 %v4374_v10  ;;  %1726 = vmatpush.msrb.mxu0 %v1470_v21  ;;  %v7670_v10 = vunpack.i.h.bf16 %v5757_v56  ;;  %v6193_v56 = vld [vmem:[%s5233_s12 + $0xa0] sm:$0xff] }
 0x305   : >> { %3876 = vmatpush.msrb.mxu1 %v1470_v21  ;;  %3799 = vmatmul.msk.f32.gmra.mxu3 %vm791_vm5, %v6157_v59  ;;  %v4402_v22 = vpop.permute.xlu0 %4401 }
 0x306   : >> { %1783 = vmatpush.msrb.mxu3 %v4348_v19  ;;  %1810 = vmatpush.msra.mxu2 %v4378_v16  ;;  %v1466_v19 = vsel %vm660_vm9, %v7670_v10, %v4394_v5  ;;  %v4403_v63 = vunpack.i.l.bf16 %v4402_v22  ;;  %v6195_v16 = vpop.permute.xlu1 %4406  ;;  %v4404_v13 = vunpack.i.h.bf16 %v4402_v22 }
 0x307   : >> { %1727 = vmatpush.msrb.mxu0 %v1468_v34  ;;  %3877 = vmatpush.msrb.mxu1 %v1468_v34  ;;  %v4408_v44 = vunpack.i.l.bf16 %v6195_v16 }
 0x308   : >> { %1659 = vmatmul.f32.gmra.mxu1 %v6169_v1  ;;  %1784 = vmatpush.msrb.mxu3 %v4349_v12  ;;  %v1428_v12 = vsel %vm615_vm10, %v7671_v7, %v4398_v27 }
 0x309   : >> { %1811 = vmatpush.msra.mxu2 %v4379_v58  ;;  %1728 = vmatpush.msrb.mxu0 %v1466_v19  ;;  %v7672_v58 = vunpack.i.h.bf16 %v5789_v46  ;;  %v4412_v46 = vpop.permute.xlu2 %4411  ;;  %v1384_v2 = vsel %vm570_vm11, %v7675_v43, %v4408_v44 }
 0x30a   : >> { %3878 = vmatpush.msrb.mxu1 %v1466_v19  ;;  %1711 = vmatmul.f32.gmra.mxu2 %v6054_v38  ;;  %v4413_v47 = vunpack.i.l.bf16 %v4412_v46  ;;  %v4414_v62 = vunpack.i.h.bf16 %v4412_v46 }
 0x30b   : >> { %1785 = vmatpush.msrb.mxu3 %v4288_v18  ;;  %1812 = vmatpush.msra.mxu2 %v4388_v36  ;;  %v1426_v18 = vsel %vm615_vm10, %v7672_v58, %v4399_v61  ;;  %v1424_v36 = vsel %vm615_vm10, %v7673_v53, %v4403_v63 }
 0x30c   : >> { %1729 = vmatpush.msrb.mxu0 %v1428_v12  ;;  %3879 = vmatpush.msrb.mxu1 %v1428_v12 }
 0x30d   : >> { %1786 = vmatpush.msrb.mxu3 %v4289_v15  ;;  %1813 = vmatpush.msra.mxu2 %v4389_v37  ;;  %v1422_v15 = vsel %vm615_vm10, %v7674_v49, %v4404_v13  ;;  %v4409_v37 = vunpack.i.h.bf16 %v6195_v16  ;;  %v4417_v55 = vpop.permute.xlu0 %4416 }
 0x30e   : >> { %1730 = vmatpush.msrb.mxu0 %v1426_v18  ;;  %3880 = vmatpush.msrb.mxu1 %v1426_v18  ;;  %v4418_v29 = vunpack.i.l.bf16 %v4417_v55  ;;  %v4419_v21 = vunpack.i.h.bf16 %v4417_v55 }
 0x30f   : >> { %3800 = vmatmul.msk.f32.gmra.mxu3 %vm791_vm5, %v6193_v56  ;;  %1814 = vmatpush.msra.mxu2 %v4393_v14  ;;  %v7677_v14 = vunpack.i.h.bf16 %v5980_v42  ;;  %v7679_v42 = vunpack.i.h.bf16 %v5956_v31 }
 0x310   : >> { %1787 = vmatpush.msrb.mxu3 %v4329_v54  ;;  %1731 = vmatpush.msrb.mxu0 %v1424_v36  ;;  %v6223_v54 = vld [vmem:[%s5233_s12 + $0xb8] sm:$0xff]  ;;  %s4942_s12 = smov (%p361_p4), 109  }
 0x311   : >> { %3881 = vmatpush.msrb.mxu1 %v1424_v36  ;;  %1815 = vmatpush.msra.mxu2 %v4394_v5  ;;  %v1382_v4 = vsel %vm570_vm11, %v7677_v14, %v4409_v37  ;;  %v1378_v50 = vsel %vm570_vm11, %v7679_v42, %v4414_v62 }
 0x312   : >> { %1788 = vmatpush.msrb.mxu3 %v4323_v9  ;;  %1732 = vmatpush.msrb.mxu0 %v1422_v15  ;;  %v7676_v9 = vunpack.i.l.bf16 %v5785_v41  ;;  %v4422_v41 = vpop.permute.xlu1 %4421 }
 0x313   : >> { %3882 = vmatpush.msrb.mxu1 %v1422_v15  ;;  %1714 = vmatmul.f32.gmra.mxu2 %v6111_v25  ;;  %v4423_v60 = vunpack.i.l.bf16 %v4422_v41  ;;  %v4424_v31 = vunpack.i.h.bf16 %v4422_v41 }
 0x314   : >> { %1789 = vmatpush.msrb.mxu3 %v4279_v30  ;;  %1816 = vmatpush.msra.mxu2 %v4398_v27  ;;  %v1380_v30 = vsel %vm570_vm11, %v7678_v17, %v4413_v47 }
 0x315   : >> { %1733 = vmatpush.msrb.mxu0 %v1384_v2  ;;  %3883 = vmatpush.msrb.mxu1 %v1384_v2  ;;  %v6287_v11 = vpop.permute.xlu0 %1580 }
 0x316   : >> { %1790 = vmatpush.msrb.mxu3 %v7676_v9  ;;  %1817 = vmatpush.msra.mxu2 %v4399_v61 }
 0x317   : >> { %1734 = vmatpush.msrb.mxu0 %v1382_v4  ;;  %3884 = vmatpush.msrb.mxu1 %v1382_v4 }
 0x318   : >> { %3801 = vmatmul.msk.f32.gmra.mxu3 %vm791_vm5, %v6223_v54  ;;  %1818 = vmatpush.msra.mxu2 %v4403_v63 }
 0x319   : >> { %1791 = vmatpush.msrb.mxu3 %v5714_v35  ;;  %1735 = vmatpush.msrb.mxu0 %v1380_v30  ;;  %v7680_v35 = vunpack.i.h.bf16 %v6046_v8  ;;  %v1556_v8 = vsel %vm750_vm3, %v4369_v20, %v4423_v60 }
 0x31a   : >> { %3885 = vmatpush.msrb.mxu1 %v1380_v30  ;;  %1819 = vmatpush.msra.mxu2 %v4404_v13 }
 0x31b   : >> { %1792 = vmatpush.msrb.mxu3 %v5721_v28  ;;  %1736 = vmatpush.msrb.mxu0 %v1378_v50  ;;  %v1560_v52 = vsel %vm750_vm3, %v7680_v35, %v4418_v29  ;;  %v1558_v28 = vsel %vm750_vm3, %v4364_v3, %v4419_v21 }
 0x31c   : >> { %3886 = vmatpush.msrb.mxu1 %v1378_v50  ;;  %1717 = vmatmul.f32.gmra.mxu2 %v6140_v48 }
 0x31d   : >> { %1737 = vmatmul.f32.vlgmr.msrb.gmra.mxu0 %v6034_v45  ;;  %1743 = vmatmul.f32.vlgmr.msrb.gmra.mxu1 %v6132_v24 }
 0x31e   : >> { %1762 = vmatpush.msra.mxu1 %v1560_v52  ;;  %1793 = vmatpush.msrb.mxu3 %v5692_v26  ;;  %v1554_v26 = vsel %vm750_vm3, %v4384_v39, %v4424_v31 }
 0x31f   : >> { %1820 = vmatpush.msra.mxu2 %v4408_v44  ;;  %1849 = vmatpush.msra.mxu0 %v4418_v29 }
 0x320   : >> { %1763 = vmatpush.msra.mxu1 %v1558_v28  ;;  %1794 = vmatpush.msrb.mxu3 %v5683_v57  ;;  %v1882_v57 = vperm.slane %v6085_v6, 2 }
 0x321   : >> { %1821 = vmatpush.msra.mxu2 %v4409_v37  ;;  %1850 = vmatpush.msra.mxu0 %v4419_v21 }
 0x322   : >> { %1764 = vmatpush.msra.mxu1 %v1556_v8  ;;  %1795 = vmatmul.f32.vlgmr.msrb.gmra.mxu3 %v5989_v32 }
 0x323   : >> { %1822 = vmatpush.msra.mxu2 %v4413_v47  ;;  %1851 = vmatpush.msra.mxu0 %v4423_v60 }
 0x324   : >> { %1765 = vmatpush.msra.mxu1 %v1554_v26  ;;  %1887 = vrot.lane.b32.xlu2 %v1882_v57, %s4932_s29  ;;  %s4941_s29 = smov (%p361_p4), 108  }
 0x325   : >> { %1823 = vmatpush.msra.mxu2 %v4414_v62  ;;  %1852 = vmatpush.msra.mxu0 %v4424_v31 }
 0x326   : >> { %1740 = vmatmul.f32.gmra.mxu0 %v6100_v33  ;;  %1746 = vmatmul.f32.gmra.mxu1 %v6169_v1 }
 0x327   : >> { %1824 = vmatmul.f32.vlgmr.msra.gmra.mxu2 %v6034_v45  ;;  %v1576_v45 = vpop.permute.xlu2 %1575 }
 0x32a   : >> { %1798 = vmatmul.f32.gmra.mxu3 %v6054_v38  ;;  %v6285_v38 = vpop.permute.xlu1 %1585 }
 0x32e   : >> { %3802 = vmatmul.msk.f32.vlgmr.msra.gmra.mxu1 %vm791_vm5, %v6125_v40  ;;  %3806 = vmatmul.msk.f32.vlgmr.msra.gmra.mxu0 %vm791_vm5, %v6125_v40 }
 0x32f   : >> { %1827 = vmatmul.f32.gmra.mxu2 %v6100_v33  ;;  %v6294_v36 = vpop.permute.xlu2 %1590 }
 0x332   : >> { %1801 = vmatmul.f32.gmra.mxu3 %v6111_v25 }
 0x336   : >> { %3803 = vmatmul.msk.f32.gmra.mxu1 %vm791_vm5, %v6157_v59  ;;  %3807 = vmatmul.msk.f32.gmra.mxu0 %vm791_vm5, %v6157_v59 }
 0x337   : >> { %1830 = vmatmul.f32.gmra.mxu2 %v6132_v24 }
 0x33a   : >> { %1804 = vmatmul.f32.gmra.mxu3 %v6140_v48 }
 0x33e   : >> { %3804 = vmatmul.msk.f32.gmra.mxu1 %vm791_vm5, %v6193_v56  ;;  %3808 = vmatmul.msk.f32.gmra.mxu0 %vm791_vm5, %v6193_v56 }
 0x33f   : >> { %1833 = vmatmul.f32.gmra.mxu2 %v6169_v1 }
 0x346   : >> { %3805 = vmatmul.msk.f32.gmra.mxu1 %vm791_vm5, %v6223_v54  ;;  %3809 = vmatmul.msk.f32.gmra.mxu0 %vm791_vm5, %v6223_v54 }
 0x365   : >> { %v1622_v32 = vpop.f32.mrf.mxu0 }
 0x366   : >> { %v1623_v23 = vadd.f32 %v1622_v32, %v1576_v45  ;;  %v1886_v33 = vpop.permute.xlu1 %1885 }
 0x367   : >> { %v1884_v39 = vpop.permute.xlu0 %1883 }
 0x368   : >> { %v1889_v24 = vsel %vm570_vm11, %v1884_v39, %v1886_v33 }
 0x36b   : >> { %v1651_v3 = vpop.f32.mrf.mxu1 }
 0x36c   : >> { %v1652_v51 = vadd.f32 %v1651_v3, %v1623_v23 }
 0x36d   : >> { %v1625_v6 = vpop.f32.mrf.mxu0 }
 0x36e   : >> { %v1626_v1 = vadd.f32 %v1625_v6, %v6287_v11 }
 0x373   : >> { %v1654_v25 = vpop.f32.mrf.mxu1 }
 0x374   : >> { %v1655_v0 = vadd.f32 %v1654_v25, %v1626_v1 }
 0x375   : >> { %v1628_v34 = vpop.f32.mrf.mxu0 }
 0x376   : >> { %v1629_v7 = vadd.f32 %v1628_v34, %v6285_v38 }
 0x37b   : >> { %v1657_v27 = vpop.f32.mrf.mxu1 }
 0x37c   : >> { %v1658_v12 = vadd.f32 %v1657_v27, %v1629_v7 }
 0x37d   : >> { %v1631_v56 = vpop.f32.mrf.mxu0 }
 0x37e   : >> { %v1632_v46 = vadd.f32 %v1631_v56, %v6294_v36  ;;  %v1888_v41 = vpop.permute.xlu2 %1887 }
 0x37f   : >> { %v1680_v20 = vpop.f32.mrf.mxu3  ;;  %v1890_v31 = vsel %vm570_vm11, %v1886_v33, %v1888_v41 }
 0x380   : >> { %v1681_v40 = vadd.f32 %v1680_v20, %v1652_v51 }
 0x382   : >> { %v1866_v48 = vmax.f32 %v1681_v40, 0.0 }
 0x384   : >> { %v1709_v59 = vpop.f32.mrf.mxu2  ;;  %v1894_v5 = vmul.f32 %v1889_v24, %v1866_v48 }
 0x385   : >> { %v1660_v16 = vpop.f32.mrf.mxu1  ;;  %v1710_v4 = vadd.f32 %v1709_v59, %v1576_v45 }
 0x386   : >> { %1918 = vrot.lane.b32.xlu0 %v1894_v5, %s4934_s11  ;;  %v1661_v49 = vadd.f32 %v1660_v16, %v1632_v46 }
 0x388   : >> { %v1683_v22 = vpop.f32.mrf.mxu3 }
 0x389   : >> { %v1684_v10 = vadd.f32 %v1683_v22, %v1655_v0 }
 0x38b   : >> { %v1869_v19 = vmax.f32 %v1684_v10, 0.0 }
 0x38d   : >> { %v1897_v61 = vmul.f32 %v1889_v24, %v1869_v19  ;;  %v1712_v63 = vpop.f32.mrf.mxu2 }
 0x38e   : >> { %v1713_v26 = vadd.f32 %v1712_v63, %v6287_v11 }
 0x38f   : >> { %1924 = vrot.lane.b32.xlu0 %v1897_v61, %s4934_s11 }
 0x392   : >> { %v1686_v13 = vpop.f32.mrf.mxu3 }
 0x393   : >> { %v1687_v58 = vadd.f32 %v1686_v13, %v1658_v12 }
 0x395   : >> { %v1872_v18 = vmax.f32 %v1687_v58, 0.0 }
 0x396   : >> { %v1715_v53 = vpop.f32.mrf.mxu2 }
 0x397   : >> { %v1900_v44 = vmul.f32 %v1889_v24, %v1872_v18  ;;  %v1716_v40 = vadd.f32 %v1715_v53, %v6285_v38 }
 0x399   : >> { %1930 = vrot.lane.b32.xlu0 %v1900_v44, %s4934_s11 }
 0x39a   : >> { %v1738_v15 = vpop.f32.mrf.mxu0  ;;  %v1744_v37 = vpop.f32.mrf.mxu1 }
 0x39b   : >> { %v1689_v47 = vpop.f32.mrf.mxu3  ;;  %v1739_v30 = vadd.f32 %v1738_v15, %v1710_v4  ;;  %v1745_v1 = vadd.f32 %v1744_v37, %v1716_v40 }
 0x39c   : >> { %v1690_v43 = vadd.f32 %v1689_v47, %v1661_v49 }
 0x39e   : >> { %v1875_v2 = vmax.f32 %v1690_v43, 0.0 }
 0x39f   : >> { %v1718_v62 = vpop.f32.mrf.mxu2 }
 0x3a0   : >> { %v1903_v54 = vmul.f32 %v1889_v24, %v1875_v2  ;;  %v1719_v61 = vadd.f32 %v1718_v62, %v6294_v36 }
 0x3a2   : >> { %1936 = vrot.lane.b32.xlu0 %v1903_v54, %s4934_s11 }
 0x3a3   : >> { %v1741_v55 = vpop.f32.mrf.mxu0  ;;  %v1747_v9 = vpop.f32.mrf.mxu1 }
 0x3a4   : >> { %v1748_v13 = vadd.f32 %v1747_v9, %v1719_v61 }
 0x3a5   : >> { %v1796_v14 = vpop.f32.mrf.mxu3 }
 0x3a6   : >> { %v1797_v17 = vadd.f32 %v1796_v14, %v1576_v45  ;;  %v1742_v45 = vadd.f32 %v1741_v55, %v1713_v26 }
 0x3aa   : >> { %v1825_v29 = vpop.f32.mrf.mxu2 }
 0x3ab   : >> { %v1826_v42 = vadd.f32 %v1825_v29, %v1797_v17  ;;  %v1767_v50 = vpop.f32.mrf.mxu1  ;;  %v1854_v21 = vpop.f32.mrf.mxu0 }
 0x3ac   : >> { %v1768_v60 = vadd.f32 %v1767_v50, %v1739_v30 }
 0x3ad   : >> { %v1855_v35 = vadd.f32 %v1854_v21, %v1826_v42  ;;  %v1799_v52 = vpop.f32.mrf.mxu3 }
 0x3ae   : >> { %v1867_v28 = vmax.f32 %v1768_v60, 0.0  ;;  %v1800_v32 = vadd.f32 %v1799_v52, %v6287_v11 }
 0x3af   : >> { %v1868_v8 = vmax.f32 %v1855_v35, 0.0 }
 0x3b0   : >> { %v1895_v57 = vmul.f32 %v1890_v31, %v1867_v28 }
 0x3b1   : >> { %v1896_v3 = vmul.f32 %v1888_v41, %v1868_v8 }
 0x3b2   : >> { %v1828_v23 = vpop.f32.mrf.mxu2  ;;  %1920 = vrot.lane.b32.xlu1 %v1895_v57, %s4934_s11 }
 0x3b3   : >> { %v1829_v6 = vadd.f32 %v1828_v23, %v1800_v32  ;;  %1922 = vrot.lane.b32.xlu2 %v1896_v3, %s4934_s11  ;;  %v1770_v51 = vpop.f32.mrf.mxu1  ;;  %v1857_v25 = vpop.f32.mrf.mxu0 }
 0x3b4   : >> { %v1771_v39 = vadd.f32 %v1770_v51, %v1742_v45 }
 0x3b5   : >> { %v1858_v20 = vadd.f32 %v1857_v25, %v1829_v6  ;;  %v1802_v33 = vpop.f32.mrf.mxu3 }
 0x3b6   : >> { %v1870_v24 = vmax.f32 %v1771_v39, 0.0  ;;  %v1803_v11 = vadd.f32 %v1802_v33, %v6285_v38 }
 0x3b7   : >> { %v1871_v48 = vmax.f32 %v1858_v20, 0.0 }
 0x3b8   : >> { %v1898_v59 = vmul.f32 %v1890_v31, %v1870_v24 }
 0x3b9   : >> { %v1899_v5 = vmul.f32 %v1888_v41, %v1871_v48 }
 0x3ba   : >> { %v1831_v0 = vpop.f32.mrf.mxu2  ;;  %1926 = vrot.lane.b32.xlu1 %v1898_v59, %s4934_s11 }
 0x3bb   : >> { %v1832_v34 = vadd.f32 %v1831_v0, %v1803_v11  ;;  %1928 = vrot.lane.b32.xlu2 %v1899_v5, %s4934_s11  ;;  %v1773_v27 = vpop.f32.mrf.mxu1  ;;  %v1860_v22 = vpop.f32.mrf.mxu0 }
 0x3bc   : >> { %v1774_v10 = vadd.f32 %v1773_v27, %v1745_v1 }
 0x3bd   : >> { %v1861_v19 = vadd.f32 %v1860_v22, %v1832_v34  ;;  %v1805_v7 = vpop.f32.mrf.mxu3 }
 0x3be   : >> { %v1873_v63 = vmax.f32 %v1774_v10, 0.0  ;;  %v1806_v38 = vadd.f32 %v1805_v7, %v6294_v36 }
 0x3bf   : >> { %v1874_v12 = vmax.f32 %v1861_v19, 0.0 }
 0x3c0   : >> { %v1901_v56 = vmul.f32 %v1890_v31, %v1873_v63 }
 0x3c1   : >> { %v1902_v16 = vmul.f32 %v1888_v41, %v1874_v12 }
 0x3c2   : >> { %v1834_v58 = vpop.f32.mrf.mxu2  ;;  %1932 = vrot.lane.b32.xlu1 %v1901_v56, %s4934_s11 }
 0x3c3   : >> { %v1835_v18 = vadd.f32 %v1834_v58, %v1806_v38  ;;  %1934 = vrot.lane.b32.xlu2 %v1902_v16, %s4934_s11  ;;  %v1776_v53 = vpop.f32.mrf.mxu1  ;;  %v1863_v44 = vpop.f32.mrf.mxu0 }
 0x3c4   : >> { %v1777_v46 = vadd.f32 %v1776_v53, %v1748_v13 }
 0x3c5   : >> { %v1864_v49 = vadd.f32 %v1863_v44, %v1835_v18 }
 0x3c6   : >> { %v1876_v15 = vmax.f32 %v1777_v46, 0.0 }
 0x3c7   : >> { %v1877_v37 = vmax.f32 %v1864_v49, 0.0 }
 0x3c8   : >> { %v1904_v47 = vmul.f32 %v1890_v31, %v1876_v15 }
 0x3c9   : >> { %v1905_v43 = vmul.f32 %v1888_v41, %v1877_v37 }
 0x3ca   : >> { %1938 = vrot.lane.b32.xlu1 %v1904_v47, %s4934_s11 }
 0x3cb   : >> { %1940 = vrot.lane.b32.xlu2 %v1905_v43, %s4934_s11 }
 0x3f8   : >> { %v1919_v36 = vpop.permute.xlu0 %1918 }
 0x3f9   : >> { %1962 = vst.msk [vmem:[#allocation2] sm:$0xff] %vm1161_vm12, %v1919_v36 }
 0x400   : > { %v6343_v45 = vld [vmem:[#allocation2] sm:$0xff] (%p361_p4) }
 0x401   : >> { %v1925_v2 = vpop.permute.xlu0 %1924 }
 0x402   : >> { %1965 = vst.msk [vmem:[#allocation2 + $0x18] sm:$0xff] %vm1161_vm12, %v1925_v2 }
 0x409   : > { %v6364_v24 = vld [vmem:[#allocation2 + $0x18] sm:$0xff] (%p361_p4) }
 0x40a   : > { %v4560_v19 = vpack.i.bf16 (%p361_p4), %v6343_v45, %v6364_v24 }
 0x40b   : >> { %v1931_v54 = vpop.permute.xlu0 %1930 }
 0x40c   : >> { %1968 = vst.msk [vmem:[#allocation2 + $0x30] sm:$0xff] %vm1161_vm12, %v1931_v54 }
 0x40d   : >> { %v1923_v55 = vpop.permute.xlu2 %1922 }
 0x413   : > { %v6358_v20 = vld [vmem:[#allocation2 + $0x30] sm:$0xff] (%p361_p4) }
 0x414   : >> { %v1937_v62 = vpop.permute.xlu0 %1936 }
 0x415   : >> { %1971 = vst.msk [vmem:[#allocation2 + $0x48] sm:$0xff] %vm1161_vm12, %v1937_v62  ;;  %v1929_v17 = vpop.permute.xlu2 %1928 }
 0x41c   : > { %v6335_v26 = vld [vmem:[#allocation2 + $0x48] sm:$0xff] (%p361_p4) }
 0x41d   : >> { %v1935_v42 = vpop.permute.xlu2 %1934 }
 0x424   : >> { %v1921_v9 = vpop.permute.xlu1 %1920 }
 0x425   : >> { %v1942_v14 = vsel %vm324_vm0, %v1919_v36, %v1921_v9  ;;  %v1943_v4 = vsel %vm324_vm0, %v1921_v9, %v1923_v55  ;;  %v1941_v35 = vpop.permute.xlu2 %1940 }
 0x426   : >> { %1963 = vst [vmem:[#allocation2 + $0x8] sm:$0xff] %v1942_v14 }
 0x427   : >> { %1964 = vst.msk [vmem:[#allocation2 + $0x10] sm:$0xff] %vm1164_vm13, %v1943_v4 }
 0x42c   : >> { %v1927_v30 = vpop.permute.xlu1 %1926 }
 0x42d   : >> { %v1944_v29 = vsel %vm324_vm0, %v1925_v2, %v1927_v30  ;;  %v1945_v41 = vsel %vm324_vm0, %v1927_v30, %v1929_v17  ;;  %v6345_v23 = vld [vmem:[#allocation2 + $0x8] sm:$0xff] (%p361_p4) }
 0x42e   : >> { %1966 = vst [vmem:[#allocation2 + $0x20] sm:$0xff] %v1944_v29  ;;  %v4425_v51 = vpack.i.bf16 (%p361_p4), %v6345_v23, %v6343_v45  ;;  %v6362_v40 = vld [vmem:[#allocation2 + $0x10] sm:$0xff] (%p361_p4) }
 0x42f   : >> { %1967 = vst.msk [vmem:[#allocation2 + $0x28] sm:$0xff] %vm1164_vm13, %v1945_v41  ;;  %v4430_v5 = vpack.i.bf16 (%p361_p4), %v6364_v24, %v6362_v40  ;;  %v4555_v27 = vpack.i.bf16 (%p361_p4), %v6362_v40, %v6345_v23 }
 0x430   : > { %4426 = vrot.lane.b32.xlu0 (%p361_p4), %v4425_v51, %s4935_s20 }
 0x434   : >> { %v1933_v50 = vpop.permute.xlu1 %1932 }
 0x435   : >> { %v1946_v21 = vsel %vm324_vm0, %v1931_v54, %v1933_v50  ;;  %v1947_v60 = vsel %vm324_vm0, %v1933_v50, %v1935_v42  ;;  %v6337_v57 = vld [vmem:[#allocation2 + $0x20] sm:$0xff] (%p361_p4) }
 0x436   : >> { %1969 = vst [vmem:[#allocation2 + $0x38] sm:$0xff] %v1946_v21  ;;  %v6341_v3 = vld [vmem:[#allocation2 + $0x28] sm:$0xff] (%p361_p4)  ;;  %v4510_v11 = vpack.i.bf16 (%p361_p4), %v6337_v57, %v6364_v24  ;;  %v4545_v10 = vpack.i.bf16 (%p361_p4), %v6337_v57, %v6335_v26 }
 0x437   : >> { %1970 = vst.msk [vmem:[#allocation2 + $0x40] sm:$0xff] %vm1164_vm13, %v1947_v60  ;;  %v4435_v6 = vpack.i.bf16 (%p361_p4), %v6341_v3, %v6337_v57  ;;  %v4550_v22 = vpack.i.bf16 (%p361_p4), %v6358_v20, %v6341_v3  ;;  %v4660_v18 = vpack.i.bf16 (%p361_p4), %v6362_v40, %v6341_v3 }
 0x438   : > { %4431 = vrot.lane.b32.xlu0 (%p361_p4), %v4430_v5, %s4935_s20 }
 0x439   : > { %4436 = vrot.lane.b32.xlu1 (%p361_p4), %v4435_v6, %s4935_s20 }
 0x43b   : > { %363 = sbr.rel (!%p361_p4) target bundleno = 32 (0x20), region = 112 }
 0x43c   : >> { %v1939_v52 = vpop.permute.xlu1 %1938 }
 0x43d   : >> { %v1948_v31 = vsel %vm324_vm0, %v1937_v62, %v1939_v52  ;;  %v1949_v28 = vsel %vm324_vm0, %v1939_v52, %v1941_v35  ;;  %v6360_v33 = vld [vmem:[#allocation2 + $0x38] sm:$0xff] (%p361_p4) }
 0x43e   : >> { %1972 = vst [vmem:[#allocation2 + $0x50] sm:$0xff] %v1948_v31  ;;  %v6333_v8 = vld [vmem:[#allocation2 + $0x40] sm:$0xff] (%p361_p4)  ;;  %v4440_v59 = vpack.i.bf16 (%p361_p4), %v6360_v33, %v6358_v20 }
 0x43f   : >> { %1973 = vst.msk [vmem:[#allocation2 + $0x58] sm:$0xff] %vm1164_vm13, %v1949_v28  ;;  %v4445_v32 = vpack.i.bf16 (%p361_p4), %v6335_v26, %v6333_v8  ;;  %v4540_v34 = vpack.i.bf16 (%p361_p4), %v6333_v8, %v6360_v33 }
 0x440   : > { %4456 = vrot.lane.b32.xlu0 %v4425_v51, %s4936_s23 }
 0x441   : > { %4446 = vrot.lane.b32.xlu2 %v4445_v32, %s4935_s20  ;;  %4441 = vrot.lane.b32.xlu1 %v4440_v59, %s4935_s20 }
 0x445   : > { %v6354_v25 = vld [vmem:[#allocation2 + $0x50] sm:$0xff] }
 0x446   : > { %v6356_v39 = vld [vmem:[#allocation2 + $0x58] sm:$0xff]  ;;  %v4500_v1 = vpack.i.bf16 %v6354_v25, %v6335_v26 }
 0x447   : > { %v4450_v48 = vpack.i.bf16 %v6356_v39, %v6354_v25  ;;  %v4520_v0 = vpack.i.bf16 %v6358_v20, %v6356_v39  ;;  %v4655_v53 = vpack.i.bf16 %v6333_v8, %v6356_v39 }
 0x448   : > { %4471 = vrot.lane.b32.xlu0 %v4440_v59, %s4936_s23 }
 0x449   : > { %4451 = vrot.lane.b32.xlu2 %v4450_v48, %s4935_s20  ;;  %4461 = vrot.lane.b32.xlu1 %v4430_v5, %s4936_s23 }
 0x450   : > { %4486 = vrot.lane.b32.xlu0 %v4425_v51, %s4937_s25 }
 0x451   : > { %4466 = vrot.lane.b32.xlu2 %v4435_v6, %s4936_s23  ;;  %4476 = vrot.lane.b32.xlu1 %v4445_v32, %s4936_s23 }
 0x458   : > { %4501 = vrot.lane.b32.xlu0 %v4500_v1, %s4938_s26 }
 0x459   : > { %4481 = vrot.lane.b32.xlu2 %v4450_v48, %s4936_s23  ;;  %4491 = vrot.lane.b32.xlu1 %v4430_v5, %s4937_s25 }
 0x460   : > { %4516 = vrot.lane.b32.xlu0 %v4500_v1, %s4937_s25 }
 0x461   : > { %4496 = vrot.lane.b32.xlu2 %v4435_v6, %s4937_s25  ;;  %4506 = vrot.lane.b32.xlu1 %v4440_v59, %s4938_s26 }
 0x468   : > { %4531 = vrot.lane.b32.xlu0 %v4540_v34, %s4937_s25 }
 0x469   : > { %4511 = vrot.lane.b32.xlu2 %v4510_v11, %s4938_s26  ;;  %4521 = vrot.lane.b32.xlu1 %v4520_v0, %s4937_s25 }
 0x470   : > { %4546 = vrot.lane.b32.xlu0 %v4545_v10, %s4939_s27 }
 0x471   : > { %4526 = vrot.lane.b32.xlu2 %v4425_v51, %s4938_s26  ;;  %4536 = vrot.lane.b32.xlu1 %v4450_v48, %s4939_s27 }
 0x478   : > { %4561 = vrot.lane.b32.xlu0 %v4560_v19, %s4939_s27 }
 0x479   : > { %4541 = vrot.lane.b32.xlu2 %v4540_v34, %s4939_s27  ;;  %4551 = vrot.lane.b32.xlu1 %v4550_v22, %s4939_s27 }
 0x480   : > { %4576 = vrot.lane.b32.xlu0 %v4545_v10, %s4940_s28 }
 0x481   : > { %4556 = vrot.lane.b32.xlu2 %v4555_v27, %s4939_s27  ;;  %4566 = vrot.lane.b32.xlu1 %v4450_v48, %s4940_s28 }
 0x488   : > { %4591 = vrot.lane.b32.xlu0 %v4560_v19, %s4940_s28 }
 0x489   : > { %4571 = vrot.lane.b32.xlu2 %v4540_v34, %s4940_s28  ;;  %4581 = vrot.lane.b32.xlu1 %v4550_v22, %s4940_s28 }
 0x490   : > { %4606 = vrot.lane.b32.xlu0 %v4545_v10, %s4941_s29 }
 0x491   : > { %4586 = vrot.lane.b32.xlu2 %v4555_v27, %s4940_s28  ;;  %4596 = vrot.lane.b32.xlu1 %v4450_v48, %s4941_s29 }
 0x498   : > { %4621 = vrot.lane.b32.xlu0 %v4560_v19, %s4941_s29 }
 0x499   : > { %4601 = vrot.lane.b32.xlu2 %v4540_v34, %s4941_s29  ;;  %4611 = vrot.lane.b32.xlu1 %v4550_v22, %s4941_s29 }
 0x49b   : > { %v6421_v61 = vpop.permute.xlu2 %4446 }
 0x49c   : > { %v4449_v63 = vunpack.i.h.bf16 %v6421_v61 }
 0x4a0   : > { %4636 = vrot.lane.b32.xlu0 %v4545_v10, %s4942_s12  ;;  %v6525_v10 = vld [vmem:[%s7578_s2 + $0x550] sm:$0xff] }
 0x4a1   : > { %4616 = vrot.lane.b32.xlu2 %v4555_v27, %s4941_s29  ;;  %4626 = vrot.lane.b32.xlu1 %v4450_v48, %s4942_s12 }
 0x4a2   : > { %v6445_v13 = vpop.permute.xlu0 %4426 }
 0x4a3   : > { %v6427_v7 = vpop.permute.xlu2 %4451 }
 0x4a4   : > { %v4453_v12 = vunpack.i.l.bf16 %v6427_v7 }
 0x4a6   : > { %v6433_v56 = vsel %vm435_vm8, %v4449_v63, %v4453_v12 }
 0x4a8   : > { %4651 = vrot.lane.b32.xlu0 %v4560_v19, %s4942_s12 }
 0x4a9   : > { %4631 = vrot.lane.b32.xlu2 %v4540_v34, %s4942_s12  ;;  %4641 = vrot.lane.b32.xlu1 %v4550_v22, %s4942_s12 }
 0x4aa   : > { %v6458_v46 = vpop.permute.xlu0 %4431 }
 0x4ab   : > { %v6438_v16 = vpop.permute.xlu2 %4466  ;;  %v6443_v38 = vpop.permute.xlu1 %4436  ;;  %v4434_v15 = vunpack.i.h.bf16 %v6458_v46 }
 0x4ac   : > { %v7630_v49 = vunpack.i.l.bf16 %v6443_v38 }
 0x4ae   : > { %v6467_v47 = vsel %vm435_vm8, %v4434_v15, %v7630_v49 }
 0x4b1   : > { %4646 = vrot.lane.b32.xlu2 %v4555_v27, %s4942_s12  ;;  %4656 = vrot.lane.b32.xlu1 %v4655_v53, %s4938_s26 }
 0x4b2   : > { %v6471_v36 = vpop.permute.xlu0 %4456 }
 0x4b3   : > { %v6447_v58 = vpop.permute.xlu2 %4481  ;;  %v6456_v44 = vpop.permute.xlu1 %4441 }
 0x4b9   : > { %4661 = vrot.lane.b32.xlu2 %v4660_v18, %s4938_s26 }
 0x4ba   : > { %v6477_v62 = vpop.permute.xlu0 %4471 }
 0x4bb   : > { %v6462_v37 = vpop.permute.xlu2 %4496  ;;  %v6469_v43 = vpop.permute.xlu1 %4461 }
 0x4bc   : > { %v7624_v27 = vunpack.i.h.bf16 %v6462_v37  ;;  %v4498_v22 = vunpack.i.l.bf16 %v6462_v37 }
 0x4c2   : > { %v6483_v14 = vpop.permute.xlu0 %4486 }
 0x4c3   : > { %v6473_v2 = vpop.permute.xlu2 %4511  ;;  %v6475_v54 = vpop.permute.xlu1 %4476 }
 0x4c4   : > { %v7621_v4 = vunpack.i.h.bf16 %v6473_v2  ;;  %v4513_v17 = vunpack.i.l.bf16 %v6473_v2 }
 0x4c6   : > { %v2358_v32 = vsel %vm750_vm3, %v4513_v17, %v7621_v4  ;;  %v4468_v4 = vunpack.i.l.bf16 %v6438_v16 }
 0x4ca   : > { %v6489_v29 = vpop.permute.xlu0 %4501 }
 0x4cb   : > { %v6479_v55 = vpop.permute.xlu2 %4526  ;;  %v6481_v9 = vpop.permute.xlu1 %4491  ;;  %v7626_v21 = vunpack.i.h.bf16 %v6489_v29  ;;  %v4503_v60 = vunpack.i.l.bf16 %v6489_v29 }
 0x4cc   : > { %v7619_v35 = vunpack.i.h.bf16 %v6479_v55  ;;  %v4528_v52 = vunpack.i.l.bf16 %v6479_v55  ;;  %v4494_v19 = vunpack.i.h.bf16 %v6481_v9 }
 0x4cd   : > { %v2362_v31 = vsel %vm750_vm3, %v4503_v60, %v7626_v21 }
 0x4ce   : > { %2479 = vmatpush.msra.mxu2 %v2362_v31  ;;  %v2356_v6 = vsel %vm750_vm3, %v4528_v52, %v7619_v35  ;;  %v4479_v35 = vunpack.i.h.bf16 %v6475_v54 }
 0x4d2   : > { %v4517_v48 = vpop.permute.xlu0 %4516 }
 0x4d3   : > { %v6487_v30 = vpop.permute.xlu1 %4506  ;;  %v6491_v41 = vpop.permute.xlu2 %4541  ;;  %v4519_v5 = vunpack.i.h.bf16 %v4517_v48  ;;  %v4518_v11 = vunpack.i.l.bf16 %v4517_v48  ;;  %v4488_v48 = vunpack.i.l.bf16 %v6483_v14 }
 0x4d4   : > { %v7625_v42 = vunpack.i.h.bf16 %v6487_v30  ;;  %v4508_v50 = vunpack.i.l.bf16 %v6487_v30  ;;  %v7627_v63 = vunpack.i.h.bf16 %v6491_v41  ;;  %v4543_v18 = vunpack.i.l.bf16 %v6491_v41 }
 0x4d5   : > { %v2137_v34 = vsel %vm525_vm4, %v4518_v11, %v4519_v5 }
 0x4d6   : > { %v2360_v28 = vsel %vm750_vm3, %v4508_v50, %v7625_v42  ;;  %2409 = vmatpush.msra.mxu0 %v2137_v34  ;;  %v4483_v34 = vunpack.i.l.bf16 %v6447_v58 }
 0x4d7   : > { %2480 = vmatpush.msra.mxu2 %v2360_v28  ;;  %v7623_v28 = vunpack.i.h.bf16 %v6447_v58 }
 0x4d9   : > { %2481 = vmatpush.msra.mxu2 %v2358_v32  ;;  %v7629_v32 = vunpack.i.l.bf16 %v6481_v9 }
 0x4da   : > { %v6533_v17 = vpop.permute.xlu0 %4531 }
 0x4db   : > { %v6511_v51 = vpop.permute.xlu1 %4521  ;;  %2482 = vmatpush.msra.mxu2 %v2356_v6  ;;  %v6514_v1 = vpop.permute.xlu2 %4556  ;;  %v7620_v52 = vunpack.i.h.bf16 %v6533_v17  ;;  %v4533_v31 = vunpack.i.l.bf16 %v6533_v17  ;;  %v4489_v6 = vunpack.i.h.bf16 %v6483_v14  ;;  %v2316_v14 = vsel %vm705_vm6, %v4543_v18, %v7627_v63 }
 0x4dc   : > { %v7622_v59 = vunpack.i.l.bf16 %v6511_v51  ;;  %v4524_v53 = vunpack.i.h.bf16 %v6511_v51  ;;  %3826 = vmatmul.msk.f32.vlgmr.msra.gmra.mxu2 %vm791_vm5, %v6525_v10 }
 0x4dd   : > { %v2136_v11 = vsel %vm525_vm4, %v4533_v31, %v7620_v52  ;;  %v2134_v52 = vsel %vm525_vm4, %v4498_v22, %v7624_v27  ;;  %v4558_v27 = vunpack.i.l.bf16 %v6514_v1 }
 0x4de   : > { %v2138_v0 = vsel %vm525_vm4, %v4519_v5, %v7622_v59  ;;  %v2135_v5 = vsel %vm525_vm4, %v4524_v53, %v4533_v31  ;;  %v2133_v31 = vsel %vm525_vm4, %v4494_v19, %v4498_v22  ;;  %v4474_v19 = vunpack.i.h.bf16 %v6477_v62 }
 0x4df   : > { %2496 = vmatpush.msra.mxu3 %v2138_v0  ;;  %2410 = vmatpush.msra.mxu0 %v2135_v5  ;;  %v4464_v5 = vunpack.i.h.bf16 %v6469_v43  ;;  %v4473_v59 = vunpack.i.l.bf16 %v6477_v62  ;;  %v2131_v22 = vsel %vm525_vm4, %v4488_v48, %v4489_v6  ;;  %v2092_v62 = vsel %vm480_vm7, %v4479_v35, %v4483_v34 }
 0x4e1   : > { %2497 = vmatpush.msra.mxu3 %v2136_v11  ;;  %2411 = vmatpush.msra.mxu0 %v2133_v31  ;;  %v2093_v11 = vsel %vm480_vm7, %v4483_v34, %v7623_v28  ;;  %v2132_v31 = vsel %vm525_vm4, %v4489_v6, %v7629_v32  ;;  %v4559_v28 = vunpack.i.h.bf16 %v6514_v1  ;;  %v4459_v32 = vunpack.i.h.bf16 %v6471_v36 }
 0x4e2   : > { %v4547_v21 = vpop.permute.xlu0 %4546 }
 0x4e3   : > { %v6531_v15 = vpop.permute.xlu1 %4536  ;;  %v6559_v53 = vpop.permute.xlu2 %4571  ;;  %2498 = vmatpush.msra.mxu3 %v2134_v52  ;;  %v4478_v52 = vunpack.i.l.bf16 %v6475_v54  ;;  %2412 = vmatpush.msra.mxu0 %v2131_v22  ;;  %v4548_v6 = vunpack.i.l.bf16 %v4547_v21  ;;  %v4458_v22 = vunpack.i.l.bf16 %v6471_v36  ;;  %v2312_v36 = vsel %vm705_vm6, %v4558_v27, %v4559_v28 }
 0x4e4   : > { %v7628_v50 = vunpack.i.h.bf16 %v6531_v15  ;;  %v4538_v60 = vunpack.i.l.bf16 %v6531_v15 }
 0x4e5   : > { %2499 = vmatpush.msra.mxu3 %v2132_v31  ;;  %2413 = vmatpush.msra.mxu0 %v2092_v62  ;;  %v2090_v31 = vsel %vm480_vm7, %v4473_v59, %v4474_v19  ;;  %v2091_v49 = vsel %vm480_vm7, %v4474_v19, %v4478_v52  ;;  %v7633_v59 = vunpack.i.h.bf16 %v6427_v7  ;;  %v6619_v62 = vld [vmem:[%s7578_s2 + $0x580] sm:$0xff] }
 0x4e6   : > { %v2318_v0 = vsel %vm705_vm6, %v4538_v60, %v7628_v50  ;;  %v4549_v50 = vunpack.i.h.bf16 %v4547_v21  ;;  %v2317_v35 = vsel %vm705_vm6, %v4548_v6, %v4538_v60  ;;  %v7632_v21 = vunpack.i.l.bf16 %v6469_v43 }
 0x4e7   : > { %2525 = vmatpush.msrb.mxu2 %v2318_v0  ;;  %v6573_v0 = vld [vmem:[%s7578_s2 + $0x568] sm:$0xff]  ;;  %2500 = vmatpush.msra.mxu3 %v2093_v11  ;;  %v2088_v60 = vsel %vm480_vm7, %v4464_v5, %v4468_v4  ;;  %v4574_v6 = vunpack.i.h.bf16 %v6559_v53  ;;  %v4573_v5 = vunpack.i.l.bf16 %v6559_v53 }
 0x4e8   : > { %3827 = vmatmul.msk.f32.gmra.mxu2 %vm791_vm5, %v6573_v0  ;;  %2414 = vmatpush.msra.mxu0 %v2090_v31 }
 0x4e9   : > { %2526 = vmatpush.msrb.mxu2 %v2316_v14  ;;  %v7631_v14 = vunpack.i.h.bf16 %v6438_v16  ;;  %2438 = vmatpush.msra.mxu1 %v2317_v35 }
 0x4ea   : > { %2501 = vmatpush.msra.mxu3 %v2091_v49  ;;  %2415 = vmatpush.msra.mxu0 %v2088_v60  ;;  %v4443_v49 = vunpack.i.l.bf16 %v6456_v44  ;;  %v2087_v60 = vsel %vm480_vm7, %v4459_v32, %v7632_v21 }
 0x4eb   : > { %v6584_v42 = vpop.permute.xlu1 %4551  ;;  %v2089_v19 = vsel %vm480_vm7, %v4468_v4, %v7631_v14  ;;  %v6624_v31 = vpop.permute.xlu2 %4586  ;;  %v4444_v4 = vunpack.i.h.bf16 %v6456_v44  ;;  %v2048_v44 = vsel %vm435_vm8, %v4453_v12, %v7633_v59  ;;  %v2271_v59 = vsel %vm660_vm9, %v4573_v5, %v4574_v6 }
 0x4ec   : > { %v4554_v48 = vunpack.i.h.bf16 %v6584_v42  ;;  %v4553_v63 = vunpack.i.l.bf16 %v6584_v42  ;;  %2502 = vmatpush.msra.mxu3 %v2089_v19 }
 0x4ee   : > { %v2314_v34 = vsel %vm705_vm6, %v4549_v50, %v4553_v63  ;;  %v2315_v11 = vsel %vm705_vm6, %v4554_v48, %v4543_v18  ;;  %v2086_v18 = vsel %vm480_vm7, %v4458_v22, %v4459_v32  ;;  %v4448_v48 = vunpack.i.l.bf16 %v6421_v61  ;;  %2503 = vmatpush.msra.mxu3 %v2087_v60 }
 0x4ef   : > { %2527 = vmatpush.msrb.mxu2 %v2314_v34  ;;  %2439 = vmatpush.msra.mxu1 %v2315_v11  ;;  %v4562_v34 = vpop.permute.xlu0 %4561  ;;  %v4439_v22 = vunpack.i.h.bf16 %v6443_v38  ;;  %v4428_v32 = vunpack.i.l.bf16 %v6445_v13  ;;  %v2045_v60 = vsel %vm435_vm8, %v4443_v49, %v4444_v4 }
 0x4f0   : > { %2416 = vmatpush.msra.mxu0 %v2086_v18  ;;  %v4563_v19 = vunpack.i.l.bf16 %v4562_v34  ;;  %3828 = vmatmul.msk.f32.gmra.mxu2 %vm791_vm5, %v6619_v62  ;;  %v4564_v18 = vunpack.i.h.bf16 %v4562_v34 }
 0x4f1   : > { %2528 = vmatpush.msrb.mxu2 %v2312_v36  ;;  %v4429_v36 = vunpack.i.h.bf16 %v6445_v13  ;;  %2504 = vmatpush.msra.mxu3 %v2048_v44  ;;  %v4433_v13 = vunpack.i.l.bf16 %v6458_v46 }
 0x4f2   : > { %2417 = vmatpush.msra.mxu0 %v6433_v56  ;;  %v2313_v12 = vsel %vm705_vm6, %v4563_v19, %v4549_v50  ;;  %v2046_v56 = vsel %vm435_vm8, %v4444_v4, %v4448_v48  ;;  %v7681_v50 = vunpack.i.l.bf16 %v6443_v38  ;;  %v2311_v34 = vsel %vm705_vm6, %v4564_v18, %v4558_v27  ;;  %v6673_v4 = vld [vmem:[%s7578_s2 + $0x598] sm:$0xff] }
 0x4f3   : > { %v6629_v35 = vpop.permute.xlu1 %4566  ;;  %2505 = vmatpush.msra.mxu3 %v2046_v56  ;;  %2440 = vmatpush.msra.mxu1 %v2313_v12  ;;  %v2041_v19 = vsel %vm435_vm8, %v4428_v32, %v4429_v36  ;;  %v2042_v27 = vsel %vm435_vm8, %v4429_v36, %v4433_v13 }
 0x4f4   : > { %v4569_v11 = vunpack.i.h.bf16 %v6629_v35  ;;  %v4568_v14 = vunpack.i.l.bf16 %v6629_v35  ;;  %2418 = vmatpush.msra.mxu0 %v2045_v60  ;;  %v2044_v49 = vsel %vm435_vm8, %v7681_v50, %v4439_v22 }
 0x4f5   : > { %2506 = vmatpush.msra.mxu3 %v2044_v49  ;;  %2441 = vmatpush.msra.mxu1 %v2311_v34 }
 0x4f6   : > { %v2273_v21 = vsel %vm660_vm9, %v4568_v14, %v4569_v11  ;;  %2419 = vmatpush.msra.mxu0 %v6467_v47  ;;  %v4588_v47 = vunpack.i.l.bf16 %v6624_v31 }
 0x4f7   : > { %2529 = vmatpush.msrb.mxu2 %v2273_v21  ;;  %v4589_v21 = vunpack.i.h.bf16 %v6624_v31  ;;  %v4577_v60 = vpop.permute.xlu0 %4576  ;;  %2507 = vmatpush.msra.mxu3 %v2042_v27 }
 0x4f8   : > { %2420 = vmatpush.msra.mxu0 %v2041_v19  ;;  %v4579_v56 = vunpack.i.h.bf16 %v4577_v60  ;;  %v4578_v50 = vunpack.i.l.bf16 %v4577_v60  ;;  %3829 = vmatmul.msk.f32.gmra.mxu2 %vm791_vm5, %v6673_v4 }
 0x4f9   : > { %2530 = vmatpush.msrb.mxu2 %v2271_v59  ;;  %v6683_v59 = vpop.permute.xlu2 %4601  ;;  %2508 = vmatpush.msra.mxu3 %v6354_v25  ;;  %v2267_v49 = vsel %vm660_vm9, %v4588_v47, %v4589_v21 }
 0x4fa   : > { %2421 = vmatpush.msra.mxu0 %v6335_v26  ;;  %v2272_v32 = vsel %vm660_vm9, %v4578_v50, %v4568_v14  ;;  %v4604_v25 = vunpack.i.h.bf16 %v6683_v59  ;;  %v4603_v14 = vunpack.i.l.bf16 %v6683_v59  ;;  %v6788_v59 = vld [vmem:[%s7578_s2 + $0x588] sm:$0xff] }
 0x4fb   : > { %v6678_v44 = vpop.permute.xlu1 %4581  ;;  %2442 = vmatpush.msra.mxu1 %v2272_v32  ;;  %2509 = vmatpush.msra.mxu3 %v6360_v33  ;;  %v6710_v33 = vld [vmem:[%s7578_s2 + $0x540] sm:$0xff] }
 0x4fc   : > { %v4584_v18 = vunpack.i.h.bf16 %v6678_v44  ;;  %v4583_v12 = vunpack.i.l.bf16 %v6678_v44  ;;  %2422 = vmatpush.msra.mxu0 %v6358_v20  ;;  %v2226_v32 = vsel %vm615_vm10, %v4603_v14, %v4604_v25  ;;  %v3825_v44 = vld [vmem:[%s7579_s3 + $0x1d8] sm:$0xff] }
 0x4fd   : > { %2510 = vmatpush.msra.mxu3 %v6337_v57 }
 0x4fe   : > { %v2269_v36 = vsel %vm660_vm9, %v4579_v56, %v4583_v12  ;;  %v2270_v26 = vsel %vm660_vm9, %v4584_v18, %v4573_v5  ;;  %2423 = vmatpush.msra.mxu0 %v6364_v24  ;;  %v7682_v24 = vunpack.i.h.bf16 %v6531_v15  ;;  %v3822_v15 = vld [vmem:[%s7579_s3 + $0x1c0] sm:$0xff] }
 0x4ff   : > { %2531 = vmatpush.msrb.mxu2 %v2269_v36  ;;  %2443 = vmatpush.msra.mxu1 %v2270_v26  ;;  %v4592_v5 = vpop.permute.xlu0 %4591 }
 0x500   : > { %v4593_v60 = vunpack.i.l.bf16 %v4592_v5  ;;  %2511 = vmatpush.msra.mxu3 %v6345_v23  ;;  %2424 = vmatpush.msra.mxu0 %v6343_v45  ;;  %v4594_v57 = vunpack.i.h.bf16 %v4592_v5  ;;  %v7683_v45 = vunpack.i.h.bf16 %v6491_v41  ;;  %v4943_v41 = vmov 0  }
 0x501   : > { %2532 = vmatpush.msrb.mxu2 %v2267_v49  ;;  %2425 = vmatmul.f32.vlgmr.msra.gmra.mxu0 %v6710_v33  ;;  %v6721_v27 = vpop.permute.xlu2 %4616 }
 0x502   : > { %2612 = vmatpush.msrb.mxu3 %v7682_v24  ;;  %v2268_v50 = vsel %vm660_vm9, %v4593_v60, %v4579_v56  ;;  %v2266_v23 = vsel %vm660_vm9, %v4594_v57, %v4588_v47  ;;  %v6740_v56 = vld [vmem:[%s7578_s2 + $0x558] sm:$0xff]  ;;  %4666 = vset.pattern.permute.xlu1 %v4943_v41  ;;  %v4619_v36 = vunpack.i.h.bf16 %v6721_v27  ;;  %v4618_v42 = vunpack.i.l.bf16 %v6721_v27  ;;  %v3823_v60 = vld [vmem:[%s7579_s3 + $0x1c8] sm:$0xff]  ;;  %v6764_v27 = vld [vmem:[%s7578_s2 + $0x570] sm:$0xff] }
 0x503   : > { %v6712_v34 = vpop.permute.xlu1 %4596  ;;  %2512 = vmatmul.f32.vlgmr.msra.gmra.mxu3 %v6710_v33  ;;  %2444 = vmatpush.msra.mxu1 %v2268_v50 }
 0x504   : > { %v4599_v20 = vunpack.i.h.bf16 %v6712_v34  ;;  %v4598_v19 = vunpack.i.l.bf16 %v6712_v34  ;;  %2613 = vmatpush.msrb.mxu3 %v7683_v45  ;;  %4665 = vset.pattern.permute.xlu0 %v4943_v41  ;;  %v2222_v57 = vsel %vm615_vm10, %v4618_v42, %v4619_v36 }
 0x505   : > { %2445 = vmatpush.msra.mxu1 %v2266_v23  ;;  %2378 = vperm.xlu0 %4665, %v3822_v15  }
 0x506   : > { %v2228_v18 = vsel %vm615_vm10, %v4598_v19, %v4599_v20  ;;  %2614 = vmatpush.msrb.mxu3 %v4553_v63  ;;  %4667 = vset.pattern.permute.xlu2 %v4943_v41 }
 0x507   : > { %2533 = vmatpush.msrb.mxu2 %v2228_v18  ;;  %v4607_v47 = vpop.permute.xlu0 %4606  ;;  %2383 = vperm.xlu1 %4666, %v3823_v60  }
 0x508   : > { %2615 = vmatpush.msrb.mxu3 %v4559_v28  ;;  %v4609_v34 = vunpack.i.h.bf16 %v4607_v47  ;;  %v4608_v5 = vunpack.i.l.bf16 %v4607_v47 }
 0x509   : > { %2534 = vmatpush.msrb.mxu2 %v2226_v32  ;;  %2428 = vmatmul.f32.gmra.mxu0 %v6740_v56  ;;  %v4632_v24 = vpop.permute.xlu2 %4631 }
 0x50a   : > { %2616 = vmatpush.msrb.mxu3 %v4569_v11  ;;  %v2227_v1 = vsel %vm615_vm10, %v4608_v5, %v4598_v19  ;;  %v4634_v11 = vunpack.i.h.bf16 %v4632_v24  ;;  %v4633_v19 = vunpack.i.l.bf16 %v4632_v24 }
 0x50b   : > { %v4612_v63 = vpop.permute.xlu1 %4611  ;;  %2515 = vmatmul.f32.gmra.mxu3 %v6740_v56  ;;  %2446 = vmatpush.msra.mxu1 %v2227_v1 }
 0x50c   : > { %v4614_v49 = vunpack.i.h.bf16 %v4612_v63  ;;  %v4613_v26 = vunpack.i.l.bf16 %v4612_v63  ;;  %2617 = vmatpush.msrb.mxu3 %v4574_v6  ;;  %v2181_v31 = vsel %vm570_vm11, %v4633_v19, %v4634_v11 }
 0x50e   : > { %v2224_v28 = vsel %vm615_vm10, %v4609_v34, %v4613_v26  ;;  %v2225_v35 = vsel %vm615_vm10, %v4614_v49, %v4603_v14  ;;  %2618 = vmatpush.msrb.mxu3 %v4583_v12 }
 0x50f   : > { %2535 = vmatpush.msrb.mxu2 %v2224_v28  ;;  %2447 = vmatpush.msra.mxu1 %v2225_v35  ;;  %v4622_v6 = vpop.permute.xlu0 %4621 }
 0x510   : > { %2619 = vmatpush.msrb.mxu3 %v4589_v21  ;;  %v4623_v14 = vunpack.i.l.bf16 %v4622_v6  ;;  %v4624_v12 = vunpack.i.h.bf16 %v4622_v6  ;;  %2393 = vperm.xlu1 %4666, %v3825_v44   ;;  %v6781_v21 = vld [vmem:[%s7580_s4] sm:$0x7] }
 0x511   : > { %2536 = vmatpush.msrb.mxu2 %v2222_v57  ;;  %2431 = vmatmul.f32.gmra.mxu0 %v6764_v27  ;;  %v2685_v23 = vperm.slane %v6781_v21, 1  ;;  %v4647_v15 = vpop.permute.xlu2 %4646  ;;  %v2686_v49 = vperm.slane %v6781_v21, 2  ;;  %v3811_v57 = vld [vmem:[%s7578_s2 + $0x548] sm:$0xff] }
 0x512   : > { %2620 = vmatpush.msrb.mxu3 %v4599_v20  ;;  %v2223_v45 = vsel %vm615_vm10, %v4623_v14, %v4609_v34  ;;  %v2221_v20 = vsel %vm615_vm10, %v4624_v12, %v4618_v42  ;;  %v4648_v41 = vunpack.i.l.bf16 %v4647_v15 }
 0x513   : > { %v4627_v53 = vpop.permute.xlu1 %4626  ;;  %2518 = vmatmul.f32.gmra.mxu3 %v6764_v27  ;;  %2448 = vmatpush.msra.mxu1 %v2223_v45  ;;  %v7685_v45 = vunpack.i.h.bf16 %v6487_v30  ;;  %v7687_v30 = vunpack.i.h.bf16 %v6473_v2  ;;  %v3817_v2 = vld [vmem:[%s7578_s2 + $0x578] sm:$0xff] }
 0x514   : > { %v4629_v18 = vunpack.i.h.bf16 %v4627_v53  ;;  %v4628_v50 = vunpack.i.l.bf16 %v4627_v53  ;;  %2621 = vmatpush.msrb.mxu3 %v4604_v25  ;;  %v4649_v25 = vunpack.i.h.bf16 %v4647_v15  ;;  %2689 = vrot.lane.b32.xlu0 %v2685_v23, %s4942_s12  ;;  %v7686_v15 = vunpack.i.l.bf16 %v6511_v51 }
 0x515   : > { %2449 = vmatpush.msra.mxu1 %v2221_v20  ;;  %v3814_v20 = vld [vmem:[%s7578_s2 + $0x560] sm:$0xff]  ;;  %v7690_v51 = vunpack.i.h.bf16 %v6462_v37  ;;  %v7693_v37 = vunpack.i.h.bf16 %v6438_v16 }
 0x516   : > { %v2183_v32 = vsel %vm570_vm11, %v4628_v50, %v4629_v18  ;;  %2622 = vmatpush.msrb.mxu3 %v4613_v26 }
 0x517   : > { %2537 = vmatpush.msrb.mxu2 %v2183_v32  ;;  %v4637_v47 = vpop.permute.xlu0 %4636 }
 0x518   : > { %2623 = vmatpush.msrb.mxu3 %v4619_v36  ;;  %v4639_v34 = vunpack.i.h.bf16 %v4637_v47  ;;  %v4638_v5 = vunpack.i.l.bf16 %v4637_v47  ;;  %2691 = vrot.lane.b32.xlu1 %v2686_v49, %s4942_s12  ;;  %v2177_v36 = vsel %vm570_vm11, %v4648_v41, %v4649_v25  ;;  %v7692_v49 = vunpack.i.h.bf16 %v6447_v58 }
 0x519   : > { %2538 = vmatpush.msrb.mxu2 %v2181_v31  ;;  %2434 = vmatmul.f32.gmra.mxu0 %v6788_v59  ;;  %v4662_v53 = vpop.permute.xlu2 %4661  ;;  %v7695_v58 = vunpack.i.h.bf16 %v6427_v7 }
 0x51a   : > { %2624 = vmatpush.msrb.mxu3 %v4629_v18  ;;  %v2182_v60 = vsel %vm570_vm11, %v4638_v5, %v4628_v50  ;;  %v4663_v12 = vunpack.i.l.bf16 %v4662_v53  ;;  %v4664_v23 = vunpack.i.h.bf16 %v4662_v53 }
 0x51b   : > { %v4642_v63 = vpop.permute.xlu1 %4641  ;;  %2521 = vmatmul.f32.gmra.mxu3 %v6788_v59  ;;  %2450 = vmatpush.msra.mxu1 %v2182_v60 }
 0x51c   : > { %v4644_v42 = vunpack.i.h.bf16 %v4642_v63  ;;  %v4643_v26 = vunpack.i.l.bf16 %v4642_v63  ;;  %2625 = vmatpush.msrb.mxu3 %v4634_v11  ;;  %v7689_v63 = vunpack.i.h.bf16 %v6479_v55  ;;  %v2684_v55 = vperm.slane %v6781_v21, 0 }
 0x51d   : > { %v7694_v21 = vunpack.i.l.bf16 %v6469_v43 }
 0x51e   : > { %v2179_v1 = vsel %vm570_vm11, %v4639_v34, %v4643_v26  ;;  %v2180_v28 = vsel %vm570_vm11, %v4644_v42, %v4633_v19  ;;  %2626 = vmatpush.msrb.mxu3 %v4643_v26  ;;  %v7684_v19 = vunpack.i.h.bf16 %v6489_v29  ;;  %v3824_v29 = vld [vmem:[%s7579_s3 + $0x1d0] sm:$0xff]  ;;  %v2357_v47 = vsel %vm750_vm3, %v7689_v63, %v4664_v23 }
 0x51f   : > { %2539 = vmatpush.msrb.mxu2 %v2179_v1  ;;  %2451 = vmatpush.msra.mxu1 %v2180_v28  ;;  %v4652_v35 = vpop.permute.xlu0 %4651 }
 0x520   : > { %2627 = vmatpush.msrb.mxu3 %v4649_v25  ;;  %v4654_v18 = vunpack.i.h.bf16 %v4652_v35  ;;  %v4653_v50 = vunpack.i.l.bf16 %v4652_v35  ;;  %v2359_v25 = vsel %vm750_vm3, %v7687_v30, %v4663_v12  ;;  %2388 = vperm.xlu2 %4667, %v3824_v29  }
 0x521   : > { %2540 = vmatpush.msrb.mxu2 %v2177_v36 }
 0x522   : > { %2541 = vmatmul.f32.vlgmr.msrb.gmra.mxu2 %v3811_v57  ;;  %v2178_v14 = vsel %vm570_vm11, %v4653_v50, %v4639_v34  ;;  %v2176_v32 = vsel %vm570_vm11, %v4654_v18, %v4648_v41  ;;  %v7688_v41 = vunpack.i.h.bf16 %v6533_v17  ;;  %v7691_v17 = vunpack.i.l.bf16 %v6481_v9  ;;  %v3820_v9 = vld [vmem:[%s7578_s2 + $0x590] sm:$0xff] }
 0x523   : > { %v4657_v24 = vpop.permute.xlu1 %4656  ;;  %2452 = vmatpush.msra.mxu1 %v2178_v14  ;;  %2628 = vmatmul.f32.vlgmr.msrb.gmra.mxu3 %v3811_v57 }
 0x524   : > { %v4659_v6 = vunpack.i.h.bf16 %v4657_v24  ;;  %v4658_v11 = vunpack.i.l.bf16 %v4657_v24 }
 0x525   : > { %2453 = vmatpush.msra.mxu1 %v2176_v32 }
 0x526   : > { %2653 = vmatpush.msra.mxu2 %v4658_v11  ;;  %v2363_v44 = vsel %vm750_vm3, %v7684_v19, %v4658_v11  ;;  %v2361_v31 = vsel %vm750_vm3, %v7685_v45, %v4659_v6  ;;  %2454 = vmatmul.f32.vlgmr.msra.gmra.mxu1 %v3811_v57 }
 0x527   : > { %2566 = vmatpush.msrb.mxu0 %v2363_v44  ;;  %2583 = vmatpush.msrb.mxu1 %v7686_v15 }
 0x528   : > { %2654 = vmatpush.msra.mxu2 %v4659_v6  ;;  %2687 = vrot.lane.b32.xlu2 %v2684_v55, %s4942_s12 }
 0x529   : > { %2567 = vmatpush.msrb.mxu0 %v2361_v31  ;;  %2584 = vmatpush.msrb.mxu1 %v7688_v41 }
 0x52a   : > { %2655 = vmatpush.msra.mxu2 %v4663_v12 }
 0x52b   : > { %2544 = vmatmul.f32.gmra.mxu2 %v3814_v20  ;;  %2568 = vmatpush.msrb.mxu0 %v2359_v25 }
 0x52c   : > { %2656 = vmatpush.msra.mxu2 %v4664_v23  ;;  %2585 = vmatpush.msrb.mxu1 %v7690_v51 }
 0x52d   : > { %2569 = vmatpush.msrb.mxu0 %v2357_v47  ;;  %2631 = vmatmul.f32.gmra.mxu3 %v3814_v20 }
 0x52e   : > { %3830 = vmatmul.msk.f32.vlgmr.msrb.gmra.mxu0 %vm791_vm5, %v6525_v10  ;;  %2586 = vmatpush.msrb.mxu1 %v7691_v17 }
 0x52f   : > { %2457 = vmatmul.f32.gmra.mxu1 %v3814_v20 }
 0x530   : > { %2587 = vmatpush.msrb.mxu1 %v7692_v49 }
 0x532   : > { %2588 = vmatpush.msrb.mxu1 %v4478_v52 }
 0x533   : > { %2547 = vmatmul.f32.gmra.mxu2 %v3817_v2 }
 0x534   : > { %2589 = vmatpush.msrb.mxu1 %v7693_v37 }
 0x535   : > { %2634 = vmatmul.f32.gmra.mxu3 %v3817_v2 }
 0x536   : > { %3831 = vmatmul.msk.f32.gmra.mxu0 %vm791_vm5, %v6573_v0  ;;  %2590 = vmatpush.msrb.mxu1 %v7694_v21 }
 0x537   : > { %2460 = vmatmul.f32.gmra.mxu1 %v3817_v2 }
 0x538   : > { %2591 = vmatpush.msrb.mxu1 %v7695_v58 }
 0x53a   : > { %2592 = vmatpush.msrb.mxu1 %v4448_v48 }
 0x53b   : > { %2550 = vmatmul.f32.gmra.mxu2 %v3820_v9 }
 0x53c   : > { %2593 = vmatpush.msrb.mxu1 %v4439_v22 }
 0x53d   : > { %2637 = vmatmul.f32.gmra.mxu3 %v3820_v9 }
 0x53e   : > { %3832 = vmatmul.msk.f32.gmra.mxu0 %vm791_vm5, %v6619_v62  ;;  %2594 = vmatpush.msrb.mxu1 %v4433_v13 }
 0x53f   : > { %2463 = vmatmul.f32.gmra.mxu1 %v3820_v9 }
 0x540   : > { %2595 = vmatpush.msrb.mxu1 %v6356_v39 }
 0x542   : > { %2596 = vmatpush.msrb.mxu1 %v6333_v8 }
 0x543   : > { %3834 = vmatmul.msk.f32.vlgmr.msra.gmra.mxu2 %vm791_vm5, %v6525_v10 }
 0x544   : > { %2597 = vmatpush.msrb.mxu1 %v6341_v3 }
 0x546   : > { %3833 = vmatmul.msk.f32.gmra.mxu0 %vm791_vm5, %v6673_v4  ;;  %2598 = vmatpush.msrb.mxu1 %v6362_v40 }
 0x547   : > { %2599 = vmatmul.f32.vlgmr.msrb.gmra.mxu1 %v6710_v33 }
 0x54b   : > { %3835 = vmatmul.msk.f32.gmra.mxu2 %vm791_vm5, %v6573_v0 }
 0x54f   : > { %2602 = vmatmul.f32.gmra.mxu1 %v6740_v56 }
 0x553   : > { %3836 = vmatmul.msk.f32.gmra.mxu2 %vm791_vm5, %v6619_v62 }
 0x557   : > { %2605 = vmatmul.f32.gmra.mxu1 %v6764_v27 }
 0x55b   : > { %3837 = vmatmul.msk.f32.gmra.mxu2 %vm791_vm5, %v6673_v4 }
 0x55f   : > { %2608 = vmatmul.f32.gmra.mxu1 %v6788_v59  ;;  %v2484_v8 = vpop.f32.mrf.mxu2 }
 0x56b   : > { %v2487_v39 = vpop.f32.mrf.mxu2 }
 0x573   : > { %v2490_v61 = vpop.f32.mrf.mxu2 }
 0x577   : > { %v6884_v54 = vpop.permute.xlu0 %2378 }
 0x579   : > { %v6878_v7 = vpop.permute.xlu1 %2383 }
 0x57a   : > { %v6882_v43 = vpop.permute.xlu2 %2388 }
 0x57b   : > { %v6880_v46 = vpop.f32.mrf.mxu2 }
 0x57e   : > { %v2426_v3 = vpop.f32.mrf.mxu0 }
 0x57f   : > { %v2427_v22 = vadd.f32 %v2426_v3, %v6884_v54 }
 0x582   : > { %v6886_v10 = vpop.permute.xlu1 %2393  ;;  %v2688_v33 = vpop.permute.xlu2 %2687 }
 0x586   : > { %v2429_v40 = vpop.f32.mrf.mxu0  ;;  %v2513_v38 = vpop.f32.mrf.mxu3 }
 0x587   : > { %v2514_v52 = vadd.f32 %v2513_v38, %v6884_v54  ;;  %v2690_v56 = vpop.permute.xlu0 %2689  ;;  %v2430_v28 = vadd.f32 %v2429_v40, %v6878_v7 }
 0x588   : > { %v2693_v42 = vsel %vm570_vm11, %v2688_v33, %v2690_v56 }
 0x58a   : > { %v6891_v26 = vpop.permute.xlu1 %2691 }
 0x58b   : > { %v2694_v24 = vsel %vm570_vm11, %v2690_v56, %v6891_v26 }
 0x58e   : > { %v2432_v16 = vpop.f32.mrf.mxu0  ;;  %v2516_v62 = vpop.f32.mrf.mxu3 }
 0x58f   : > { %v2517_v60 = vadd.f32 %v2516_v62, %v6878_v7  ;;  %v2433_v31 = vadd.f32 %v2432_v16, %v6882_v43 }
 0x596   : > { %v2435_v0 = vpop.f32.mrf.mxu0  ;;  %v2519_v53 = vpop.f32.mrf.mxu3 }
 0x597   : > { %v2520_v12 = vadd.f32 %v2519_v53, %v6882_v43  ;;  %v2436_v55 = vadd.f32 %v2435_v0, %v6886_v10 }
 0x59e   : > { %v2522_v41 = vpop.f32.mrf.mxu3 }
 0x59f   : > { %v2523_v58 = vadd.f32 %v2522_v41, %v6886_v10 }
 0x5a3   : > { %v2455_v13 = vpop.f32.mrf.mxu1 }
 0x5a4   : > { %v2456_v4 = vadd.f32 %v2455_v13, %v2427_v22 }
 0x5a5   : > { %v2542_v48 = vpop.f32.mrf.mxu2 }
 0x5a6   : > { %v2543_v27 = vadd.f32 %v2542_v48, %v2514_v52  ;;  %v2485_v59 = vadd.f32 %v2484_v8, %v2456_v4  ;;  %v2629_v3 = vpop.f32.mrf.mxu3 }
 0x5a8   : > { %v2670_v34 = vmax.f32 %v2485_v59, 0.0 }
 0x5aa   : > { %v2698_v57 = vmul.f32 %v2693_v42, %v2670_v34 }
 0x5ab   : > { %v2571_v5 = vpop.f32.mrf.mxu0 }
 0x5ac   : > { %v2572_v1 = vadd.f32 %v2571_v5, %v2543_v27  ;;  %v2458_v6 = vpop.f32.mrf.mxu1  ;;  %2722 = vrot.lane.b32.xlu2 %v2698_v57, %s4944_s21 }
 0x5ad   : > { %v2459_v11 = vadd.f32 %v2458_v6, %v2430_v28 }
 0x5ae   : > { %v2545_v36 = vpop.f32.mrf.mxu2  ;;  %v2671_v35 = vmax.f32 %v2572_v1, 0.0 }
 0x5af   : > { %v2546_v18 = vadd.f32 %v2545_v36, %v2517_v60  ;;  %v2488_v14 = vadd.f32 %v2487_v39, %v2459_v11 }
 0x5b0   : > { %v2699_v50 = vmul.f32 %v2694_v24, %v2671_v35  ;;  %v2632_v33 = vpop.f32.mrf.mxu3 }
 0x5b1   : > { %v2673_v19 = vmax.f32 %v2488_v14, 0.0 }
 0x5b2   : > { %2724 = vrot.lane.b32.xlu0 %v2699_v50, %s4944_s21 }
 0x5b3   : > { %v2574_v44 = vpop.f32.mrf.mxu0  ;;  %v2701_v20 = vmul.f32 %v2693_v42, %v2673_v19 }
 0x5b4   : > { %v2575_v32 = vadd.f32 %v2574_v44, %v2546_v18  ;;  %v2461_v29 = vpop.f32.mrf.mxu1 }
 0x5b5   : > { %v2462_v15 = vadd.f32 %v2461_v29, %v2433_v31  ;;  %2728 = vrot.lane.b32.xlu2 %v2701_v20, %s4944_s21 }
 0x5b6   : > { %v2548_v45 = vpop.f32.mrf.mxu2  ;;  %v2674_v23 = vmax.f32 %v2575_v32, 0.0 }
 0x5b7   : > { %v2549_v25 = vadd.f32 %v2548_v45, %v2520_v12  ;;  %v2491_v63 = vadd.f32 %v2490_v61, %v2462_v15 }
 0x5b8   : > { %v2702_v30 = vmul.f32 %v2694_v24, %v2674_v23 }
 0x5b9   : > { %v2676_v47 = vmax.f32 %v2491_v63, 0.0 }
 0x5ba   : > { %2730 = vrot.lane.b32.xlu0 %v2702_v30, %s4944_s21 }
 0x5bb   : > { %v2577_v51 = vpop.f32.mrf.mxu0  ;;  %v2704_v49 = vmul.f32 %v2693_v42, %v2676_v47 }
 0x5bc   : > { %v2578_v2 = vadd.f32 %v2577_v51, %v2549_v25  ;;  %v2464_v9 = vpop.f32.mrf.mxu1 }
 0x5bd   : > { %v2465_v21 = vadd.f32 %v2464_v9, %v2436_v55  ;;  %2734 = vrot.lane.b32.xlu2 %v2704_v49, %s4944_s21 }
 0x5be   : > { %v2551_v17 = vpop.f32.mrf.mxu2  ;;  %v2677_v37 = vmax.f32 %v2578_v2, 0.0 }
 0x5bf   : > { %v2494_v39 = vadd.f32 %v6880_v46, %v2465_v21  ;;  %v2552_v40 = vadd.f32 %v2551_v17, %v2523_v58 }
 0x5c0   : > { %v2705_v8 = vmul.f32 %v2694_v24, %v2677_v37 }
 0x5c1   : > { %v2679_v61 = vmax.f32 %v2494_v39, 0.0 }
 0x5c2   : > { %2736 = vrot.lane.b32.xlu0 %v2705_v8, %s4944_s21 }
 0x5c3   : > { %v2580_v16 = vpop.f32.mrf.mxu0  ;;  %v2707_v52 = vmul.f32 %v2693_v42, %v2679_v61 }
 0x5c4   : > { %v2581_v38 = vadd.f32 %v2580_v16, %v2552_v40  ;;  %v2600_v48 = vpop.f32.mrf.mxu1 }
 0x5c5   : > { %v2601_v22 = vadd.f32 %v2600_v48, %v6884_v54  ;;  %2740 = vrot.lane.b32.xlu2 %v2707_v52, %s4944_s21  ;;  %v2635_v54 = vpop.f32.mrf.mxu3 }
 0x5c6   : > { %v2658_v0 = vpop.f32.mrf.mxu2  ;;  %v2680_v62 = vmax.f32 %v2581_v38, 0.0 }
 0x5c7   : > { %v2630_v4 = vadd.f32 %v2629_v3, %v2601_v22 }
 0x5c8   : > { %v2708_v13 = vmul.f32 %v2694_v24, %v2680_v62 }
 0x5c9   : > { %v2659_v46 = vadd.f32 %v2658_v0, %v2630_v4 }
 0x5ca   : > { %2742 = vrot.lane.b32.xlu0 %v2708_v13, %s4944_s21 }
 0x5cb   : > { %v2672_v56 = vmax.f32 %v2659_v46, 0.0 }
 0x5cc   : > { %v2603_v59 = vpop.f32.mrf.mxu1 }
 0x5cd   : > { %v2700_v34 = vmul.f32 %v6891_v26, %v2672_v56  ;;  %v2604_v42 = vadd.f32 %v2603_v59, %v6878_v7  ;;  %v2638_v18 = vpop.f32.mrf.mxu3 }
 0x5ce   : > { %v2661_v27 = vpop.f32.mrf.mxu2 }
 0x5cf   : > { %v2633_v5 = vadd.f32 %v2632_v33, %v2604_v42  ;;  %2726 = vrot.lane.b32.xlu1 %v2700_v34, %s4944_s21 }
 0x5d1   : > { %v2662_v60 = vadd.f32 %v2661_v27, %v2633_v5 }
 0x5d3   : > { %v2675_v1 = vmax.f32 %v2662_v60, 0.0 }
 0x5d4   : > { %v2606_v36 = vpop.f32.mrf.mxu1 }
 0x5d5   : > { %v2703_v57 = vmul.f32 %v6891_v26, %v2675_v1  ;;  %v2607_v24 = vadd.f32 %v2606_v36, %v6882_v43 }
 0x5d6   : > { %v2664_v28 = vpop.f32.mrf.mxu2 }
 0x5d7   : > { %v2636_v35 = vadd.f32 %v2635_v54, %v2607_v24  ;;  %2732 = vrot.lane.b32.xlu1 %v2703_v57, %s4944_s21  ;;  %v3467_v57 = vld [vmem:[%s7580_s4] sm:$0x7] }
 0x5d9   : > { %v2665_v53 = vadd.f32 %v2664_v28, %v2636_v35  ;;  %v3850_v28 = vld [vmem:[%s7579_s3 + $0x1e0] sm:$0xff] }
 0x5db   : > { %v2678_v6 = vmax.f32 %v2665_v53, 0.0  ;;  %v3471_v53 = vperm.slane %v3467_v57, 2 }
 0x5dc   : > { %v2609_v11 = vpop.f32.mrf.mxu1 }
 0x5dd   : > { %v2706_v7 = vmul.f32 %v6891_v26, %v2678_v6  ;;  %v2610_v50 = vadd.f32 %v2609_v11, %v6886_v10 }
 0x5de   : > { %v2667_v14 = vpop.f32.mrf.mxu2 }
 0x5df   : > { %v2639_v19 = vadd.f32 %v2638_v18, %v2610_v50  ;;  %2738 = vrot.lane.b32.xlu1 %v2706_v7, %s4944_s21  ;;  %v3470_v18 = vperm.slane %v3467_v57, 1  ;;  %v3853_v7 = vld [vmem:[%s7579_s3 + $0x1f8] sm:$0xff] }
 0x5e1   : > { %v2668_v44 = vadd.f32 %v2667_v14, %v2639_v19  ;;  %v3469_v19 = vperm.slane %v3467_v57, 0 }
 0x5e3   : > { %v2681_v12 = vmax.f32 %v2668_v44, 0.0 }
 0x5e5   : > { %v2709_v32 = vmul.f32 %v6891_v26, %v2681_v12 }
 0x5e7   : > { %2744 = vrot.lane.b32.xlu1 %v2709_v32, %s4944_s21 }
 0x606   : > { %v2723_v43 = vpop.permute.xlu2 %2722 }
 0x607   : > { %2767 = vst.msk [vmem:[#allocation3] sm:$0xff] %vm1161_vm12, %v2723_v43 }
 0x60e   : > { %v6929_v29 = vld [vmem:[#allocation3] sm:$0xff] }
 0x60f   : > { %v2729_v45 = vpop.permute.xlu2 %2728 }
 0x610   : > { %2771 = vst.msk [vmem:[#allocation3 + $0x18] sm:$0xff] %vm1161_vm12, %v2729_v45 }
 0x617   : > { %v2735_v31 = vpop.permute.xlu2 %2734  ;;  %v6942_v25 = vld [vmem:[#allocation3 + $0x18] sm:$0xff] }
 0x618   : > { %2774 = vst.msk [vmem:[#allocation3 + $0x30] sm:$0xff] %vm1161_vm12, %v2735_v31 }
 0x61f   : > { %v2741_v10 = vpop.permute.xlu2 %2740  ;;  %v6957_v51 = vld [vmem:[#allocation3 + $0x30] sm:$0xff] }
 0x620   : > { %2777 = vst.msk [vmem:[#allocation3 + $0x48] sm:$0xff] %vm1161_vm12, %v2741_v10 }
 0x624   : > { %v2725_v20 = vpop.permute.xlu0 %2724 }
 0x625   : > { %v6927_v23 = vsel %vm324_vm0, %v2723_v43, %v2725_v20 }
 0x626   : > { %v6933_v26 = vpack.i.bf16 %v6927_v23, %v6929_v29 }
 0x627   : > { %v6987_v61 = vld [vmem:[#allocation3 + $0x48] sm:$0xff] }
 0x628   : > { %4679 = vrot.lane.b32.xlu1 %v6933_v26, %s4937_s25  ;;  %4669 = vrot.lane.b32.xlu2 %v6933_v26, %s4935_s20 }
 0x62c   : > { %v2731_v15 = vpop.permute.xlu0 %2730 }
 0x62d   : > { %v6940_v30 = vsel %vm324_vm0, %v2729_v45, %v2731_v15 }
 0x62e   : > { %v6946_v41 = vpack.i.bf16 %v6940_v30, %v6942_v25 }
 0x630   : > { %4674 = vrot.lane.b32.xlu2 %v6933_v26, %s4936_s23  ;;  %4704 = vrot.lane.b32.xlu1 %v6946_v41, %s4940_s28 }
 0x631   : > { %4699 = vrot.lane.b32.xlu0 %v6946_v41, %s4939_s27 }
 0x634   : > { %v2737_v63 = vpop.permute.xlu0 %2736 }
 0x635   : > { %v6955_v47 = vsel %vm324_vm0, %v2735_v31, %v2737_v63  ;;  %v3852_v31 = vld [vmem:[%s7579_s3 + $0x1f0] sm:$0xff] }
 0x636   : > { %v4733_v2 = vpack.i.bf16 %v6955_v47, %v6957_v51  ;;  %v4738_v22 = vpack.i.bf16 %v6942_v25, %v6955_v47 }
 0x638   : > { %4684 = vrot.lane.b32.xlu2 %v6933_v26, %s4939_s27  ;;  %4734 = vrot.lane.b32.xlu1 %v4733_v2, %s4939_s27 }
 0x639   : > { %4709 = vrot.lane.b32.xlu0 %v6946_v41, %s4941_s29 }
 0x63c   : > { %v2743_v17 = vpop.permute.xlu0 %2742 }
 0x63d   : > { %v6967_v55 = vsel %vm324_vm0, %v2741_v10, %v2743_v17 }
 0x63e   : > { %v4763_v62 = vpack.i.bf16 %v6967_v55, %v6987_v61  ;;  %v4773_v56 = vpack.i.bf16 %v6957_v51, %v6967_v55 }
 0x640   : > { %4689 = vrot.lane.b32.xlu2 %v6933_v26, %s4940_s28  ;;  %4744 = vrot.lane.b32.xlu1 %v4733_v2, %s4940_s28 }
 0x641   : > { %v2727_v49 = vpop.permute.xlu1 %2726 }
 0x642   : > { %v2747_v37 = vsel %vm324_vm0, %v2725_v20, %v2727_v49 }
 0x643   : > { %2770 = vst.msk [vmem:[#allocation3 + $0x10] sm:$0xff] %vm1164_vm13, %v2747_v37 }
 0x648   : > { %4694 = vrot.lane.b32.xlu2 %v6946_v41, %s4937_s25 }
 0x649   : > { %v2733_v9 = vpop.permute.xlu1 %2732 }
 0x64a   : > { %v2749_v21 = vsel %vm324_vm0, %v2731_v15, %v2733_v9  ;;  %v6977_v58 = vld [vmem:[#allocation3 + $0x10] sm:$0xff] }
 0x64b   : > { %2773 = vst.msk [vmem:[#allocation3 + $0x28] sm:$0xff] %vm1164_vm13, %v2749_v21  ;;  %v4713_v8 = vpack.i.bf16 %v6942_v25, %v6977_v58  ;;  %v4718_v38 = vpack.i.bf16 %v6987_v61, %v6977_v58 }
 0x64d   : > { %4714 = vrot.lane.b32.xlu0 %v4713_v8, %s4935_s20 }
 0x650   : > { %4724 = vrot.lane.b32.xlu2 %v4733_v2, %s4935_s20 }
 0x651   : > { %v2739_v3 = vpop.permute.xlu1 %2738 }
 0x652   : > { %v2751_v39 = vsel %vm324_vm0, %v2737_v63, %v2739_v3  ;;  %v6985_v40 = vld [vmem:[#allocation3 + $0x28] sm:$0xff] }
 0x653   : > { %2776 = vst.msk [vmem:[#allocation3 + $0x40] sm:$0xff] %vm1164_vm13, %v2751_v39  ;;  %v4753_v16 = vpack.i.bf16 %v6985_v40, %v6940_v30  ;;  %v4758_v33 = vpack.i.bf16 %v6977_v58, %v6985_v40 }
 0x655   : > { %4754 = vrot.lane.b32.xlu1 %v4753_v16, %s4935_s20  ;;  %4719 = vrot.lane.b32.xlu0 %v4718_v38, %s4936_s23  ;;  %v3851_v16 = vld [vmem:[%s7579_s3 + $0x1e8] sm:$0xff] }
 0x658   : > { %4749 = vrot.lane.b32.xlu2 %v4733_v2, %s4941_s29 }
 0x659   : > { %v2745_v52 = vpop.permute.xlu1 %2744 }
 0x65a   : > { %v2753_v0 = vsel %vm324_vm0, %v2743_v17, %v2745_v52  ;;  %v7004_v48 = vld [vmem:[#allocation3 + $0x40] sm:$0xff] }
 0x65b   : > { %2779 = vst.msk [vmem:[#allocation3 + $0x58] sm:$0xff] %vm1164_vm13, %v2753_v0  ;;  %v4793_v13 = vpack.i.bf16 %v6985_v40, %v7004_v48  ;;  %v4788_v42 = vpack.i.bf16 %v6987_v61, %v7004_v48 }
 0x65d   : > { %4729 = vrot.lane.b32.xlu0 %v4733_v2, %s4937_s25  ;;  %4764 = vrot.lane.b32.xlu1 %v4763_v62, %s4937_s25 }
 0x660   : > { %4769 = vrot.lane.b32.xlu2 %v4763_v62, %s4939_s27 }
 0x662   : > { %v7013_v4 = vld [vmem:[#allocation3 + $0x58] sm:$0xff] }
 0x663   : > { %v4798_v46 = vpack.i.bf16 %v7013_v4, %v6967_v55  ;;  %v4803_v27 = vpack.i.bf16 %v7004_v48, %v7013_v4  ;;  %v4828_v59 = vpack.i.bf16 %v7013_v4, %v6940_v30 }
 0x665   : > { %4739 = vrot.lane.b32.xlu0 %v4738_v22, %s4936_s23  ;;  %4794 = vrot.lane.b32.xlu1 %v4793_v13, %s4936_s23 }
 0x668   : > { %4779 = vrot.lane.b32.xlu2 %v4763_v62, %s4940_s28 }
 0x66d   : > { %4759 = vrot.lane.b32.xlu0 %v4758_v33, %s4937_s25  ;;  %4799 = vrot.lane.b32.xlu1 %v4798_v46, %s4935_s20 }
 0x670   : > { %4814 = vrot.lane.b32.xlu2 %v4763_v62, %s4942_s12 }
 0x675   : > { %4774 = vrot.lane.b32.xlu0 %v4773_v56, %s4936_s23  ;;  %4804 = vrot.lane.b32.xlu1 %v4803_v27, %s4937_s25 }
 0x678   : > { %4829 = vrot.lane.b32.xlu2 %v4828_v59, %s4936_s23 }
 0x67d   : > { %4784 = vrot.lane.b32.xlu0 %v4763_v62, %s4941_s29  ;;  %4809 = vrot.lane.b32.xlu1 %v6933_v26, %s4941_s29 }
 0x680   : > { %4834 = vrot.lane.b32.xlu2 %v6933_v26, %s4942_s12 }
 0x682   : > { %v7036_v34 = vpop.permute.xlu2 %4669 }
 0x685   : > { %4789 = vrot.lane.b32.xlu0 %v4788_v42, %s4935_s20  ;;  %4824 = vrot.lane.b32.xlu1 %v6946_v41, %s4942_s12 }
 0x688   : > { %4844 = vrot.lane.b32.xlu2 %v4733_v2, %s4938_s26 }
 0x68a   : > { %v7044_v5 = vpop.permute.xlu2 %4674 }
 0x68d   : > { %4819 = vrot.lane.b32.xlu0 %v4733_v2, %s4942_s12  ;;  %4854 = vrot.lane.b32.xlu1 %v4803_v27, %s4939_s27 }
 0x690   : > { %4864 = vrot.lane.b32.xlu2 %v6933_v26, %s4938_s26 }
 0x692   : > { %v7050_v60 = vpop.permute.xlu2 %4684 }
 0x693   : > { %v4687_v15 = vunpack.i.h.bf16 %v7050_v60 }
 0x695   : > { %4839 = vrot.lane.b32.xlu0 %v4763_v62, %s4938_s26  ;;  %4859 = vrot.lane.b32.xlu1 %v4758_v33, %s4939_s27 }
 0x698   : > { %4879 = vrot.lane.b32.xlu2 %v4803_v27, %s4941_s29 }
 0x69a   : > { %v7055_v54 = vpop.permute.xlu2 %4689  ;;  %v7061_v1 = vpop.permute.xlu1 %4679 }
 0x69b   : > { %v7634_v62 = vunpack.i.h.bf16 %v7055_v54  ;;  %v4691_v22 = vunpack.i.l.bf16 %v7055_v54 }
 0x69d   : > { %4849 = vrot.lane.b32.xlu0 %v6946_v41, %s4938_s26  ;;  %4874 = vrot.lane.b32.xlu1 %v4758_v33, %s4940_s28  ;;  %v4686_v41 = vunpack.i.l.bf16 %v7050_v60 }
 0x69f   : > { %v3110_v9 = vsel %vm705_vm6, %v4686_v41, %v4687_v15 }
 0x6a0   : > { %4894 = vrot.lane.b32.xlu2 %v4758_v33, %s4942_s12 }
 0x6a2   : > { %v7063_v36 = vpop.permute.xlu2 %4694  ;;  %v7075_v35 = vpop.permute.xlu1 %4704 }
 0x6a3   : > { %v7077_v6 = vpop.permute.xlu0 %4699  ;;  %v7635_v38 = vunpack.i.h.bf16 %v7075_v35  ;;  %v4706_v52 = vunpack.i.l.bf16 %v7075_v35 }
 0x6a4   : > { %v4702_v10 = vunpack.i.h.bf16 %v7077_v6  ;;  %v4701_v20 = vunpack.i.l.bf16 %v7077_v6 }
 0x6a5   : > { %4869 = vrot.lane.b32.xlu0 %v4803_v27, %s4940_s28  ;;  %4889 = vrot.lane.b32.xlu1 %v4803_v27, %s4942_s12  ;;  %v3068_v56 = vsel %vm660_vm9, %v4706_v52, %v7635_v38 }
 0x6a6   : > { %v3112_v49 = vsel %vm705_vm6, %v4701_v20, %v4702_v10 }
 0x6a8   : > { %3176 = vperm.xlu2 %4667, %v3850_v28  }
 0x6aa   : > { %v7073_v24 = vpop.permute.xlu2 %4724  ;;  %v7087_v50 = vpop.permute.xlu1 %4734 }
 0x6ab   : > { %v7091_v14 = vpop.permute.xlu0 %4709  ;;  %v4737_v12 = vunpack.i.h.bf16 %v7087_v50  ;;  %v4736_v32 = vunpack.i.l.bf16 %v7087_v50  ;;  %v7341_v50 = vld [vmem:[%s7578_s2 + $0x5c0] sm:$0xff] }
 0x6ad   : > { %4884 = vrot.lane.b32.xlu0 %v4758_v33, %s4941_s29  ;;  %4904 = vrot.lane.b32.xlu1 %v4758_v33, %s4938_s26  ;;  %v3114_v63 = vsel %vm705_vm6, %v4736_v32, %v4737_v12 }
 0x6b0   : > { %3476 = vrot.lane.b32.xlu2 %v3471_v53, %s4942_s12 }
 0x6b2   : > { %v7082_v11 = vpop.permute.xlu2 %4749  ;;  %v7113_v2 = vpop.permute.xlu1 %4744 }
 0x6b3   : > { %v4747_v21 = vunpack.i.h.bf16 %v7113_v2  ;;  %v4746_v8 = vunpack.i.l.bf16 %v7113_v2  ;;  %v7415_v2 = vld [vmem:[%s7578_s2 + $0x5e8] sm:$0xff] }
 0x6b5   : > { %4899 = vrot.lane.b32.xlu0 %v4803_v27, %s4938_s26  ;;  %3474 = vrot.lane.b32.xlu1 %v3470_v18, %s4942_s12  ;;  %v3070_v13 = vsel %vm660_vm9, %v4746_v8, %v4747_v21  ;;  %v3066_v27 = vsel %vm660_vm9, %v4691_v22, %v7634_v62  ;;  %v4711_v62 = vunpack.i.l.bf16 %v7091_v14 }
 0x6b8   : > { %3191 = vperm.xlu2 %4667, %v3853_v7   ;;  %v4697_v7 = vunpack.i.h.bf16 %v7063_v36 }
 0x6ba   : > { %v7093_v44 = vpop.permute.xlu2 %4769 }
 0x6bb   : > { %v4772_v43 = vunpack.i.h.bf16 %v7093_v44  ;;  %v4771_v45 = vunpack.i.l.bf16 %v7093_v44 }
 0x6bd   : > { %v3116_v26 = vsel %vm705_vm6, %v4771_v45, %v4772_v43  ;;  %3472 = vrot.lane.b32.xlu0 %v3469_v19, %s4942_s12  ;;  %3186 = vperm.xlu1 %4666, %v3852_v31   ;;  %v4696_v19 = vunpack.i.l.bf16 %v7063_v36  ;;  %v4682_v45 = vunpack.i.h.bf16 %v7061_v1  ;;  %v4681_v31 = vunpack.i.l.bf16 %v7061_v1 }
 0x6be   : > { %3235 = vmatpush.msra.mxu1 %v3116_v26 }
 0x6bf   : > { %v7115_v17 = vpop.permute.xlu0 %4714  ;;  %v2936_v26 = vsel %vm525_vm4, %v4696_v19, %v4697_v7  ;;  %v4677_v19 = vunpack.i.h.bf16 %v7044_v5 }
 0x6c0   : > { %3236 = vmatpush.msra.mxu1 %v3114_v63 }
 0x6c2   : > { %v7120_v37 = vpop.permute.xlu2 %4779  ;;  %3237 = vmatpush.msra.mxu1 %v3112_v49  ;;  %v2934_v49 = vsel %vm525_vm4, %v4681_v31, %v4682_v45 }
 0x6c3   : > { %v4782_v3 = vunpack.i.h.bf16 %v7120_v37  ;;  %v4781_v39 = vunpack.i.l.bf16 %v7120_v37 }
 0x6c4   : > { %3238 = vmatpush.msra.mxu1 %v3110_v9 }
 0x6c5   : > { %v3072_v0 = vsel %vm660_vm9, %v4781_v39, %v4782_v3  ;;  %3181 = vperm.xlu0 %4665, %v3851_v16  }
 0x6c6   : > { %3239 = vmatpush.msra.mxu1 %v3072_v0 }
 0x6c7   : > { %v7142_v33 = vpop.permute.xlu1 %4754  ;;  %v7144_v46 = vpop.permute.xlu0 %4719 }
 0x6c8   : > { %3240 = vmatpush.msra.mxu1 %v3070_v13  ;;  %v4722_v1 = vunpack.i.h.bf16 %v7144_v46 }
 0x6ca   : > { %3241 = vmatpush.msra.mxu1 %v3068_v56  ;;  %v7162_v36 = vpop.permute.xlu2 %4814 }
 0x6cc   : > { %3242 = vmatpush.msra.mxu1 %v3066_v27 }
 0x6cf   : > { %v4730_v59 = vpop.permute.xlu0 %4729  ;;  %v4765_v42 = vpop.permute.xlu1 %4764 }
 0x6d0   : > { %v4732_v28 = vunpack.i.h.bf16 %v4730_v59  ;;  %v4731_v57 = vunpack.i.l.bf16 %v4730_v59  ;;  %v4767_v53 = vunpack.i.h.bf16 %v4765_v42  ;;  %v4766_v18 = vunpack.i.l.bf16 %v4765_v42 }
 0x6d2   : > { %v2940_v32 = vsel %vm525_vm4, %v4766_v18, %v4767_v53  ;;  %v2938_v20 = vsel %vm525_vm4, %v4731_v57, %v4732_v28  ;;  %v7173_v27 = vpop.permute.xlu2 %4829 }
 0x6d3   : > { %3206 = vmatpush.msra.mxu0 %v2940_v32  ;;  %v4676_v32 = vunpack.i.l.bf16 %v7044_v5  ;;  %v4831_v31 = vunpack.i.l.bf16 %v7173_v27 }
 0x6d5   : > { %3207 = vmatpush.msra.mxu0 %v2938_v20 }
 0x6d7   : > { %v4740_v41 = vpop.permute.xlu0 %4739  ;;  %v7159_v63 = vpop.permute.xlu1 %4794  ;;  %3208 = vmatpush.msra.mxu0 %v2936_v26 }
 0x6d8   : > { %v4742_v56 = vunpack.i.h.bf16 %v4740_v41  ;;  %v4741_v59 = vunpack.i.l.bf16 %v4740_v41 }
 0x6d9   : > { %3209 = vmatpush.msra.mxu0 %v2934_v49  ;;  %v7636_v49 = vunpack.i.h.bf16 %v7082_v11 }
 0x6df   : > { %v7164_v9 = vpop.permute.xlu0 %4759  ;;  %v7166_v8 = vpop.permute.xlu1 %4799 }
 0x6e0   : > { %v4761_v42 = vunpack.i.l.bf16 %v7164_v9  ;;  %v4762_v20 = vunpack.i.h.bf16 %v7164_v9 }
 0x6e2   : > { %v2937_v5 = vsel %vm525_vm4, %v4697_v7, %v4761_v42 }
 0x6e7   : > { %v4775_v39 = vpop.permute.xlu0 %4774  ;;  %v7169_v16 = vpop.permute.xlu1 %4804 }
 0x6e8   : > { %v4777_v52 = vunpack.i.h.bf16 %v4775_v39  ;;  %v4776_v0 = vunpack.i.l.bf16 %v4775_v39  ;;  %v4807_v22 = vunpack.i.h.bf16 %v7169_v16  ;;  %v4806_v13 = vunpack.i.l.bf16 %v7169_v16  ;;  %v7398_v16 = vld [vmem:[%s7578_s2 + $0x5c8] sm:$0xff] }
 0x6e9   : > { %v7641_v39 = vunpack.i.h.bf16 %v7173_v27 }
 0x6ea   : > { %v2896_v57 = vsel %vm480_vm7, %v4722_v1, %v4776_v0  ;;  %v2941_v18 = vsel %vm525_vm4, %v4767_v53, %v4806_v13  ;;  %v2894_v26 = vsel %vm480_vm7, %v4777_v52, %v4741_v59  ;;  %v2939_v41 = vsel %vm525_vm4, %v4732_v28, %v4807_v22 }
 0x6eb   : > { %3210 = vmatpush.msra.mxu0 %v2896_v57  ;;  %3293 = vmatpush.msrb.mxu2 %v2941_v18  ;;  %v2892_v53 = vsel %vm480_vm7, %v4742_v56, %v4831_v31  ;;  %v4751_v1 = vunpack.i.l.bf16 %v7082_v11  ;;  %v2890_v28 = vsel %vm480_vm7, %v4676_v32, %v4677_v19  ;;  %v7638_v56 = vunpack.i.l.bf16 %v7159_v63 }
 0x6ed   : > { %3211 = vmatpush.msra.mxu0 %v2894_v26  ;;  %3294 = vmatpush.msrb.mxu2 %v2939_v41  ;;  %v2935_v26 = vsel %vm525_vm4, %v4682_v45, %v4762_v20  ;;  %v7639_v41 = vunpack.i.h.bf16 %v7091_v14  ;;  %v3026_v45 = vsel %vm615_vm10, %v4751_v1, %v7636_v49  ;;  %v4727_v49 = vunpack.i.h.bf16 %v7073_v24 }
 0x6ef   : > { %v7195_v57 = vpop.permute.xlu0 %4784  ;;  %v7197_v52 = vpop.permute.xlu1 %4809  ;;  %3212 = vmatpush.msra.mxu0 %v2892_v53  ;;  %3295 = vmatpush.msrb.mxu2 %v2937_v5  ;;  %v7640_v53 = vunpack.i.h.bf16 %v7159_v63  ;;  %v2897_v5 = vsel %vm480_vm7, %v4776_v0, %v7641_v39  ;;  %v7644_v0 = vunpack.i.h.bf16 %v7162_v36  ;;  %v3024_v1 = vsel %vm615_vm10, %v4711_v62, %v7639_v41 }
 0x6f0   : > { %v7637_v18 = vunpack.i.h.bf16 %v7195_v57  ;;  %v4786_v7 = vunpack.i.l.bf16 %v7195_v57  ;;  %v4811_v38 = vunpack.i.l.bf16 %v7197_v52 }
 0x6f1   : > { %3213 = vmatpush.msra.mxu0 %v2890_v28  ;;  %3296 = vmatpush.msrb.mxu2 %v2935_v26  ;;  %v7643_v28 = vunpack.i.l.bf16 %v7144_v46  ;;  %v7642_v26 = vunpack.i.h.bf16 %v7197_v52 }
 0x6f2   : > { %v3028_v32 = vsel %vm615_vm10, %v4786_v7, %v7637_v18  ;;  %v2895_v7 = vsel %vm480_vm7, %v4741_v59, %v7638_v56  ;;  %v4802_v18 = vunpack.i.h.bf16 %v7166_v8  ;;  %v4801_v59 = vunpack.i.l.bf16 %v7166_v8 }
 0x6f3   : > { %3243 = vmatpush.msra.mxu1 %v3028_v32  ;;  %3297 = vmatpush.msrb.mxu2 %v2897_v5  ;;  %v4816_v32 = vunpack.i.l.bf16 %v7162_v36  ;;  %v2893_v5 = vsel %vm480_vm7, %v4831_v31, %v7640_v53  ;;  %v4726_v56 = vunpack.i.l.bf16 %v7073_v24  ;;  %v3022_v31 = vsel %vm615_vm10, %v4811_v38, %v7642_v26  ;;  %v7247_v53 = vpop.permute.xlu2 %4834 }
 0x6f4   : > { %v2891_v41 = vsel %vm480_vm7, %v4677_v19, %v7643_v28  ;;  %v4672_v38 = vunpack.i.h.bf16 %v7036_v34  ;;  %v4671_v26 = vunpack.i.l.bf16 %v7036_v34  ;;  %v7645_v19 = vunpack.i.h.bf16 %v7142_v33 }
 0x6f5   : > { %3244 = vmatpush.msra.mxu1 %v3026_v45  ;;  %3298 = vmatpush.msrb.mxu2 %v2895_v7  ;;  %v4716_v28 = vunpack.i.l.bf16 %v7115_v17 }
 0x6f7   : > { %v7235_v45 = vpop.permute.xlu0 %4789  ;;  %v7237_v7 = vpop.permute.xlu1 %4824  ;;  %3245 = vmatpush.msra.mxu1 %v3024_v1  ;;  %3299 = vmatpush.msrb.mxu2 %v2893_v5  ;;  %v4756_v1 = vunpack.i.l.bf16 %v7142_v33  ;;  %v2984_v5 = vsel %vm570_vm11, %v4816_v32, %v7644_v0 }
 0x6f8   : > { %v4792_v62 = vunpack.i.h.bf16 %v7235_v45  ;;  %v4791_v39 = vunpack.i.l.bf16 %v7235_v45 }
 0x6f9   : > { %3246 = vmatpush.msra.mxu1 %v3022_v31  ;;  %3300 = vmatpush.msrb.mxu2 %v2891_v41  ;;  %v2853_v41 = vsel %vm435_vm8, %v4801_v59, %v4802_v18  ;;  %v4717_v31 = vunpack.i.h.bf16 %v7115_v17 }
 0x6fa   : > { %v2852_v24 = vsel %vm435_vm8, %v4792_v62, %v4801_v59  ;;  %v2850_v62 = vsel %vm435_vm8, %v4726_v56, %v4727_v49  ;;  %v2851_v34 = vsel %vm435_vm8, %v4727_v49, %v4791_v39  ;;  %v2849_v59 = vsel %vm435_vm8, %v4756_v1, %v7645_v19 }
 0x6fb   : > { %3214 = vmatpush.msra.mxu0 %v2852_v24  ;;  %3247 = vmatpush.msra.mxu1 %v2984_v5  ;;  %v2848_v32 = vsel %vm435_vm8, %v4717_v31, %v4756_v1  ;;  %v2846_v56 = vsel %vm435_vm8, %v4671_v26, %v4672_v38  ;;  %v2847_v31 = vsel %vm435_vm8, %v4672_v38, %v4716_v28  ;;  %v4836_v1 = vunpack.i.l.bf16 %v7247_v53 }
 0x6fc   : > { %3301 = vmatpush.msrb.mxu2 %v2853_v41  ;;  %v4827_v41 = vunpack.i.h.bf16 %v7237_v7 }
 0x6fd   : > { %3215 = vmatpush.msra.mxu0 %v2850_v62  ;;  %v4826_v62 = vunpack.i.l.bf16 %v7237_v7 }
 0x6fe   : > { %3302 = vmatpush.msrb.mxu2 %v2851_v34  ;;  %v4837_v34 = vunpack.i.h.bf16 %v7247_v53 }
 0x6ff   : > { %v7268_v24 = vpop.permute.xlu0 %4819  ;;  %v4855_v5 = vpop.permute.xlu1 %4854  ;;  %3216 = vmatpush.msra.mxu0 %v2848_v32  ;;  %v2980_v38 = vsel %vm570_vm11, %v4826_v62, %v4827_v41 }
 0x700   : > { %v4822_v0 = vunpack.i.h.bf16 %v7268_v24  ;;  %v4821_v49 = vunpack.i.l.bf16 %v7268_v24  ;;  %3303 = vmatpush.msrb.mxu2 %v2849_v59  ;;  %v7286_v32 = vpop.permute.xlu2 %4844  ;;  %v4856_v19 = vunpack.i.l.bf16 %v4855_v5  ;;  %v2978_v59 = vsel %vm570_vm11, %v4836_v1, %v4837_v34 }
 0x701   : > { %3217 = vmatpush.msra.mxu0 %v2846_v56  ;;  %v4857_v56 = vunpack.i.h.bf16 %v4855_v5  ;;  %v4846_v44 = vunpack.i.l.bf16 %v7286_v32 }
 0x702   : > { %3304 = vmatpush.msrb.mxu2 %v2847_v31  ;;  %v2982_v26 = vsel %vm570_vm11, %v4821_v49, %v4822_v0 }
 0x703   : > { %3218 = vmatpush.msra.mxu0 %v6987_v61  ;;  %3248 = vmatpush.msra.mxu1 %v2982_v26  ;;  %v7301_v61 = vld [vmem:[%s7578_s2 + $0x5a8] sm:$0xff] }
 0x704   : > { %3305 = vmatpush.msrb.mxu2 %v6967_v55 }
 0x705   : > { %3219 = vmatpush.msra.mxu0 %v6957_v51  ;;  %3249 = vmatpush.msra.mxu1 %v2980_v38  ;;  %v7312_v51 = vld [vmem:[%s7578_s2 + $0x5a0] sm:$0xff] }
 0x706   : > { %3306 = vmatpush.msrb.mxu2 %v6955_v47  ;;  %v3117_v47 = vsel %vm705_vm6, %v4772_v43, %v4856_v19 }
 0x707   : > { %v7303_v55 = vpop.permute.xlu0 %4839  ;;  %v4860_v49 = vpop.permute.xlu1 %4859  ;;  %3220 = vmatpush.msra.mxu0 %v6942_v25  ;;  %3250 = vmatpush.msra.mxu1 %v2978_v59  ;;  %v4847_v25 = vunpack.i.h.bf16 %v7286_v32 }
 0x708   : > { %v4842_v62 = vunpack.i.h.bf16 %v7303_v55  ;;  %v4841_v31 = vunpack.i.l.bf16 %v7303_v55  ;;  %v4861_v5 = vunpack.i.l.bf16 %v4860_v49  ;;  %3307 = vmatpush.msrb.mxu2 %v6940_v30  ;;  %3251 = vmatmul.f32.vlgmr.msra.gmra.mxu1 %v7301_v61  ;;  %v4862_v1 = vunpack.i.h.bf16 %v4860_v49 }
 0x709   : > { %3887 = vmatpush.msrb.mxu1 %v3117_v47  ;;  %3221 = vmatpush.msra.mxu0 %v6929_v29  ;;  %v3115_v29 = vsel %vm705_vm6, %v4737_v12, %v4857_v56  ;;  %v3158_v26 = vsel %vm750_vm3, %v4846_v44, %v4847_v25 }
 0x70a   : > { %3308 = vmatpush.msrb.mxu2 %v6927_v23  ;;  %3222 = vmatmul.f32.vlgmr.msra.gmra.mxu0 %v7312_v51  ;;  %v3160_v43 = vsel %vm750_vm3, %v4841_v31, %v4842_v62  ;;  %v3113_v30 = vsel %vm705_vm6, %v4702_v10, %v4861_v5  ;;  %v7333_v23 = vpop.permute.xlu2 %4864  ;;  %v3111_v6 = vsel %vm705_vm6, %v4687_v15, %v4862_v1  ;;  %v7351_v10 = vld [vmem:[%s7578_s2 + $0x5b8] sm:$0xff]  ;;  %v7366_v15 = vld [vmem:[%s7578_s2 + $0x5b0] sm:$0xff] }
 0x70b   : > { %3309 = vmatmul.f32.vlgmr.msrb.gmra.mxu2 %v7312_v51  ;;  %3322 = vmatpush.msrb.mxu0 %v3117_v47  ;;  %v4866_v38 = vunpack.i.l.bf16 %v7333_v23  ;;  %v7376_v47 = vld [vmem:[%s7578_s2 + $0x5d8] sm:$0xff] }
 0x70c   : > { %3888 = vmatpush.msrb.mxu1 %v3115_v29  ;;  %3409 = vmatpush.msra.mxu2 %v4856_v19  ;;  %v4867_v19 = vunpack.i.h.bf16 %v7333_v23 }
 0x70d   : > { %3276 = vmatpush.msra.mxu3 %v3160_v43  ;;  %3323 = vmatpush.msrb.mxu0 %v3115_v29 }
 0x70e   : > { %3889 = vmatpush.msrb.mxu1 %v3113_v30  ;;  %3410 = vmatpush.msra.mxu2 %v4857_v56  ;;  %v3154_v49 = vsel %vm750_vm3, %v4866_v38, %v4867_v19 }
 0x70f   : > { %3277 = vmatpush.msra.mxu3 %v3158_v26  ;;  %3324 = vmatpush.msrb.mxu0 %v3113_v30  ;;  %v7346_v12 = vpop.permute.xlu0 %4849  ;;  %v4875_v44 = vpop.permute.xlu1 %4874 }
 0x710   : > { %3890 = vmatpush.msrb.mxu1 %v3111_v6  ;;  %3411 = vmatpush.msra.mxu2 %v4861_v5  ;;  %v4852_v59 = vunpack.i.h.bf16 %v7346_v12  ;;  %v4851_v56 = vunpack.i.l.bf16 %v7346_v12  ;;  %v7383_v5 = vld [vmem:[%s7578_s2 + $0x5d0] sm:$0xff]  ;;  %v4876_v29 = vunpack.i.l.bf16 %v4875_v44  ;;  %v4877_v30 = vunpack.i.h.bf16 %v4875_v44 }
 0x711   : > { %3325 = vmatpush.msrb.mxu0 %v3111_v6  ;;  %3254 = vmatmul.f32.gmra.mxu1 %v7341_v50  ;;  %v7697_v6 = vunpack.i.h.bf16 %v7173_v27  ;;  %v7700_v27 = vunpack.i.h.bf16 %v7159_v63  ;;  %v7702_v44 = vunpack.i.l.bf16 %v7144_v46  ;;  %v7704_v46 = vunpack.i.h.bf16 %v7091_v14 }
 0x712   : > { %3412 = vmatpush.msra.mxu2 %v4862_v1  ;;  %3225 = vmatmul.f32.gmra.mxu0 %v7351_v10  ;;  %v3156_v60 = vsel %vm750_vm3, %v4851_v56, %v4852_v59  ;;  %v7701_v56 = vunpack.i.h.bf16 %v7195_v57  ;;  %v7706_v14 = vunpack.i.h.bf16 %v7162_v36 }
 0x713   : > { %3312 = vmatmul.f32.gmra.mxu2 %v7351_v10  ;;  %3278 = vmatpush.msra.mxu3 %v3156_v60  ;;  %v7432_v60 = vld [vmem:[%s7578_s2 + $0x5f0] sm:$0xff] }
 0x715   : > { %3279 = vmatpush.msra.mxu3 %v3154_v49 }
 0x716   : > { %3854 = vmatmul.msk.f32.vlgmr.msra.gmra.mxu3 %vm791_vm5, %v7366_v15 }
 0x717   : > { %3380 = vmatpush.msrb.mxu3 %v4806_v13  ;;  %v4870_v31 = vpop.permute.xlu0 %4869 }
 0x718   : > { %v4871_v43 = vunpack.i.l.bf16 %v4870_v31  ;;  %v4872_v1 = vunpack.i.h.bf16 %v4870_v31  ;;  %v4890_v31 = vpop.permute.xlu1 %4889 }
 0x719   : > { %3381 = vmatpush.msrb.mxu3 %v4807_v22  ;;  %3257 = vmatmul.f32.gmra.mxu1 %v7376_v47  ;;  %v4880_v22 = vpop.permute.xlu2 %4879 }
 0x71a   : > { %3228 = vmatmul.f32.gmra.mxu0 %v7383_v5  ;;  %3413 = vmatpush.msra.mxu2 %v4871_v43  ;;  %v3073_v13 = vsel %vm660_vm9, %v4782_v3, %v4871_v43  ;;  %v3071_v37 = vsel %vm660_vm9, %v4747_v21, %v4872_v1  ;;  %v7696_v3 = vunpack.i.h.bf16 %v7075_v35  ;;  %v4881_v26 = vunpack.i.l.bf16 %v4880_v22 }
 0x71b   : > { %3315 = vmatmul.f32.gmra.mxu2 %v7383_v5  ;;  %3382 = vmatpush.msrb.mxu3 %v4761_v42  ;;  %v7698_v21 = vunpack.i.h.bf16 %v7055_v54  ;;  %v7699_v35 = vunpack.i.l.bf16 %v7159_v63  ;;  %v4882_v38 = vunpack.i.h.bf16 %v4880_v22  ;;  %v7439_v63 = vld [vmem:[%s7578_s2 + $0x5e0] sm:$0xff]  ;;  %v7703_v43 = vunpack.i.h.bf16 %v7082_v11 }
 0x71c   : > { %3326 = vmatpush.msrb.mxu0 %v3073_v13  ;;  %3891 = vmatpush.msrb.mxu1 %v3073_v13  ;;  %v3069_v42 = vsel %vm660_vm9, %v7696_v3, %v4876_v29  ;;  %v3029_v54 = vsel %vm615_vm10, %v7701_v56, %v4881_v26  ;;  %v4891_v13 = vunpack.i.l.bf16 %v4890_v31  ;;  %v7705_v11 = vunpack.i.h.bf16 %v7197_v52  ;;  %v3849_v52 = vld [vmem:[%s7578_s2 + $0x5f8] sm:$0xff] }
 0x71d   : > { %3383 = vmatpush.msrb.mxu3 %v4762_v20  ;;  %3414 = vmatpush.msra.mxu2 %v4872_v1  ;;  %v3067_v9 = vsel %vm660_vm9, %v7698_v21, %v4877_v30  ;;  %v3027_v1 = vsel %vm615_vm10, %v7703_v43, %v4882_v38  ;;  %v7707_v3 = vunpack.i.h.bf16 %v7142_v33 }
 0x71e   : > { %3327 = vmatpush.msrb.mxu0 %v3071_v37  ;;  %3892 = vmatpush.msrb.mxu1 %v3071_v37  ;;  %v2985_v8 = vsel %vm570_vm11, %v7706_v14, %v4891_v13 }
 0x71f   : > { %3855 = vmatmul.msk.f32.gmra.mxu3 %vm791_vm5, %v7398_v16  ;;  %3415 = vmatpush.msra.mxu2 %v4876_v29  ;;  %v4885_v20 = vpop.permute.xlu0 %4884 }
 0x720   : > { %3384 = vmatpush.msrb.mxu3 %v7697_v6  ;;  %3328 = vmatpush.msrb.mxu0 %v3069_v42  ;;  %v4886_v49 = vunpack.i.l.bf16 %v4885_v20  ;;  %v4887_v57 = vunpack.i.h.bf16 %v4885_v20 }
 0x721   : > { %3893 = vmatpush.msrb.mxu1 %v3069_v42  ;;  %3416 = vmatpush.msra.mxu2 %v4877_v30  ;;  %v4895_v22 = vpop.permute.xlu2 %4894  ;;  %v4892_v30 = vunpack.i.h.bf16 %v4890_v31 }
 0x722   : > { %3385 = vmatpush.msrb.mxu3 %v7699_v35  ;;  %3329 = vmatpush.msrb.mxu0 %v3067_v9  ;;  %v3025_v29 = vsel %vm615_vm10, %v7704_v46, %v4886_v49  ;;  %v3023_v37 = vsel %vm615_vm10, %v7705_v11, %v4887_v57  ;;  %v4897_v45 = vunpack.i.h.bf16 %v4895_v22 }
 0x723   : > { %3894 = vmatpush.msrb.mxu1 %v3067_v9  ;;  %3231 = vmatmul.f32.gmra.mxu0 %v7415_v2 }
 0x724   : > { %3318 = vmatmul.f32.gmra.mxu2 %v7415_v2  ;;  %3386 = vmatpush.msrb.mxu3 %v7700_v27  ;;  %v2979_v17 = vsel %vm570_vm11, %v4837_v34, %v4897_v45 }
 0x725   : > { %3417 = vmatpush.msra.mxu2 %v4881_v26  ;;  %3330 = vmatpush.msrb.mxu0 %v3029_v54  ;;  %v4905_v26 = vpop.permute.xlu1 %4904 }
 0x726   : > { %3895 = vmatpush.msrb.mxu1 %v3029_v54  ;;  %3387 = vmatpush.msrb.mxu3 %v7702_v44 }
 0x727   : > { %3260 = vmatmul.f32.gmra.mxu1 %v7432_v60  ;;  %3418 = vmatpush.msra.mxu2 %v4882_v38  ;;  %v4900_v42 = vpop.permute.xlu0 %4899 }
 0x728   : > { %3331 = vmatpush.msrb.mxu0 %v3027_v1  ;;  %3896 = vmatpush.msrb.mxu1 %v3027_v1  ;;  %v4901_v33 = vunpack.i.l.bf16 %v4900_v42 }
 0x729   : > { %3856 = vmatmul.msk.f32.gmra.mxu3 %vm791_vm5, %v7439_v63  ;;  %3419 = vmatpush.msra.mxu2 %v4886_v49  ;;  %v3177_v34 = vpop.permute.xlu2 %3176 }
 0x72a   : > { %3388 = vmatpush.msrb.mxu3 %v4802_v18  ;;  %3332 = vmatpush.msrb.mxu0 %v3025_v29  ;;  %v4896_v18 = vunpack.i.l.bf16 %v4895_v22 }
 0x72b   : > { %3897 = vmatpush.msrb.mxu1 %v3025_v29  ;;  %3420 = vmatpush.msra.mxu2 %v4887_v57 }
 0x72c   : > { %3389 = vmatpush.msrb.mxu3 %v4791_v39  ;;  %3333 = vmatpush.msrb.mxu0 %v3023_v37  ;;  %v2983_v39 = vsel %vm570_vm11, %v4822_v0, %v4892_v30  ;;  %v2981_v36 = vsel %vm570_vm11, %v4827_v41, %v4896_v18  ;;  %v4902_v0 = vunpack.i.h.bf16 %v4900_v42 }
 0x72d   : > { %3898 = vmatpush.msrb.mxu1 %v3023_v37  ;;  %3421 = vmatpush.msra.mxu2 %v4891_v13 }
 0x72e   : > { %3390 = vmatpush.msrb.mxu3 %v7707_v3  ;;  %3334 = vmatpush.msrb.mxu0 %v2985_v8  ;;  %v3159_v53 = vsel %vm750_vm3, %v4847_v25, %v4902_v0 }
 0x72f   : > { %3899 = vmatpush.msrb.mxu1 %v2985_v8  ;;  %3422 = vmatpush.msra.mxu2 %v4892_v30  ;;  %v3473_v41 = vpop.permute.xlu0 %3472 }
 0x730   : > { %3391 = vmatpush.msrb.mxu3 %v4716_v28  ;;  %3335 = vmatpush.msrb.mxu0 %v2983_v39  ;;  %v4906_v28 = vunpack.i.l.bf16 %v4905_v26 }
 0x731   : > { %3900 = vmatpush.msrb.mxu1 %v2983_v39  ;;  %3857 = vmatmul.msk.f32.gmra.mxu3 %vm791_vm5, %v3849_v52  ;;  %v7521_v21 = vpop.permute.xlu2 %3476 }
 0x732   : > { %3392 = vmatpush.msrb.mxu3 %v7013_v4  ;;  %3423 = vmatpush.msra.mxu2 %v4896_v18  ;;  %v3161_v4 = vsel %vm750_vm3, %v4842_v62, %v4901_v33  ;;  %v3157_v7 = vsel %vm750_vm3, %v4852_v59, %v4906_v28  ;;  %v3475_v62 = vpop.permute.xlu1 %3474 }
 0x733   : > { %3336 = vmatpush.msrb.mxu0 %v2981_v36  ;;  %3901 = vmatpush.msrb.mxu1 %v2981_v36  ;;  %v3478_v23 = vsel %vm570_vm11, %v3473_v41, %v3475_v62 }
 0x734   : > { %3393 = vmatpush.msrb.mxu3 %v7004_v48  ;;  %3424 = vmatpush.msra.mxu2 %v4897_v45  ;;  %v4907_v48 = vunpack.i.h.bf16 %v4905_v26 }
 0x735   : > { %3337 = vmatpush.msrb.mxu0 %v2979_v17  ;;  %3902 = vmatpush.msrb.mxu1 %v2979_v17 }
 0x736   : > { %3338 = vmatmul.f32.vlgmr.msrb.gmra.mxu0 %v7301_v61  ;;  %3344 = vmatmul.f32.vlgmr.msrb.gmra.mxu1 %v7376_v47 }
 0x737   : > { %3363 = vmatpush.msra.mxu1 %v3161_v4  ;;  %3394 = vmatpush.msrb.mxu3 %v6985_v40  ;;  %v3155_v40 = vsel %vm750_vm3, %v4867_v19, %v4907_v48 }
 0x738   : > { %3450 = vmatpush.msra.mxu0 %v4901_v33  ;;  %3425 = vmatmul.f32.vlgmr.msra.gmra.mxu2 %v7301_v61 }
 0x739   : > { %3364 = vmatpush.msra.mxu1 %v3159_v53  ;;  %3395 = vmatpush.msrb.mxu3 %v6977_v58  ;;  %v3192_v31 = vpop.permute.xlu2 %3191 }
 0x73a   : > { %3451 = vmatpush.msra.mxu0 %v4902_v0  ;;  %3396 = vmatmul.f32.vlgmr.msrb.gmra.mxu3 %v7312_v51  ;;  %v3187_v20 = vpop.permute.xlu1 %3186 }
 0x73b   : > { %3365 = vmatpush.msra.mxu1 %v3157_v7 }
 0x73c   : > { %3452 = vmatpush.msra.mxu0 %v4906_v28 }
 0x73d   : > { %3366 = vmatpush.msra.mxu1 %v3155_v40 }
 0x73e   : > { %3453 = vmatpush.msra.mxu0 %v4907_v48  ;;  %3347 = vmatmul.f32.gmra.mxu1 %v7432_v60 }
 0x73f   : > { %3341 = vmatmul.f32.gmra.mxu0 %v7341_v50 }
 0x740   : > { %3428 = vmatmul.f32.gmra.mxu2 %v7341_v50 }
 0x742   : > { %3399 = vmatmul.f32.gmra.mxu3 %v7351_v10  ;;  %v3182_v10 = vpop.permute.xlu0 %3181 }
 0x746   : > { %3858 = vmatmul.msk.f32.vlgmr.msra.gmra.mxu1 %vm791_vm5, %v7366_v15 }
 0x747   : > { %3862 = vmatmul.msk.f32.vlgmr.msra.gmra.mxu0 %vm791_vm5, %v7366_v15 }
 0x748   : > { %3431 = vmatmul.f32.gmra.mxu2 %v7376_v47 }
 0x74a   : > { %3402 = vmatmul.f32.gmra.mxu3 %v7383_v5 }
 0x74e   : > { %3859 = vmatmul.msk.f32.gmra.mxu1 %vm791_vm5, %v7398_v16 }
 0x74f   : > { %3863 = vmatmul.msk.f32.gmra.mxu0 %vm791_vm5, %v7398_v16 }
 0x750   : > { %3434 = vmatmul.f32.gmra.mxu2 %v7432_v60 }
 0x752   : > { %3405 = vmatmul.f32.gmra.mxu3 %v7415_v2 }
 0x756   : > { %3860 = vmatmul.msk.f32.gmra.mxu1 %vm791_vm5, %v7439_v63 }
 0x757   : > { %3864 = vmatmul.msk.f32.gmra.mxu0 %vm791_vm5, %v7439_v63 }
 0x75e   : > { %3861 = vmatmul.msk.f32.gmra.mxu1 %vm791_vm5, %v3849_v52 }
 0x75f   : > { %3865 = vmatmul.msk.f32.gmra.mxu0 %vm791_vm5, %v3849_v52  ;;  %v3479_v52 = vsel %vm570_vm11, %v3475_v62, %v7521_v21 }
 0x785   : > { %v3252_v24 = vpop.f32.mrf.mxu1 }
 0x787   : > { %v3223_v58 = vpop.f32.mrf.mxu0 }
 0x788   : > { %v3224_v32 = vadd.f32 %v3223_v58, %v3177_v34 }
 0x78a   : > { %v3253_v25 = vadd.f32 %v3252_v24, %v3224_v32 }
 0x78e   : > { %v3310_v61 = vpop.f32.mrf.mxu2  ;;  %v3255_v51 = vpop.f32.mrf.mxu1 }
 0x78f   : > { %v3226_v55 = vpop.f32.mrf.mxu0  ;;  %v3311_v18 = vadd.f32 %v3310_v61, %v3177_v34 }
 0x790   : > { %v3227_v59 = vadd.f32 %v3226_v55, %v3182_v10 }
 0x792   : > { %v3256_v47 = vadd.f32 %v3255_v51, %v3227_v59 }
 0x796   : > { %v3313_v15 = vpop.f32.mrf.mxu2  ;;  %v3258_v16 = vpop.f32.mrf.mxu1 }
 0x797   : > { %v3229_v5 = vpop.f32.mrf.mxu0  ;;  %v3314_v48 = vadd.f32 %v3313_v15, %v3182_v10 }
 0x798   : > { %v3230_v35 = vadd.f32 %v3229_v5, %v3187_v20 }
 0x799   : > { %v3281_v50 = vpop.f32.mrf.mxu3 }
 0x79a   : > { %v3282_v12 = vadd.f32 %v3281_v50, %v3253_v25  ;;  %v3259_v27 = vadd.f32 %v3258_v16, %v3230_v35 }
 0x79c   : > { %v3483_v19 = vmul.f32 %v3478_v23, %v3282_v12 }
 0x79e   : > { %3507 = vrot.lane.b32.xlu0 %v3483_v19, %s4944_s21  ;;  %v3316_v38 = vpop.f32.mrf.mxu2 }
 0x79f   : > { %v3317_v62 = vadd.f32 %v3316_v38, %v3187_v20 }
 0x7a0   : > { %v3232_v56 = vpop.f32.mrf.mxu0 }
 0x7a1   : > { %v3233_v44 = vadd.f32 %v3232_v56, %v3192_v31 }
 0x7a2   : > { %v3284_v6 = vpop.f32.mrf.mxu3 }
 0x7a3   : > { %v3285_v2 = vadd.f32 %v3284_v6, %v3256_v47 }
 0x7a4   : > { %v3261_v54 = vpop.f32.mrf.mxu1 }
 0x7a5   : > { %v3486_v9 = vmul.f32 %v3478_v23, %v3285_v2  ;;  %v3262_v43 = vadd.f32 %v3261_v54, %v3233_v44  ;;  %v3565_v44 = vld [vmem:[%s5000_s30 + $0x10] sm:$0xf] }
 0x7a7   : > { %3513 = vrot.lane.b32.xlu0 %v3486_v9, %s4944_s21  ;;  %v3319_v57 = vpop.f32.mrf.mxu2 }
 0x7a8   : > { %v3320_v16 = vadd.f32 %v3319_v57, %v3192_v31  ;;  %v3579_v57 = vld [vmem:[%s5005_s10 + $0x8] sm:$0xf] }
 0x7ac   : > { %v3287_v60 = vpop.f32.mrf.mxu3 }
 0x7ad   : > { %v3288_v49 = vadd.f32 %v3287_v60, %v3259_v27 }
 0x7af   : > { %v3489_v63 = vmul.f32 %v3478_v23, %v3288_v49 }
 0x7b1   : > { %3519 = vrot.lane.b32.xlu0 %v3489_v63, %s4944_s21  ;;  %v3578_v63 = vld [vmem:[%s5005_s10] sm:$0xff] }
 0x7b3   : > { %v3339_v1 = vpop.f32.mrf.mxu0  ;;  %v3345_v13 = vpop.f32.mrf.mxu1 }
 0x7b4   : > { %v3290_v46 = vpop.f32.mrf.mxu3  ;;  %v3340_v3 = vadd.f32 %v3339_v1, %v3311_v18  ;;  %v3346_v25 = vadd.f32 %v3345_v13, %v3317_v62  ;;  %v3563_v1 = vld [vmem:[%s5000_s30] sm:$0xf] }
 0x7b5   : > { %v3291_v29 = vadd.f32 %v3290_v46, %v3262_v43 }
 0x7b7   : > { %v3492_v22 = vmul.f32 %v3478_v23, %v3291_v29 }
 0x7b9   : > { %3525 = vrot.lane.b32.xlu0 %v3492_v22, %s4944_s21 }
 0x7bb   : > { %v3348_v30 = vpop.f32.mrf.mxu1  ;;  %v3426_v11 = vpop.f32.mrf.mxu2 }
 0x7bc   : > { %v3342_v37 = vpop.f32.mrf.mxu0  ;;  %v3349_v2 = vadd.f32 %v3348_v30, %v3320_v16 }
 0x7bd   : > { %v3397_v14 = vpop.f32.mrf.mxu3  ;;  %v3343_v53 = vadd.f32 %v3342_v37, %v3314_v48 }
 0x7be   : > { %v3398_v8 = vadd.f32 %v3397_v14, %v3177_v34 }
 0x7c0   : > { %v3427_v42 = vadd.f32 %v3426_v11, %v3398_v8 }
 0x7c3   : > { %v3368_v39 = vpop.f32.mrf.mxu1  ;;  %v3429_v36 = vpop.f32.mrf.mxu2 }
 0x7c4   : > { %v3369_v45 = vadd.f32 %v3368_v39, %v3340_v3  ;;  %v3455_v33 = vpop.f32.mrf.mxu0 }
 0x7c5   : > { %v3456_v26 = vadd.f32 %v3455_v33, %v3427_v42  ;;  %v3400_v0 = vpop.f32.mrf.mxu3 }
 0x7c6   : > { %v3484_v17 = vmul.f32 %v3479_v52, %v3369_v45  ;;  %v3401_v4 = vadd.f32 %v3400_v0, %v3182_v10 }
 0x7c7   : > { %v3485_v28 = vmul.f32 %v7521_v21, %v3456_v26 }
 0x7c8   : > { %3509 = vrot.lane.b32.xlu1 %v3484_v17, %s4944_s21  ;;  %v3430_v7 = vadd.f32 %v3429_v36, %v3401_v4 }
 0x7c9   : > { %3511 = vrot.lane.b32.xlu2 %v3485_v28, %s4944_s21 }
 0x7cb   : > { %v3371_v40 = vpop.f32.mrf.mxu1  ;;  %v3432_v61 = vpop.f32.mrf.mxu2 }
 0x7cc   : > { %v3372_v58 = vadd.f32 %v3371_v40, %v3343_v53  ;;  %v3458_v24 = vpop.f32.mrf.mxu0 }
 0x7cd   : > { %v3459_v41 = vadd.f32 %v3458_v24, %v3430_v7  ;;  %v3403_v34 = vpop.f32.mrf.mxu3 }
 0x7ce   : > { %v3487_v32 = vmul.f32 %v3479_v52, %v3372_v58  ;;  %v3404_v51 = vadd.f32 %v3403_v34, %v3187_v20 }
 0x7cf   : > { %v3488_v55 = vmul.f32 %v7521_v21, %v3459_v41 }
 0x7d0   : > { %3515 = vrot.lane.b32.xlu1 %v3487_v32, %s4944_s21  ;;  %v3433_v23 = vadd.f32 %v3432_v61, %v3404_v51 }
 0x7d1   : > { %3517 = vrot.lane.b32.xlu2 %v3488_v55, %s4944_s21 }
 0x7d3   : > { %v3374_v50 = vpop.f32.mrf.mxu1  ;;  %v3435_v6 = vpop.f32.mrf.mxu2 }
 0x7d4   : > { %v3375_v12 = vadd.f32 %v3374_v50, %v3346_v25  ;;  %v3461_v10 = vpop.f32.mrf.mxu0 }
 0x7d5   : > { %v3462_v19 = vadd.f32 %v3461_v10, %v3433_v23  ;;  %v3406_v59 = vpop.f32.mrf.mxu3 }
 0x7d6   : > { %v3490_v15 = vmul.f32 %v3479_v52, %v3375_v12  ;;  %v3407_v5 = vadd.f32 %v3406_v59, %v3192_v31  ;;  %v3564_v31 = vld [vmem:[%s5000_s30 + $0x8] sm:$0xf] }
 0x7d7   : > { %v3491_v47 = vmul.f32 %v7521_v21, %v3462_v19  ;;  %v3582_v43 = vrot.slane %v3564_v31, 4 }
 0x7d8   : > { %3521 = vrot.lane.b32.xlu1 %v3490_v15, %s4944_s21  ;;  %v3436_v9 = vadd.f32 %v3435_v6, %v3407_v5 }
 0x7d9   : > { %3523 = vrot.lane.b32.xlu2 %v3491_v47, %s4944_s21  ;;  %v3583_v13 = vsel %vm3572_vm14, %v3563_v1, %v3582_v43 }
 0x7da   : > { %v3585_v46 = vsub.f32 %v3578_v63, %v3583_v13 }
 0x7db   : > { %v3377_v20 = vpop.f32.mrf.mxu1 }
 0x7dc   : > { %v3378_v35 = vadd.f32 %v3377_v20, %v3349_v2  ;;  %v3464_v38 = vpop.f32.mrf.mxu0  ;;  %3587 = vst [vmem:[%s5017_s16] sm:$0xff] %v3585_v46 }
 0x7dd   : > { %v3465_v27 = vadd.f32 %v3464_v38, %v3436_v9 }
 0x7de   : > { %v3493_v56 = vmul.f32 %v3479_v52, %v3378_v35 }
 0x7df   : > { %v3494_v54 = vmul.f32 %v7521_v21, %v3465_v27  ;;  %v3586_v21 = vsub.f32 %v3579_v57, %v3565_v44 }
 0x7e0   : > { %3527 = vrot.lane.b32.xlu1 %v3493_v56, %s4944_s21 }
 0x7e1   : > { %3529 = vrot.lane.b32.xlu2 %v3494_v54, %s4944_s21  ;;  %3588 = vst.msk [vmem:[%s5017_s16 + $0x8] sm:$0xf] %vm3576_vm15, %v3586_v21 }
 0x810   : > { %v3508_v60 = vpop.permute.xlu0 %3507 }
 0x811   : > { %3551 = vst.msk [vmem:[#allocation2] sm:$0xff] %vm1161_vm12, %v3508_v60 }
 0x818   : > { %v3589_v3 = vld [vmem:[#allocation2] sm:$0xf] }
 0x819   : > { %v3514_v49 = vpop.permute.xlu0 %3513  ;;  %v3566_v17 = vld [vmem:[#allocation2] sm:$0xf]  ;;  %v3592_v4 = vadd.f32 %v3589_v3, %v3563_v1 }
 0x81a   : > { %3554 = vst.msk [vmem:[#allocation2 + $0x18] sm:$0xff] %vm1161_vm12, %v3514_v49 }
 0x823   : > { %v3520_v29 = vpop.permute.xlu0 %3519  ;;  %v3512_v30 = vpop.permute.xlu2 %3511 }
 0x824   : > { %3557 = vst.msk [vmem:[#allocation2 + $0x30] sm:$0xff] %vm1161_vm12, %v3520_v29 }
 0x82b   : > { %v3526_v22 = vpop.permute.xlu0 %3525  ;;  %v3518_v8 = vpop.permute.xlu2 %3517 }
 0x82c   : > { %3560 = vst.msk [vmem:[#allocation2 + $0x48] sm:$0xff] %vm1161_vm12, %v3526_v22 }
 0x833   : > { %v3524_v7 = vpop.permute.xlu2 %3523 }
 0x83a   : > { %v3510_v11 = vpop.permute.xlu1 %3509 }
 0x83b   : > { %v3531_v37 = vsel %vm324_vm0, %v3508_v60, %v3510_v11  ;;  %v3532_v14 = vsel %vm324_vm0, %v3510_v11, %v3512_v30  ;;  %v3530_v34 = vpop.permute.xlu2 %3529 }
 0x83c   : > { %3552 = vst [vmem:[#allocation2 + $0x8] sm:$0xff] %v3531_v37 }
 0x83d   : > { %3553 = vst.msk [vmem:[#allocation2 + $0x10] sm:$0xff] %vm1164_vm13, %v3532_v14 }
 0x842   : > { %v3516_v18 = vpop.permute.xlu1 %3515 }
 0x843   : > { %v3567_v52 = vld [vmem:[#allocation2 + $0x8] sm:$0xf]  ;;  %v3533_v39 = vsel %vm324_vm0, %v3514_v49, %v3516_v18  ;;  %v3534_v45 = vsel %vm324_vm0, %v3516_v18, %v3518_v8 }
 0x844   : > { %v3590_v42 = vld [vmem:[#allocation2 + $0x8] sm:$0xf]  ;;  %v3568_v33 = vld [vmem:[#allocation2 + $0x10] sm:$0xf]  ;;  %v3571_v36 = vrot.slane %v3567_v52, 4  ;;  %3555 = vst [vmem:[#allocation2 + $0x20] sm:$0xff] %v3533_v39 }
 0x845   : > { %v3591_v26 = vld [vmem:[#allocation2 + $0x10] sm:$0xf]  ;;  %v3593_v0 = vadd.f32 %v3590_v42, %v3564_v31  ;;  %3577 = vst.msk [vmem:[%s5010_s13 + $0x8] sm:$0xf] %vm3576_vm15, %v3568_v33 }
 0x846   : > { %v3594_v28 = vadd.f32 %v3591_v26, %v3565_v44  ;;  %v3573_v48 = vsel %vm3572_vm14, %v3566_v17, %v3571_v36  ;;  %3556 = vst.msk [vmem:[#allocation2 + $0x28] sm:$0xff] %vm1164_vm13, %v3534_v45 }
 0x847   : > { %v3597_v53 = vrot.slane %v3593_v0, 4  ;;  %3575 = vst [vmem:[%s5010_s13] sm:$0xff] %v3573_v48 }
 0x848   : > { %3601 = vst.msk [vmem:[%s5022_s19 + $0x8] sm:$0xf] %vm3576_vm15, %v3594_v28 }
 0x849   : > { %v3598_v40 = vsel %vm3572_vm14, %v3592_v4, %v3597_v53 }
 0x84a   : > { %3600 = vst [vmem:[%s5022_s19] sm:$0xff] %v3598_v40  ;;  %v3522_v58 = vpop.permute.xlu1 %3521 }
 0x84b   : > { %v3535_v24 = vsel %vm324_vm0, %v3520_v29, %v3522_v58  ;;  %v3536_v41 = vsel %vm324_vm0, %v3522_v58, %v3524_v7 }
 0x84c   : > { %3558 = vst [vmem:[#allocation2 + $0x38] sm:$0xff] %v3535_v24 }
 0x84d   : > { %3559 = vst.msk [vmem:[#allocation2 + $0x40] sm:$0xff] %vm1164_vm13, %v3536_v41 }
 0x852   : > { %v3528_v32 = vpop.permute.xlu1 %3527 }
 0x853   : > { %v3537_v61 = vsel %vm324_vm0, %v3526_v22, %v3528_v32  ;;  %v3538_v55 = vsel %vm324_vm0, %v3528_v32, %v3530_v34 }
 0x854   : > { %3561 = vst [vmem:[#allocation2 + $0x50] sm:$0xff] %v3537_v61 }
 0x855   : > { %3562 = vst.msk [vmem:[#allocation2 + $0x58] sm:$0xff] %vm1164_vm13, %v3538_v55 }
 0x856 PF: > { %s18_s24 = sadd.s32 1, %s4918_s24  }
 0x857   : > { %p15_p5 = scmp.ge.s32.totalorder %s18_s24, 4  }
 0x859   :  { %17 = sbr.rel (!%p15_p5) target bundleno = 1 (0x1), region = 123 }

</bundles_post_ra>
